<compile_context>
chip_gen: v5e
topology: v5e:2x2
jax: 0.10.0
libtpu: 0.0.40
codegen_flags: <defaults>
</compile_context>

<pallas_src>
import functools

import jax
import jax.numpy as jnp
import numpy as np
from jax.experimental import pallas as pl
from jax.experimental.pallas import tpu as pltpu


def _contrastive_kernel(xi_ref, xj_ref, sqi_ref, sqj_ref, out_ref, acc_ref,
                        *, margin, tm, tn, n_valid):
    i = pl.program_id(0)
    j = pl.program_id(1)
    nj = pl.num_programs(1)

    @pl.when(j == 0)
    def _init():
        acc_ref[...] = jnp.zeros_like(acc_ref)

    # Skip tiles that contain no strictly-upper-triangular elements
    # (max global col in tile must exceed min global row in tile).
    @pl.when(j * tn + (tn - 1) > i * tm)
    def _compute():
        xi = xi_ref[...]                              # (tm, D), native dtype
        xj = xj_ref[...]                              # (tn, D), native dtype
        # Contract the last dim of BOTH operands -> no explicit xj.T transpose;
        # MXU accumulates in f32.
        gram = jax.lax.dot_general(
            xi, xj,
            dimension_numbers=(((1,), (1,)), ((), ())),
            preferred_element_type=jnp.float32)       # (tm, tn)

        sq_i = sqi_ref[...]                           # (tm, 1) f32, precomputed
        sq_j = sqj_ref[...]                           # (1, tn) f32, precomputed
        d2 = jnp.maximum(sq_i + sq_j - 2.0 * gram, 0.0)

        # EUP-friendly sqrt: d2 * rsqrt(d2 + eps) == sqrt(d2) (exact 0 at d2 == 0)
        dist = d2 * jax.lax.rsqrt(d2 + 1e-30)
        diff = margin - dist

        # Strict upper-triangular mask on GLOBAL indices + padding mask, and fold
        # the hinge clamp into the same select (diff <= 0 <=> d2 >= margin^2).
        row = i * tm + jax.lax.broadcasted_iota(jnp.int32, (tm, tn), 0)
        col = j * tn + jax.lax.broadcasted_iota(jnp.int32, (tm, tn), 1)
        keep = (d2 < margin * margin) & (col > row) & (col < n_valid)

        acc_ref[...] += jnp.where(keep, diff * diff, 0.0)

    @pl.when(j == nj - 1)
    def _finalize():
        total = jnp.sum(acc_ref[...])                 # one cross-lane reduce / row-block
        r = jax.lax.broadcasted_iota(jnp.int32, (8, 128), 0)
        c = jax.lax.broadcasted_iota(jnp.int32, (8, 128), 1)
        # Partial sum lives at [0, 0] of this row-block's output tile; rest is 0,
        # so a plain jnp.sum over the output recovers the loss.
        out_ref[0] = jnp.where((r == 0) & (c == 0), total, 0.0)


def contrastive_loss(x, *, margin=1.0, tile=256):
    """Forward of the PyTorch `contrastive_loss` module for a 2-D (N, D) input."""
    assert x.ndim == 2, "expects a 2-D (N, D) input (same as the PyTorch cdist case)"
    assert tile % 128 == 0, "tile must be a multiple of 128"
    N, D = x.shape
    tm = tn = tile

    # Pad N up to a tile multiple; padded rows/cols are masked out in-kernel.
    n_pad = ((N + tile - 1) // tile) * tile
    x_p = jnp.pad(x, ((0, n_pad - N), (0, 0))) if n_pad != N else x

    # Row norms computed ONCE (in f32) instead of per grid step.
    xf32 = x_p.astype(jnp.float32)
    sq = jnp.sum(xf32 * xf32, axis=-1)                # (n_pad,)
    sq_col = sq[:, None]                              # (n_pad, 1)
    sq_row = sq[None, :]                              # (1, n_pad)

    grid = (n_pad // tm, n_pad // tn)
    num_i = grid[0]

    kernel = functools.partial(
        _contrastive_kernel, margin=float(margin), tm=tm, tn=tn, n_valid=N)

    out = pl.pallas_call(
        kernel,
        # One (8,128) partial-sum tile per i row-block -> i can be "parallel"
        # (megacore on v7x) without racing on a shared scalar accumulator.
        out_shape=jax.ShapeDtypeStruct((num_i, 8, 128), jnp.float32),
        grid_spec=pltpu.PrefetchScalarGridSpec(
            num_scalar_prefetch=0,
            grid=grid,
            in_specs=[
                pl.BlockSpec((tm, D), lambda i, j: (i, 0)),   # xi rows
                pl.BlockSpec((tn, D), lambda i, j: (j, 0)),   # xj rows
                pl.BlockSpec((tm, 1), lambda i, j: (i, 0)),   # precomputed |xi|^2
                pl.BlockSpec((1, tn), lambda i, j: (0, j)),   # precomputed |xj|^2
            ],
            out_specs=pl.BlockSpec((1, 8, 128), lambda i, j: (i, 0, 0)),
            scratch_shapes=[pltpu.VMEM((tm, tn), jnp.float32)],
        ),
        compiler_params=pltpu.CompilerParams(
            dimension_semantics=("parallel", "arbitrary"),
        ),
    )(x_p, x_p, sq_col, sq_row)

    return jnp.sum(out)


def _reference(x, margin=1.0):
    x = x.astype(jnp.float32)
    sq = jnp.sum(x * x, axis=-1)
    d2 = jnp.maximum(sq[:, None] + sq[None, :] - 2.0 * (x @ x.T), 0.0)
    dist = jnp.sqrt(d2)
    loss = jnp.maximum(margin - dist, 0.0) ** 2
    return jnp.sum(jnp.triu(loss, k=1))


if __name__ == "__main__":
    key = jax.random.PRNGKey(0)
    # N=500 (not a tile multiple) deliberately exercises the padding/masking path.
    N, D = 500, 64
    # small scale so many pairwise distances fall below the margin
    x = 0.05 * jax.random.normal(key, (N, D), dtype=jnp.float32)

    out = contrastive_loss(x)
    jax.block_until_ready(out)

    ref = _reference(x)
    np.testing.assert_allclose(np.asarray(out), np.asarray(ref), rtol=1e-4, atol=1e-4)

    print("KERNEL_OK")
</pallas_src>

<mosaic_0001>
module attributes {stable_mosaic.version = 11 : i64} {
  func.func @_contrastive_kernel(%arg0: i32, %arg1: i32, %arg2: memref<256x64xf32, #tpu.memory_space<vmem>>, %arg3: memref<256x64xf32, #tpu.memory_space<vmem>>, %arg4: memref<256x1xf32, #tpu.memory_space<vmem>>, %arg5: memref<1x256xf32, #tpu.memory_space<vmem>>, %arg6: memref<1x8x128xf32, #tpu.memory_space<vmem>>, %arg7: memref<256x256xf32, #tpu.memory_space<vmem>>) attributes {dimension_semantics = [#tpu.dimension_semantics<parallel>, #tpu.dimension_semantics<arbitrary>], iteration_bounds = array<i64: 2, 2>, scalar_prefetch = 0 : i64, scratch_operands = 1 : i64, tpu.core_type = #tpu.core_type<tc>, window_params = [{transform_indices = @transform_0, window_bounds = array<i64: 256, 64>}, {transform_indices = @transform_1, window_bounds = array<i64: 256, 64>}, {transform_indices = @transform_2, window_bounds = array<i64: 256, 1>}, {transform_indices = @transform_3, window_bounds = array<i64: 1, 256>}, {transform_indices = @transform_4, window_bounds = array<i64: 1, 8, 128>}]} {
    %c0_i32 = arith.constant 0 : i32
    %0 = arith.cmpi eq, %arg1, %c0_i32 : i32
    %1 = arith.extui %0 : i1 to i32
    %c0_i32_0 = arith.constant 0 : i32
    %2 = arith.cmpi ne, %1, %c0_i32_0 : i32
    scf.if %2 {
      %cst = arith.constant 0.000000e+00 : f32
      %12 = vector.broadcast %cst : f32 to vector<256x256xf32>
      %c0 = arith.constant 0 : index
      %c0_4 = arith.constant 0 : index
      %13 = vector.load %arg7[%c0, %c0_4] : memref<256x256xf32, #tpu.memory_space<vmem>>, vector<256x256xf32>
      tpu.vector_store %arg7[%c0, %c0_4], %12 {strides = array<i32>} : memref<256x256xf32, #tpu.memory_space<vmem>>, vector<256x256xf32>,
    } else {
    }
    %c256_i32 = arith.constant 256 : i32
    %3 = arith.muli %arg1, %c256_i32 : i32
    %c255_i32 = arith.constant 255 : i32
    %4 = arith.addi %3, %c255_i32 : i32
    %c256_i32_1 = arith.constant 256 : i32
    %5 = arith.muli %arg0, %c256_i32_1 : i32
    %6 = arith.cmpi sgt, %4, %5 : i32
    %7 = arith.extui %6 : i1 to i32
    %c0_i32_2 = arith.constant 0 : i32
    %8 = arith.cmpi ne, %7, %c0_i32_2 : i32
    scf.if %8 {
      %c0 = arith.constant 0 : index
      %c0_4 = arith.constant 0 : index
      %12 = vector.load %arg2[%c0, %c0_4] : memref<256x64xf32, #tpu.memory_space<vmem>>, vector<256x64xf32>
      %c0_5 = arith.constant 0 : index
      %c0_6 = arith.constant 0 : index
      %13 = vector.load %arg3[%c0_5, %c0_6] : memref<256x64xf32, #tpu.memory_space<vmem>>, vector<256x64xf32>
      %cst = arith.constant dense<0.000000e+00> : vector<256x256xf32>
      %14 = tpu.matmul %12, %13, %cst {dimension_numbers = #tpu.dot_dimension_numbers<[1], [1], [0], [0], [0, 0, 1, 0], [], []>} : vector<256x64xf32>, vector<256x64xf32>, vector<256x256xf32> -> vector<256x256xf32>
      %c0_7 = arith.constant 0 : index
      %c0_8 = arith.constant 0 : index
      %15 = vector.load %arg4[%c0_7, %c0_8] : memref<256x1xf32, #tpu.memory_space<vmem>>, vector<256x1xf32>
      %c0_9 = arith.constant 0 : index
      %c0_10 = arith.constant 0 : index
      %16 = vector.load %arg5[%c0_9, %c0_10] : memref<1x256xf32, #tpu.memory_space<vmem>>, vector<1x256xf32>
      %17 = vector.broadcast %15 : vector<256x1xf32> to vector<256x256xf32>
      %18 = vector.broadcast %16 : vector<1x256xf32> to vector<256x256xf32>
      %19 = arith.addf %17, %18 : vector<256x256xf32>
      %cst_11 = arith.constant 2.000000e+00 : f32
      %20 = vector.broadcast %cst_11 : f32 to vector<256x256xf32>
      %21 = arith.mulf %20, %14 : vector<256x256xf32>
      %22 = arith.subf %19, %21 : vector<256x256xf32>
      %cst_12 = arith.constant 0.000000e+00 : f32
      %23 = vector.broadcast %cst_12 : f32 to vector<256x256xf32>
      %24 = arith.maximumf %22, %23 : vector<256x256xf32>
      %cst_13 = arith.constant 1.000000e-30 : f32
      %25 = vector.broadcast %cst_13 : f32 to vector<256x256xf32>
      %26 = arith.addf %24, %25 : vector<256x256xf32>
      %27 = math.rsqrt %26 : vector<256x256xf32>
      %28 = arith.mulf %24, %27 : vector<256x256xf32>
      %cst_14 = arith.constant 1.000000e+00 : f32
      %29 = vector.broadcast %cst_14 : f32 to vector<256x256xf32>
      %30 = arith.subf %29, %28 : vector<256x256xf32>
      %c256_i32_15 = arith.constant 256 : i32
      %31 = arith.muli %arg0, %c256_i32_15 : i32
      %32 = tpu.iota {dimensions = array<i32: 0>} : vector<256x256xi32>
      %33 = vector.broadcast %31 : i32 to vector<256x256xi32>
      %34 = arith.addi %33, %32 : vector<256x256xi32>
      %c256_i32_16 = arith.constant 256 : i32
      %35 = arith.muli %arg1, %c256_i32_16 : i32
      %36 = tpu.iota {dimensions = array<i32: 1>} : vector<256x256xi32>
      %37 = vector.broadcast %35 : i32 to vector<256x256xi32>
      %38 = arith.addi %37, %36 : vector<256x256xi32>
      %cst_17 = arith.constant 1.000000e+00 : f32
      %39 = vector.broadcast %cst_17 : f32 to vector<256x256xf32>
      %40 = arith.cmpf olt, %24, %39 : vector<256x256xf32>
      %41 = arith.cmpi sgt, %38, %34 : vector<256x256xi32>
      %42 = arith.andi %40, %41 : vector<256x256xi1>
      %c500_i32 = arith.constant 500 : i32
      %43 = vector.broadcast %c500_i32 : i32 to vector<256x256xi32>
      %44 = arith.cmpi slt, %38, %43 : vector<256x256xi32>
      %45 = arith.andi %42, %44 : vector<256x256xi1>
      %c0_18 = arith.constant 0 : index
      %c0_19 = arith.constant 0 : index
      %46 = vector.load %arg7[%c0_18, %c0_19] : memref<256x256xf32, #tpu.memory_space<vmem>>, vector<256x256xf32>
      %47 = arith.mulf %30, %30 : vector<256x256xf32>
      %cst_20 = arith.constant 0.000000e+00 : f32
      %48 = vector.broadcast %cst_20 : f32 to vector<256x256xf32>
      %49 = arith.select %45, %47, %48 : vector<256x256xi1>, vector<256x256xf32>
      %50 = arith.addf %46, %49 : vector<256x256xf32>
      %c0_21 = arith.constant 0 : index
      %c0_22 = arith.constant 0 : index
      %51 = vector.load %arg7[%c0_21, %c0_22] : memref<256x256xf32, #tpu.memory_space<vmem>>, vector<256x256xf32>
      tpu.vector_store %arg7[%c0_21, %c0_22], %50 {strides = array<i32>} : memref<256x256xf32, #tpu.memory_space<vmem>>, vector<256x256xf32>,
    } else {
    }
    %c1_i32 = arith.constant 1 : i32
    %9 = arith.cmpi eq, %arg1, %c1_i32 : i32
    %10 = arith.extui %9 : i1 to i32
    %c0_i32_3 = arith.constant 0 : i32
    %11 = arith.cmpi ne, %10, %c0_i32_3 : i32
    scf.if %11 {
      %c0 = arith.constant 0 : index
      %c0_4 = arith.constant 0 : index
      %12 = vector.load %arg7[%c0, %c0_4] : memref<256x256xf32, #tpu.memory_space<vmem>>, vector<256x256xf32>
      %13 = vector.shape_cast %12 : vector<256x256xf32> to vector<1x256x256xf32>
      %cst = arith.constant dense<0.000000e+00> : vector<1xf32>
      %14 = vector.multi_reduction <add>, %13, %cst [1, 2] : vector<1x256x256xf32> to vector<1xf32>
      %15 = vector.shape_cast %14 : vector<1xf32> to vector<1x1x1xf32>
      %16 = vector.extract %15[0, 0, 0] : f32 from vector<1x1x1xf32>
      %17 = tpu.iota {dimensions = array<i32: 0>} : vector<8x128xi32>
      %18 = tpu.iota {dimensions = array<i32: 1>} : vector<8x128xi32>
      %c0_i32_5 = arith.constant 0 : i32
      %19 = vector.broadcast %c0_i32_5 : i32 to vector<8x128xi32>
      %20 = arith.cmpi eq, %17, %19 : vector<8x128xi32>
      %c0_i32_6 = arith.constant 0 : i32
      %21 = vector.broadcast %c0_i32_6 : i32 to vector<8x128xi32>
      %22 = arith.cmpi eq, %18, %21 : vector<8x128xi32>
      %23 = arith.andi %20, %22 : vector<8x128xi1>
      %cst_7 = arith.constant 0.000000e+00 : f32
      %24 = vector.broadcast %16 : f32 to vector<8x128xf32>
      %25 = vector.broadcast %cst_7 : f32 to vector<8x128xf32>
      %26 = arith.select %23, %24, %25 : vector<8x128xi1>, vector<8x128xf32>
      %c0_8 = arith.constant 0 : index
      %c0_9 = arith.constant 0 : index
      %c0_10 = arith.constant 0 : index
      %27 = vector.load %arg6[%c0_8, %c0_9, %c0_10] : memref<1x8x128xf32, #tpu.memory_space<vmem>>, vector<1x8x128xf32>
      %28 = vector.shape_cast %27 : vector<1x8x128xf32> to vector<8x128xf32>
      %29 = vector.shape_cast %26 : vector<8x128xf32> to vector<1x8x128xf32>
      tpu.vector_store %arg6[%c0_8, %c0_9, %c0_10], %29 {strides = array<i32>} : memref<1x8x128xf32, #tpu.memory_space<vmem>>, vector<1x8x128xf32>,
    } else {
    }
    return
  }
  func.func @transform_0(%arg0: i32, %arg1: i32) -> (i32, i32) {
    %c0_i32 = arith.constant 0 : i32
    %c0_i32_0 = arith.constant 0 : i32
    return %arg0, %c0_i32 : i32, i32
  }
  func.func @transform_1(%arg0: i32, %arg1: i32) -> (i32, i32) {
    %c0_i32 = arith.constant 0 : i32
    %c0_i32_0 = arith.constant 0 : i32
    return %arg1, %c0_i32 : i32, i32
  }
  func.func @transform_2(%arg0: i32, %arg1: i32) -> (i32, i32) {
    %c0_i32 = arith.constant 0 : i32
    %c0_i32_0 = arith.constant 0 : i32
    return %arg0, %c0_i32 : i32, i32
  }
  func.func @transform_3(%arg0: i32, %arg1: i32) -> (i32, i32) {
    %c0_i32 = arith.constant 0 : i32
    %c0_i32_0 = arith.constant 0 : i32
    return %c0_i32, %arg1 : i32, i32
  }
  func.func @transform_4(%arg0: i32, %arg1: i32) -> (i32, i32, i32) {
    %c0_i32 = arith.constant 0 : i32
    %c0_i32_0 = arith.constant 0 : i32
    %c0_i32_1 = arith.constant 0 : i32
    return %arg0, %c0_i32, %c0_i32_0 : i32, i32, i32
  }
}

</mosaic_0001>

<bundles_post_ra>
// kernel: tpu_custom_call.1
= control target key start
LH: loop header
LB: loop body
LE: loop exit
PB: predicated region body
PF: predicated region fallthrough
CT: control target
= control target key end

     0   :  { %9 = vsyncpa [#allocation4], 0  ;;  %s6482_s0 = inlined_call_operand.vmem [shape: f32[512,64], index: 0, kind: input, shape index: {}]   ;;  %s6483_s1 = inlined_call_operand.vmem [shape: f32[512,64], index: 1, kind: input, shape index: {}]   ;;  %s6484_s2 = inlined_call_operand.vmem [shape: f32[512,1], index: 2, kind: input, shape index: {}]   ;;  %s6485_s3 = inlined_call_operand.vmem [shape: f32[1,512], index: 3, kind: input, shape index: {}]   ;;  %s6486_s4 = inlined_call_operand.hbm [shape: f32[2,8,128], index: 4, kind: output, shape index: {}]  }
   0x1   :  { %11 = vsyncpa [#allocation4 + $0x1], 0  ;;  %s3515_s15 = smov 0   ;;  %s3517_s16 = smov 0  }
   0x2   :  { %s3519_s17 = smov 0   ;;  %s3521_s18 = smov 0  }
   0x3   :  { %s3523_s19 = smov 0   ;;  %s3525_s20 = smov 0  }
   0x4   :  { %s3527_s21 = smov 0   ;;  %s3529_s22 = smov 0  }
   0x5 LB: > { %6491 = sst [smem:[#allocation6_spill]] %s3482_s21  ;;  %s3036_s23 = sadd.s32 4294967295, %s3486_s22   ;;  %s3486_s22 = sphi %s3529_s22, %s17_s22   ;;  %s3482_s21 = sphi %s3527_s21, %s6660_s21   ;;  %s3478_s20 = sphi %s3525_s20, %s6665_s20   ;;  %s3474_s19 = sphi %s3523_s19, %s6658_s19   ;;  %s3470_s18 = sphi %s3521_s18, %s6664_s18   ;;  %s3466_s17 = sphi %s3519_s17, %s6663_s17   ;;  %s3462_s16 = sphi %s3517_s16, %s6662_s16   ;;  %s3458_s15 = sphi %s3515_s15, %s6661_s15  }
   0x6   : > { %s3037_s24 = sadd.s32 4294967294, %s3486_s22   ;;  %s26_s25 = sadd.s32 1, %s3478_s20 }
   0x7   : > { %p27_p0 = scmp.ge.s32.totalorder %s26_s25, 2  ;;  %s29_s26 = sadd.s32 1, %s3482_s21 }
   0x8   : > { %p150_p1 = scmp.ne.s32.totalorder %s3466_s17, %s3462_s16  ;;  %p151_p2 = scmp.eq.s32.totalorder %s3036_s23, 3 }
   0x9   : > { %s6667_s25 = smov (%p27_p0, %s26_s25), 0  ;;  %s6669_s26 = smov (!%p27_p0, %s29_s26), %s3482_s21 }
   0xa   : > { %6492 = sst [smem:[#allocation7_spill]] %s6667_s25  ;;  %p3564_p3 = por %p151_p2, %p150_p1 }
   0xb   : > { %p156_p4 = scmp.ne.s32.totalorder %s3462_s16, %s3458_s15  ;;  %p31_p5 = scmp.ge.s32.totalorder %s6669_s26, 2 }
   0xc   : > { %p157_p6 = scmp.eq.s32.totalorder %s3037_s24, 3  ;;  %p3040_p7 = scmp.ge.s32.totalorder %s3486_s22, 1 }
   0xd   : > { %p210_p8 = scmp.lt.s32.totalorder %s3486_s22, 5  ;;  %s6671_s26 = smov (%p31_p5, %s6669_s26), 0 }
   0xe   : > { %6494 = sst [smem:[#allocation8_spill]] %s6671_s26  ;;  %p3574_p9 = por %p157_p6, %p156_p4 }
   0xf   : > { %p211_p10 = pnand %p3040_p7, %p210_p8  ;;  %s137_s29 = ssub.s32 %s3482_s21, %s6671_s26 }
  0x10   : > { %s140_s30 = sadd.s32 1, %s3466_s17  ;;  %p138_p11 = scmp.eq.s32.totalorder %s137_s29, 0 }
  0x11   : > { %214 = sbr.rel (%p211_p10) target bundleno = 1000 (0x3e8), region = 36  ;;  %s6487_s6 = sand.u32 (!%p211_p10), 1, %s3462_s16  }
  0x12   : > { %s3582_s5 = scalar_select %p138_p11, %s3466_s17, %s140_s30  }
  0x13   : > { %s3042_s7 = sshll.u32 (!%p211_p10), %s3474_s19, 5  ;;  %s3588_s8 = sshll.u32 (!%p211_p10), %s6487_s6, 3 }
  0x14   : > { %p251_p12 = scmp.lt.s32.totalorder (!%p211_p10), %s3042_s7, 63  ;;  %s3044_s9 = sshll.u32 (!%p211_p10), %s3470_s18, 5 }
  0x15   : > { %p257_p13 = scmp.lt.s32.totalorder (!%p211_p10), %s3044_s9, 63  ;;  %s3048_s10 = sshll.u32 (!%p211_p10), %s3470_s18, 1 }
  0x16   : > { %s6673_s7 = smov (!%p251_p12, %s3042_s7), 63  ;;  %p269_p0 = scmp.lt.s32.totalorder %s3048_s10, 3 }
  0x17   : > { %s3043_s11 = sshll.u32 %s6673_s7, 3  ;;  %s6675_s9 = smov (!%p257_p13, %s3044_s9), 63 }
  0x18   : > { %s3595_s14 = scalar_lea.vmem %s6482_s0, %s3043_s11  ;;  %s3600_s29 = scalar_lea.vmem %s6484_s2, %s3043_s11 }
  0x19   : > { %s6677_s10 = smov (!%p269_p0, %s3048_s10), 3  ;;  %s3045_s30 = sshll.u32 %s6675_s9, 3 }
  0x1a   : > { %s3607_s7 = scalar_lea.vmem %s6483_s1, %s3045_s30  ;;  %s271_s12 = scalar_lea.vmem %s6485_s3, %s6677_s10 }
  0x1b   : > { %s249_s13 = scalar_lea.vmem [#allocation3], %s3588_s8  ;;  %p3049_p1 = scmp.ne.s32.totalorder %s3470_s18, 0 }
  0x1d   : > { %276 = sbr.rel (%p3049_p1) target bundleno = 99 (0x63), region = 40 }
  0x22   : > { %v3488_v0 = vmov 0.0  }
  0x23   : > { %277 = vst [vmem:[#allocation2 + $0xb0] sm:$0xff] %v3488_v0 }
  0x24   : > { %278 = vst [vmem:[#allocation2 + $0x1b0] sm:$0xff] %v3488_v0 }
  0x25   : > { %279 = vst [vmem:[#allocation2 + $0xd8] sm:$0xff] %v3488_v0 }
  0x26   : > { %280 = vst [vmem:[#allocation2 + $0x18] sm:$0xff] %v3488_v0 }
  0x27   : > { %281 = vst [vmem:[#allocation2 + $0x50] sm:$0xff] %v3488_v0 }
  0x28   : > { %282 = vst [vmem:[#allocation2 + $0x168] sm:$0xff] %v3488_v0 }
  0x29   : > { %283 = vst [vmem:[#allocation2 + $0x130] sm:$0xff] %v3488_v0 }
  0x2a   : > { %284 = vst [vmem:[#allocation2 + $0x48] sm:$0xff] %v3488_v0 }
  0x2b   : > { %285 = vst [vmem:[#allocation2 + $0x180] sm:$0xff] %v3488_v0 }
  0x2c   : > { %286 = vst [vmem:[#allocation2 + $0x110] sm:$0xff] %v3488_v0 }
  0x2d   : > { %287 = vst [vmem:[#allocation2 + $0x118] sm:$0xff] %v3488_v0 }
  0x2e   : > { %288 = vst [vmem:[#allocation2 + $0x98] sm:$0xff] %v3488_v0 }
  0x2f   : > { %289 = vst [vmem:[#allocation2 + $0x120] sm:$0xff] %v3488_v0 }
  0x30   : > { %290 = vst [vmem:[#allocation2 + $0x150] sm:$0xff] %v3488_v0 }
  0x31   : > { %291 = vst [vmem:[#allocation2 + $0x108] sm:$0xff] %v3488_v0 }
  0x32   : > { %292 = vst [vmem:[#allocation2 + $0x60] sm:$0xff] %v3488_v0 }
  0x33   : > { %293 = vst [vmem:[#allocation2 + $0xe0] sm:$0xff] %v3488_v0 }
  0x34   : > { %294 = vst [vmem:[#allocation2 + $0x188] sm:$0xff] %v3488_v0 }
  0x35   : > { %295 = vst [vmem:[#allocation2 + $0x138] sm:$0xff] %v3488_v0 }
  0x36   : > { %296 = vst [vmem:[#allocation2 + $0x140] sm:$0xff] %v3488_v0 }
  0x37   : > { %297 = vst [vmem:[#allocation2 + $0x80] sm:$0xff] %v3488_v0 }
  0x38   : > { %298 = vst [vmem:[#allocation2 + $0x1a8] sm:$0xff] %v3488_v0 }
  0x39   : > { %299 = vst [vmem:[#allocation2 + $0x1b8] sm:$0xff] %v3488_v0 }
  0x3a   : > { %300 = vst [vmem:[#allocation2 + $0x28] sm:$0xff] %v3488_v0 }
  0x3b   : > { %301 = vst [vmem:[#allocation2 + $0x1e8] sm:$0xff] %v3488_v0 }
  0x3c   : > { %302 = vst [vmem:[#allocation2 + $0xf8] sm:$0xff] %v3488_v0 }
  0x3d   : > { %303 = vst [vmem:[#allocation2 + $0x160] sm:$0xff] %v3488_v0 }
  0x3e   : > { %304 = vst [vmem:[#allocation2 + $0x30] sm:$0xff] %v3488_v0 }
  0x3f   : > { %305 = vst [vmem:[#allocation2 + $0x1e0] sm:$0xff] %v3488_v0 }
  0x40   : > { %306 = vst [vmem:[#allocation2] sm:$0xff] %v3488_v0 }
  0x41   : > { %307 = vst [vmem:[#allocation2 + $0xf0] sm:$0xff] %v3488_v0 }
  0x42   : > { %308 = vst [vmem:[#allocation2 + $0x8] sm:$0xff] %v3488_v0 }
  0x43   : > { %309 = vst [vmem:[#allocation2 + $0x148] sm:$0xff] %v3488_v0 }
  0x44   : > { %310 = vst [vmem:[#allocation2 + $0x1d0] sm:$0xff] %v3488_v0 }
  0x45   : > { %311 = vst [vmem:[#allocation2 + $0x100] sm:$0xff] %v3488_v0 }
  0x46   : > { %312 = vst [vmem:[#allocation2 + $0xc8] sm:$0xff] %v3488_v0 }
  0x47   : > { %313 = vst [vmem:[#allocation2 + $0x40] sm:$0xff] %v3488_v0 }
  0x48   : > { %314 = vst [vmem:[#allocation2 + $0x1f8] sm:$0xff] %v3488_v0 }
  0x49   : > { %315 = vst [vmem:[#allocation2 + $0x20] sm:$0xff] %v3488_v0 }
  0x4a   : > { %316 = vst [vmem:[#allocation2 + $0x128] sm:$0xff] %v3488_v0 }
  0x4b   : > { %317 = vst [vmem:[#allocation2 + $0x1a0] sm:$0xff] %v3488_v0 }
  0x4c   : > { %318 = vst [vmem:[#allocation2 + $0x1f0] sm:$0xff] %v3488_v0 }
  0x4d   : > { %319 = vst [vmem:[#allocation2 + $0xe8] sm:$0xff] %v3488_v0 }
  0x4e   : > { %320 = vst [vmem:[#allocation2 + $0x78] sm:$0xff] %v3488_v0 }
  0x4f   : > { %321 = vst [vmem:[#allocation2 + $0x70] sm:$0xff] %v3488_v0 }
  0x50   : > { %322 = vst [vmem:[#allocation2 + $0x90] sm:$0xff] %v3488_v0 }
  0x51   : > { %323 = vst [vmem:[#allocation2 + $0x1d8] sm:$0xff] %v3488_v0 }
  0x52   : > { %324 = vst [vmem:[#allocation2 + $0xd0] sm:$0xff] %v3488_v0 }
  0x53   : > { %325 = vst [vmem:[#allocation2 + $0xb8] sm:$0xff] %v3488_v0 }
  0x54   : > { %326 = vst [vmem:[#allocation2 + $0x88] sm:$0xff] %v3488_v0 }
  0x55   : > { %327 = vst [vmem:[#allocation2 + $0xa8] sm:$0xff] %v3488_v0 }
  0x56   : > { %328 = vst [vmem:[#allocation2 + $0x1c8] sm:$0xff] %v3488_v0 }
  0x57   : > { %329 = vst [vmem:[#allocation2 + $0x170] sm:$0xff] %v3488_v0 }
  0x58   : > { %330 = vst [vmem:[#allocation2 + $0x178] sm:$0xff] %v3488_v0 }
  0x59   : > { %331 = vst [vmem:[#allocation2 + $0x68] sm:$0xff] %v3488_v0 }
  0x5a   : > { %332 = vst [vmem:[#allocation2 + $0x190] sm:$0xff] %v3488_v0 }
  0x5b   : > { %333 = vst [vmem:[#allocation2 + $0x198] sm:$0xff] %v3488_v0 }
  0x5c   : > { %334 = vst [vmem:[#allocation2 + $0x38] sm:$0xff] %v3488_v0 }
  0x5d   : > { %335 = vst [vmem:[#allocation2 + $0xc0] sm:$0xff] %v3488_v0 }
  0x5e   : > { %336 = vst [vmem:[#allocation2 + $0x1c0] sm:$0xff] %v3488_v0 }
  0x5f   : > { %337 = vst [vmem:[#allocation2 + $0x158] sm:$0xff] %v3488_v0 }
  0x60   : > { %338 = vst [vmem:[#allocation2 + $0x10] sm:$0xff] %v3488_v0 }
  0x61   : > { %339 = vst [vmem:[#allocation2 + $0x58] sm:$0xff] %v3488_v0 }
  0x62   : > { %340 = vst [vmem:[#allocation2 + $0xa0] sm:$0xff] %v3488_v0 }
  0x63 PF: > { %s3050_s21 = sshll.u32 %s3470_s18, 8  ;;  %s3051_s25 = sshll.u32 %s3474_s19, 8 }
  0x64   : > { %s342_s26 = sadd.s32 255, %s3050_s21 }
  0x65   : > { %p3052_p2 = scmp.le.s32.totalorder %s342_s26, %s3051_s25 }
  0x67   : > { %347 = sbr.rel (%p3052_p2) target bundleno = 669 (0x29d), region = 44 }
  0x6c   : > { %v395_v1 = vld [vmem:[%s3607_s7 + $0x78] sm:$0xff]  ;;  %vm412_vm0 = vcmask 523264   ;;  %v394_v3 = vld [vmem:[%s3607_s7 + $0x70] sm:$0xff]  ;;  %v393_v5 = vld [vmem:[%s3607_s7 + $0x68] sm:$0xff]  ;;  %v3489_v8 = vmov 0  }
  0x6d   : > { %v411_v2 = vld [vmem:[%s3607_s7 + $0xf8] sm:$0xff]  ;;  %3053 = vmatpush.xpose.msk.msra.mxu0 %vm412_vm0, %v395_v1  ;;  %3154 = vmatpush.xpose.msk.msra.mxu2 %vm412_vm0, %v395_v1  ;;  %v410_v4 = vld [vmem:[%s3607_s7 + $0xf0] sm:$0xff]  ;;  %v409_v7 = vld [vmem:[%s3607_s7 + $0xe8] sm:$0xff] }
  0x6e   : > { %3101 = vmatpush.xpose.msk.msra.mxu1 %vm412_vm0, %v411_v2  ;;  %3170 = vmatpush.xpose.msk.msra.mxu3 %vm412_vm0, %v411_v2  ;;  %v833_v6 = vld [vmem:[%s3600_s29 + $0x10] sm:$0xff]  ;;  %v831_v9 = vld [vmem:[%s3600_s29] sm:$0xff]  ;;  %v391_v12 = vld [vmem:[%s3607_s7 + $0x58] sm:$0xff] }
  0x6f   : > { %3262 = vset.pattern.permute.xlu1 %v3489_v8  ;;  %3261 = vset.pattern.permute.xlu0 %v3489_v8  ;;  %v392_v10 = vld [vmem:[%s3607_s7 + $0x60] sm:$0xff]  ;;  %v834_v13 = vld [vmem:[%s3600_s29 + $0x18] sm:$0xff]  ;;  %v832_v14 = vld [vmem:[%s3600_s29 + $0x8] sm:$0xff] }
  0x70   : > { %876 = vperm.xlu1 %3262, %v833_v6   ;;  %866 = vperm.xlu0 %3261, %v831_v9   ;;  %v408_v11 = vld [vmem:[%s3607_s7 + $0xe0] sm:$0xff]  ;;  %v407_v15 = vld [vmem:[%s3607_s7 + $0xd8] sm:$0xff]  ;;  %v390_v16 = vld [vmem:[%s3607_s7 + $0x50] sm:$0xff] }
  0x71   : > { %3054 = vmatpush.xpose.msk.msra.mxu0 %vm412_vm0, %v394_v3  ;;  %3155 = vmatpush.xpose.msk.msra.mxu2 %vm412_vm0, %v394_v3  ;;  %v406_v17 = vld [vmem:[%s3607_s7 + $0xd0] sm:$0xff]  ;;  %v389_v18 = vld [vmem:[%s3607_s7 + $0x48] sm:$0xff]  ;;  %v838_v19 = vld [vmem:[%s3600_s29 + $0x38] sm:$0xff] }
  0x72   : > { %3102 = vmatpush.xpose.msk.msra.mxu1 %vm412_vm0, %v410_v4  ;;  %3171 = vmatpush.xpose.msk.msra.mxu3 %vm412_vm0, %v410_v4  ;;  %v837_v20 = vld [vmem:[%s3600_s29 + $0x30] sm:$0xff]  ;;  %v405_v21 = vld [vmem:[%s3607_s7 + $0xc8] sm:$0xff]  ;;  %v388_v22 = vld [vmem:[%s3607_s7 + $0x40] sm:$0xff] }
  0x73   : > { %3263 = vset.pattern.permute.xlu2 %v3489_v8  ;;  %v404_v23 = vld [vmem:[%s3607_s7 + $0xc0] sm:$0xff]  ;;  %v387_v24 = vld [vmem:[%s3607_s7 + $0x38] sm:$0xff]  ;;  %v841_v26 = vld [vmem:[%s3600_s29 + $0x50] sm:$0xff] }
  0x74   : > { %v403_v25 = vld [vmem:[%s3607_s7 + $0xb8] sm:$0xff]  ;;  %v840_v27 = vld [vmem:[%s3600_s29 + $0x48] sm:$0xff]  ;;  %v386_v28 = vld [vmem:[%s3607_s7 + $0x30] sm:$0xff] }
  0x75   : > { %3055 = vmatpush.xpose.msk.msra.mxu0 %vm412_vm0, %v393_v5  ;;  %3156 = vmatpush.xpose.msk.msra.mxu2 %vm412_vm0, %v393_v5  ;;  %v402_v29 = vld [vmem:[%s3607_s7 + $0xb0] sm:$0xff]  ;;  %v385_v30 = vld [vmem:[%s3607_s7 + $0x28] sm:$0xff]  ;;  %v835_v32 = vld [vmem:[%s3600_s29 + $0x20] sm:$0xff] }
  0x76   : > { %3103 = vmatpush.xpose.msk.msra.mxu1 %vm412_vm0, %v409_v7  ;;  %3172 = vmatpush.xpose.msk.msra.mxu3 %vm412_vm0, %v409_v7  ;;  %v401_v31 = vld [vmem:[%s3607_s7 + $0xa8] sm:$0xff]  ;;  %v843_v34 = vld [vmem:[%s3600_s29 + $0x60] sm:$0xff]  ;;  %v383_v37 = vld [vmem:[%s3607_s7 + $0x18] sm:$0xff] }
  0x77   : > { %v844_v33 = vld [vmem:[%s3600_s29 + $0x68] sm:$0xff]  ;;  %v384_v35 = vld [vmem:[%s3607_s7 + $0x20] sm:$0xff]  ;;  %886 = vperm.xlu2 %3263, %v835_v32   ;;  %v399_v38 = vld [vmem:[%s3607_s7 + $0x98] sm:$0xff] }
  0x78   : > { %881 = vperm.xlu1 %3262, %v834_v13   ;;  %871 = vperm.xlu0 %3261, %v832_v14   ;;  %v400_v36 = vld [vmem:[%s3607_s7 + $0xa0] sm:$0xff]  ;;  %v836_v39 = vld [vmem:[%s3600_s29 + $0x28] sm:$0xff]  ;;  %v846_v41 = vld [vmem:[%s3600_s29 + $0x78] sm:$0xff] }
  0x79   : > { %3056 = vmatpush.xpose.msk.msra.mxu0 %vm412_vm0, %v392_v10  ;;  %3157 = vmatpush.xpose.msk.msra.mxu2 %vm412_vm0, %v392_v10  ;;  %v847_v40 = vld [vmem:[%s3600_s29 + $0x80] sm:$0xff]  ;;  %v382_v42 = vld [vmem:[%s3607_s7 + $0x10] sm:$0xff]  ;;  %v381_v44 = vld [vmem:[%s3607_s7 + $0x8] sm:$0xff] }
  0x7a   : > { %3104 = vmatpush.xpose.msk.msra.mxu1 %vm412_vm0, %v408_v11  ;;  %3173 = vmatpush.xpose.msk.msra.mxu3 %vm412_vm0, %v408_v11  ;;  %v398_v43 = vld [vmem:[%s3607_s7 + $0x90] sm:$0xff]  ;;  %v397_v45 = vld [vmem:[%s3607_s7 + $0x88] sm:$0xff]  ;;  %v839_v46 = vld [vmem:[%s3600_s29 + $0x40] sm:$0xff] }
  0x7b   : > { %v850_v47 = vld [vmem:[%s3600_s29 + $0x98] sm:$0xff]  ;;  %v849_v48 = vld [vmem:[%s3600_s29 + $0x90] sm:$0xff]  ;;  %v380_v49 = vld [vmem:[%s3607_s7] sm:$0xff] }
  0x7c   : > { %v396_v50 = vld [vmem:[%s3607_s7 + $0x80] sm:$0xff]  ;;  %v842_v53 = vld [vmem:[%s3600_s29 + $0x58] sm:$0xff]  ;;  %v853_v54 = vld [vmem:[%s3600_s29 + $0xb0] sm:$0xff] }
  0x7d   : > { %3057 = vmatpush.xpose.msk.msra.mxu0 %vm412_vm0, %v391_v12  ;;  %3158 = vmatpush.xpose.msk.msra.mxu2 %vm412_vm0, %v391_v12  ;;  %v348_v51 = vld [vmem:[%s3595_s14] sm:$0xff]  ;;  %v852_v55 = vld [vmem:[%s3600_s29 + $0xa8] sm:$0xff]  ;;  %v845_v58 = vld [vmem:[%s3600_s29 + $0x70] sm:$0xff] }
  0x7e   : > { %3105 = vmatpush.xpose.msk.msra.mxu1 %vm412_vm0, %v407_v15  ;;  %3174 = vmatpush.xpose.msk.msra.mxu3 %vm412_vm0, %v407_v15  ;;  %v364_v52 = vld [vmem:[%s3595_s14 + $0x80] sm:$0xff]  ;;  %v349_v56 = vld [vmem:[%s3595_s14 + $0x8] sm:$0xff]  ;;  %v350_v61 = vld [vmem:[%s3595_s14 + $0x10] sm:$0xff] }
  0x7f   : > { %891 = vperm.xlu2 %3263, %v836_v39   ;;  %v365_v57 = vld [vmem:[%s3595_s14 + $0x88] sm:$0xff]  ;;  %v855_v60 = vld [vmem:[%s3600_s29 + $0xc0] sm:$0xff]  ;;  %v366_v62 = vld [vmem:[%s3595_s14 + $0x90] sm:$0xff] }
  0x80   : > { %901 = vperm.xlu1 %3262, %v838_v19   ;;  %896 = vperm.xlu0 %3261, %v837_v20   ;;  %v856_v59 = vld [vmem:[%s3600_s29 + $0xc8] sm:$0xff]  ;;  %v859_v0 = vld [vmem:[%s3600_s29 + $0xe0] sm:$0xff]  ;;  %v858_v1 = vld [vmem:[%s3600_s29 + $0xd8] sm:$0xff] }
  0x81   : > { %3058 = vmatpush.xpose.msk.msra.mxu0 %vm412_vm0, %v390_v16  ;;  %3159 = vmatpush.xpose.msk.msra.mxu2 %vm412_vm0, %v390_v16  ;;  %v848_v63 = vld [vmem:[%s3600_s29 + $0x88] sm:$0xff]  ;;  %v351_v2 = vld [vmem:[%s3595_s14 + $0x18] sm:$0xff]  ;;  %v861_v5 = vld [vmem:[%s3600_s29 + $0xf0] sm:$0xff] }
  0x82   : > { %3106 = vmatpush.xpose.msk.msra.mxu1 %vm412_vm0, %v406_v17  ;;  %3175 = vmatpush.xpose.msk.msra.mxu3 %vm412_vm0, %v406_v17  ;;  %v367_v3 = vld [vmem:[%s3595_s14 + $0x98] sm:$0xff]  ;;  %v352_v6 = vld [vmem:[%s3595_s14 + $0x20] sm:$0xff]  ;;  %v353_v9 = vld [vmem:[%s3595_s14 + $0x28] sm:$0xff] }
  0x83   : > { %v862_v4 = vld [vmem:[%s3600_s29 + $0xf8] sm:$0xff]  ;;  %v368_v7 = vld [vmem:[%s3595_s14 + $0xa0] sm:$0xff]  ;;  %v369_v10 = vld [vmem:[%s3595_s14 + $0xa8] sm:$0xff] }
  0x84   : > { %v851_v8 = vld [vmem:[%s3600_s29 + $0xa0] sm:$0xff]  ;;  %v854_v11 = vld [vmem:[%s3600_s29 + $0xb8] sm:$0xff]  ;;  %v354_v12 = vld [vmem:[%s3595_s14 + $0x30] sm:$0xff] }
  0x85   : > { %3059 = vmatpush.xpose.msk.msra.mxu0 %vm412_vm0, %v389_v18  ;;  %3160 = vmatpush.xpose.msk.msra.mxu2 %vm412_vm0, %v389_v18  ;;  %v370_v13 = vld [vmem:[%s3595_s14 + $0xb0] sm:$0xff]  ;;  %v355_v15 = vld [vmem:[%s3595_s14 + $0x38] sm:$0xff]  ;;  %v860_v17 = vld [vmem:[%s3600_s29 + $0xe8] sm:$0xff] }
  0x86   : > { %3107 = vmatpush.xpose.msk.msra.mxu1 %vm412_vm0, %v405_v21  ;;  %3176 = vmatpush.xpose.msk.msra.mxu3 %vm412_vm0, %v405_v21  ;;  %v857_v14 = vld [vmem:[%s3600_s29 + $0xd0] sm:$0xff]  ;;  %v371_v16 = vld [vmem:[%s3595_s14 + $0xb8] sm:$0xff]  ;;  %v356_v18 = vld [vmem:[%s3595_s14 + $0x40] sm:$0xff] }
  0x87   : > { %906 = vperm.xlu2 %3263, %v839_v46   ;;  %v372_v19 = vld [vmem:[%s3595_s14 + $0xc0] sm:$0xff]  ;;  %v357_v20 = vld [vmem:[%s3595_s14 + $0x48] sm:$0xff]  ;;  %v378_v39 = vld [vmem:[%s3595_s14 + $0xf0] sm:$0xff] }
  0x88   : > { %916 = vperm.xlu1 %3262, %v841_v26   ;;  %911 = vperm.xlu0 %3261, %v840_v27   ;;  %v373_v21 = vld [vmem:[%s3595_s14 + $0xc8] sm:$0xff]  ;;  %v375_v26 = vld [vmem:[%s3595_s14 + $0xd8] sm:$0xff] }
  0x89   : > { %3060 = vmatpush.xpose.msk.msra.mxu0 %vm412_vm0, %v388_v22  ;;  %3161 = vmatpush.xpose.msk.msra.mxu2 %vm412_vm0, %v388_v22  ;;  %v358_v22 = vld [vmem:[%s3595_s14 + $0x50] sm:$0xff] }
  0x8a   : > { %3108 = vmatpush.xpose.msk.msra.mxu1 %vm412_vm0, %v404_v23  ;;  %3177 = vmatpush.xpose.msk.msra.mxu3 %vm412_vm0, %v404_v23  ;;  %v374_v23 = vld [vmem:[%s3595_s14 + $0xd0] sm:$0xff] }
  0x8d   : > { %3061 = vmatpush.xpose.msk.msra.mxu0 %vm412_vm0, %v387_v24  ;;  %3162 = vmatpush.xpose.msk.msra.mxu2 %vm412_vm0, %v387_v24 }
  0x8e   : > { %3109 = vmatpush.xpose.msk.msra.mxu1 %vm412_vm0, %v403_v25  ;;  %3178 = vmatpush.xpose.msk.msra.mxu3 %vm412_vm0, %v403_v25  ;;  %v359_v25 = vld [vmem:[%s3595_s14 + $0x58] sm:$0xff] }
  0x8f   : > { %921 = vperm.xlu2 %3263, %v842_v53  }
  0x90   : > { %931 = vperm.xlu1 %3262, %v844_v33   ;;  %926 = vperm.xlu0 %3261, %v843_v34   ;;  %v361_v33 = vld [vmem:[%s3595_s14 + $0x68] sm:$0xff] }
  0x91   : > { %3062 = vmatpush.xpose.msk.msra.mxu0 %vm412_vm0, %v386_v28  ;;  %3163 = vmatpush.xpose.msk.msra.mxu2 %vm412_vm0, %v386_v28  ;;  %v377_v34 = vld [vmem:[%s3595_s14 + $0xe8] sm:$0xff] }
  0x92   : > { %3110 = vmatpush.xpose.msk.msra.mxu1 %vm412_vm0, %v402_v29  ;;  %3179 = vmatpush.xpose.msk.msra.mxu3 %vm412_vm0, %v402_v29  ;;  %v360_v29 = vld [vmem:[%s3595_s14 + $0x60] sm:$0xff] }
  0x95   : > { %3063 = vmatpush.xpose.msk.msra.mxu0 %vm412_vm0, %v385_v30  ;;  %3164 = vmatpush.xpose.msk.msra.mxu2 %vm412_vm0, %v385_v30  ;;  %v376_v30 = vld [vmem:[%s3595_s14 + $0xe0] sm:$0xff] }
  0x96   : > { %3111 = vmatpush.xpose.msk.msra.mxu1 %vm412_vm0, %v401_v31  ;;  %3180 = vmatpush.xpose.msk.msra.mxu3 %vm412_vm0, %v401_v31 }
  0x97   : > { %936 = vperm.xlu2 %3263, %v845_v58  }
  0x98   : > { %946 = vperm.xlu1 %3262, %v847_v40   ;;  %941 = vperm.xlu0 %3261, %v846_v41   ;;  %v863_v41 = vld [vmem:[%s271_s12] sm:$0x3] }
  0x99   : > { %3064 = vmatpush.xpose.msk.msra.mxu0 %vm412_vm0, %v384_v35  ;;  %3165 = vmatpush.xpose.msk.msra.mxu2 %vm412_vm0, %v384_v35  ;;  %v3918_v46 = vperm.slane %v863_v41, 0 }
  0x9a   : > { %3112 = vmatpush.xpose.msk.msra.mxu1 %vm412_vm0, %v400_v36  ;;  %3181 = vmatpush.xpose.msk.msra.mxu3 %vm412_vm0, %v400_v36 }
  0x9d   : > { %3065 = vmatpush.xpose.msk.msra.mxu0 %vm412_vm0, %v383_v37  ;;  %3166 = vmatpush.xpose.msk.msra.mxu2 %vm412_vm0, %v383_v37 }
  0x9e   : > { %3113 = vmatpush.xpose.msk.msra.mxu1 %vm412_vm0, %v399_v38  ;;  %3182 = vmatpush.xpose.msk.msra.mxu3 %vm412_vm0, %v399_v38  ;;  %v362_v38 = vld [vmem:[%s3595_s14 + $0x70] sm:$0xff] }
  0x9f   : > { %951 = vperm.xlu2 %3263, %v848_v63  }
  0xa0   : > { %961 = vperm.xlu1 %3262, %v850_v47   ;;  %956 = vperm.xlu0 %3261, %v849_v48   ;;  %v3922_v47 = vperm.slane %v863_v41, 1 }
  0xa1   : > { %3066 = vmatpush.xpose.msk.msra.mxu0 %vm412_vm0, %v382_v42  ;;  %3167 = vmatpush.xpose.msk.msra.mxu2 %vm412_vm0, %v382_v42  ;;  %v363_v42 = vld [vmem:[%s3595_s14 + $0x78] sm:$0xff] }
  0xa2   : > { %3114 = vmatpush.xpose.msk.msra.mxu1 %vm412_vm0, %v398_v43  ;;  %3183 = vmatpush.xpose.msk.msra.mxu3 %vm412_vm0, %v398_v43  ;;  %v379_v43 = vld [vmem:[%s3595_s14 + $0xf8] sm:$0xff] }
  0xa5   : > { %3067 = vmatpush.xpose.msk.msra.mxu0 %vm412_vm0, %v381_v44  ;;  %3168 = vmatpush.xpose.msk.msra.mxu2 %vm412_vm0, %v381_v44 }
  0xa6   : > { %3115 = vmatpush.xpose.msk.msra.mxu1 %vm412_vm0, %v397_v45  ;;  %3184 = vmatpush.xpose.msk.msra.mxu3 %vm412_vm0, %v397_v45 }
  0xa7   : > { %966 = vperm.xlu2 %3263, %v851_v8  }
  0xa8   : > { %976 = vperm.xlu1 %3262, %v853_v54   ;;  %971 = vperm.xlu0 %3261, %v852_v55  }
  0xa9   : > { %3068 = vmatpush.xpose.msk.msra.mxu0 %vm412_vm0, %v380_v49  ;;  %3169 = vmatpush.xpose.msk.msra.mxu2 %vm412_vm0, %v380_v49  ;;  %v2117_v49 = vlaneseq }
  0xaa   : > { %3116 = vmatpush.xpose.msk.msra.mxu1 %vm412_vm0, %v396_v50  ;;  %3185 = vmatpush.xpose.msk.msra.mxu3 %vm412_vm0, %v396_v50 }
  0xac   : > { %3069 = vmatmul.msk.f32.vlgmr.msra.gmra.mxu0 %vm412_vm0, %v348_v51  ;;  %3085 = vmatmul.msk.f32.vlgmr.msra.gmra.mxu2 %vm412_vm0, %v364_v52 }
  0xad   : > { %3117 = vmatmul.msk.f32.vlgmr.msra.gmra.mxu1 %vm412_vm0, %v348_v51  ;;  %3133 = vmatmul.msk.f32.vlgmr.msra.gmra.mxu3 %vm412_vm0, %v364_v52 }
  0xaf   : > { %981 = vperm.xlu2 %3263, %v854_v11  }
  0xb0   : > { %991 = vperm.xlu1 %3262, %v856_v59   ;;  %986 = vperm.xlu0 %3261, %v855_v60  }
  0xb4   : > { %3070 = vmatmul.msk.f32.gmra.mxu0 %vm412_vm0, %v349_v56  ;;  %3086 = vmatmul.msk.f32.gmra.mxu2 %vm412_vm0, %v365_v57 }
  0xb5   : > { %3118 = vmatmul.msk.f32.gmra.mxu1 %vm412_vm0, %v349_v56  ;;  %3134 = vmatmul.msk.f32.gmra.mxu3 %vm412_vm0, %v365_v57 }
  0xb7   : > { %996 = vperm.xlu2 %3263, %v857_v14   ;;  %v3975_v14 = vstv %s3051_s25 }
  0xb8   : > { %1006 = vperm.xlu1 %3262, %v859_v0   ;;  %1001 = vperm.xlu0 %3261, %v858_v1  }
  0xbc   : > { %3071 = vmatmul.msk.f32.gmra.mxu0 %vm412_vm0, %v350_v61  ;;  %3087 = vmatmul.msk.f32.gmra.mxu2 %vm412_vm0, %v366_v62 }
  0xbd   : > { %3119 = vmatmul.msk.f32.gmra.mxu1 %vm412_vm0, %v350_v61  ;;  %3135 = vmatmul.msk.f32.gmra.mxu3 %vm412_vm0, %v366_v62 }
  0xbf   : > { %1011 = vperm.xlu2 %3263, %v860_v17  }
  0xc0   : > { %1021 = vperm.xlu1 %3262, %v862_v4   ;;  %1016 = vperm.xlu0 %3261, %v861_v5   ;;  %v2184_v4 = vand.u32 127, %v2117_v49 }
  0xc4   : > { %3072 = vmatmul.msk.f32.gmra.mxu0 %vm412_vm0, %v351_v2  ;;  %3088 = vmatmul.msk.f32.gmra.mxu2 %vm412_vm0, %v367_v3 }
  0xc5   : > { %3120 = vmatmul.msk.f32.gmra.mxu1 %vm412_vm0, %v351_v2  ;;  %3136 = vmatmul.msk.f32.gmra.mxu3 %vm412_vm0, %v367_v3 }
  0xcc   : > { %3073 = vmatmul.msk.f32.gmra.mxu0 %vm412_vm0, %v352_v6  ;;  %3089 = vmatmul.msk.f32.gmra.mxu2 %vm412_vm0, %v368_v7 }
  0xcd   : > { %3121 = vmatmul.msk.f32.gmra.mxu1 %vm412_vm0, %v352_v6  ;;  %3137 = vmatmul.msk.f32.gmra.mxu3 %vm412_vm0, %v368_v7  ;;  %v3959_v7 = vshrl.u32 %v2117_v49, 7 }
  0xd1   : > { %v887_v27 = vpop.permute.xlu2 %886 }
  0xd2   : > { %v3941_v59 = vadd.f32 %v3918_v46, %v887_v27  ;;  %v3948_v1 = vadd.f32 %v3922_v47, %v887_v27 }
  0xd4   : > { %3074 = vmatmul.msk.f32.gmra.mxu0 %vm412_vm0, %v353_v9  ;;  %3090 = vmatmul.msk.f32.gmra.mxu2 %vm412_vm0, %v369_v10 }
  0xd5   : > { %3122 = vmatmul.msk.f32.gmra.mxu1 %vm412_vm0, %v353_v9  ;;  %3138 = vmatmul.msk.f32.gmra.mxu3 %vm412_vm0, %v369_v10 }
  0xd9   : > { %v892_v31 = vpop.permute.xlu2 %891 }
  0xda   : > { %v3962_v9 = vadd.f32 %v3918_v46, %v892_v31 }
  0xdc   : > { %3075 = vmatmul.msk.f32.gmra.mxu0 %vm412_vm0, %v354_v12  ;;  %3091 = vmatmul.msk.f32.gmra.mxu2 %vm412_vm0, %v370_v13 }
  0xdd   : > { %3123 = vmatmul.msk.f32.gmra.mxu1 %vm412_vm0, %v354_v12  ;;  %3139 = vmatmul.msk.f32.gmra.mxu3 %vm412_vm0, %v370_v13  ;;  %v3971_v13 = vadd.f32 %v3922_v47, %v892_v31 }
  0xe1   : > { %v3897_v36 = vpop.permute.xlu2 %906 }
  0xe2   : > { %v877_v24 = vpop.permute.xlu1 %876  ;;  %v867_v35 = vpop.permute.xlu0 %866 }
  0xe3   : > { %v1029_v48 = vadd.f32 %v3918_v46, %v867_v35  ;;  %v3928_v50 = vadd.f32 %v3918_v46, %v877_v24  ;;  %v1030_v51 = vadd.f32 %v3922_v47, %v867_v35  ;;  %v3932_v53 = vadd.f32 %v3922_v47, %v877_v24 }
  0xe4   : > { %3076 = vmatmul.msk.f32.gmra.mxu0 %vm412_vm0, %v355_v15  ;;  %3092 = vmatmul.msk.f32.gmra.mxu2 %vm412_vm0, %v371_v16  ;;  %v4003_v35 = vadd.f32 %v3922_v47, %v3897_v36 }
  0xe5   : > { %3124 = vmatmul.msk.f32.gmra.mxu1 %vm412_vm0, %v355_v15  ;;  %3140 = vmatmul.msk.f32.gmra.mxu3 %vm412_vm0, %v371_v16 }
  0xe9   : > { %v3914_v44 = vpop.permute.xlu2 %921 }
  0xea   : > { %v882_v28 = vpop.permute.xlu1 %881  ;;  %v872_v40 = vpop.permute.xlu0 %871 }
  0xeb   : > { %v3935_v54 = vadd.f32 %v3918_v46, %v882_v28  ;;  %v3938_v55 = vadd.f32 %v3922_v47, %v882_v28  ;;  %v1031_v60 = vadd.f32 %v3918_v46, %v872_v40  ;;  %v1032_v61 = vadd.f32 %v3922_v47, %v872_v40 }
  0xec   : > { %3077 = vmatmul.msk.f32.gmra.mxu0 %vm412_vm0, %v356_v18  ;;  %3093 = vmatmul.msk.f32.gmra.mxu2 %vm412_vm0, %v372_v19  ;;  %v3996_v28 = vadd.s32 %v3975_v14, %v3959_v7 }
  0xed   : > { %3125 = vmatmul.msk.f32.gmra.mxu1 %vm412_vm0, %v356_v18  ;;  %3141 = vmatmul.msk.f32.gmra.mxu3 %vm412_vm0, %v372_v19  ;;  %v2186_v19 = vstv %s3050_s21 }
  0xf1   : > { %v3945_v63 = vpop.permute.xlu2 %936 }
  0xf2   : > { %v902_v32 = vpop.permute.xlu1 %901  ;;  %v897_v56 = vpop.permute.xlu0 %896 }
  0xf3   : > { %v3951_v2 = vadd.f32 %v3918_v46, %v902_v32  ;;  %v3954_v5 = vadd.f32 %v3922_v47, %v902_v32  ;;  %v3957_v6 = vadd.f32 %v3918_v46, %v897_v56  ;;  %v3965_v10 = vadd.f32 %v3922_v47, %v897_v56 }
  0xf4   : > { %3078 = vmatmul.msk.f32.gmra.mxu0 %vm412_vm0, %v357_v20  ;;  %3094 = vmatmul.msk.f32.gmra.mxu2 %vm412_vm0, %v373_v21  ;;  %v3998_v32 = vadd.s32 %v2186_v19, %v2184_v4 }
  0xf5   : > { %3126 = vmatmul.msk.f32.gmra.mxu1 %vm412_vm0, %v357_v20  ;;  %3142 = vmatmul.msk.f32.gmra.mxu3 %vm412_vm0, %v373_v21  ;;  %v2185_v20 = vadd.s32 128, %v2184_v4 }
  0xf6   : > { %vm2253_vm1 = vcmp.gt.s32.totalorder %v3998_v32, %v3996_v28  ;;  %vm2381_vm4 = vcmp.lt.s32.totalorder %v3998_v32, 500 }
  0xfa   : > { %v3899_v37 = vpop.permute.xlu1 %916 }
  0xfb   : > { %v4011_v41 = vadd.f32 %v3918_v46, %v3899_v37 }
  0xfc   : > { %3079 = vmatmul.msk.f32.gmra.mxu0 %vm412_vm0, %v358_v22  ;;  %3095 = vmatmul.msk.f32.gmra.mxu2 %vm412_vm0, %v374_v23 }
  0xfd   : > { %3127 = vmatmul.msk.f32.gmra.mxu1 %vm412_vm0, %v358_v22  ;;  %3143 = vmatmul.msk.f32.gmra.mxu3 %vm412_vm0, %v374_v23  ;;  %v3987_v23 = vadd.f32 %v3918_v46, %v3897_v36  ;;  %6496 = vst [vmem:[#allocation9_spill] sm:$0xff] %v4011_v41  ;;  %v4020_v36 = vadd.f32 %v3922_v47, %v3899_v37 }
  0xff   : > { %6497 = vst [vmem:[#allocation10_spill] sm:$0xff] %v4020_v36 }
 0x102   : > { %v3916_v45 = vpop.permute.xlu1 %931 }
 0x104   : > { %3080 = vmatmul.msk.f32.gmra.mxu0 %vm412_vm0, %v359_v25  ;;  %3096 = vmatmul.msk.f32.gmra.mxu2 %vm412_vm0, %v375_v26 }
 0x105   : > { %3128 = vmatmul.msk.f32.gmra.mxu1 %vm412_vm0, %v359_v25  ;;  %3144 = vmatmul.msk.f32.gmra.mxu3 %vm412_vm0, %v375_v26  ;;  %v2134_v25 = vadd.s32 128, %v3959_v7 }
 0x10a   : > { %v947_v0 = vpop.permute.xlu1 %946 }
 0x10b   : > { %v1061_v12 = vadd.f32 %v3918_v46, %v947_v0  ;;  %v1062_v16 = vadd.f32 %v3922_v47, %v947_v0 }
 0x10c   : > { %3081 = vmatmul.msk.f32.gmra.mxu0 %vm412_vm0, %v360_v29  ;;  %3097 = vmatmul.msk.f32.gmra.mxu2 %vm412_vm0, %v376_v30 }
 0x10d   : > { %3129 = vmatmul.msk.f32.gmra.mxu1 %vm412_vm0, %v360_v29  ;;  %3145 = vmatmul.msk.f32.gmra.mxu3 %vm412_vm0, %v376_v30 }
 0x114   : > { %3082 = vmatmul.msk.f32.gmra.mxu0 %vm412_vm0, %v361_v33  ;;  %3098 = vmatmul.msk.f32.gmra.mxu2 %vm412_vm0, %v377_v34 }
 0x115   : > { %3130 = vmatmul.msk.f32.gmra.mxu1 %vm412_vm0, %v361_v33  ;;  %3146 = vmatmul.msk.f32.gmra.mxu3 %vm412_vm0, %v377_v34 }
 0x11c   : > { %3083 = vmatmul.msk.f32.gmra.mxu0 %vm412_vm0, %v362_v38  ;;  %3099 = vmatmul.msk.f32.gmra.mxu2 %vm412_vm0, %v378_v39 }
 0x11d   : > { %3131 = vmatmul.msk.f32.gmra.mxu1 %vm412_vm0, %v362_v38  ;;  %3147 = vmatmul.msk.f32.gmra.mxu3 %vm412_vm0, %v378_v39  ;;  %v4005_v38 = vadd.s32 %v2186_v19, %v2185_v20  ;;  %v4065_v20 = vadd.s32 136, %v3959_v7 }
 0x11f   : > { %vm2254_vm2 = vcmp.gt.s32.totalorder %v4005_v38, %v3996_v28  ;;  %vm6490_vm6 = vcmp.lt.s32.totalorder %v4005_v38, 500 }
 0x124   : > { %3084 = vmatmul.msk.f32.gmra.mxu0 %vm412_vm0, %v363_v42  ;;  %3100 = vmatmul.msk.f32.gmra.mxu2 %vm412_vm0, %v379_v43 }
 0x125   : > { %3132 = vmatmul.msk.f32.gmra.mxu1 %vm412_vm0, %v363_v42  ;;  %3148 = vmatmul.msk.f32.gmra.mxu3 %vm412_vm0, %v379_v43  ;;  %v4013_v42 = vpop.permute.xlu0 %911 }
 0x129   : > { %v622_v52 = vpop.f32.mrf.mxu0 }
 0x12a   : > { %v1093_v57 = vmul.f32 2.0, %v622_v52  ;;  %v735_v58 = vpop.f32.mrf.mxu1  ;;  %v4024_v52 = vadd.f32 %v3918_v46, %v4013_v42 }
 0x12b   : > { %v1094_v62 = vmul.f32 2.0, %v735_v58  ;;  %v4034_v58 = vadd.s32 %v3975_v14, %v2134_v25 }
 0x12c   : > { %v1157_v3 = vsub.f32 %v1029_v48, %v1093_v57  ;;  %v2119_v48 = vadd.s32 8, %v3959_v7  ;;  %6498 = vst [vmem:[#allocation11_spill] sm:$0xff] %v4024_v52 }
 0x12d   : > { %v1158_v8 = vsub.f32 %v1030_v51, %v1094_v62  ;;  %v952_v51 = vpop.permute.xlu2 %951  ;;  %vm2285_vm9 = vcmp.gt.s32.totalorder %v3998_v32, %v4034_v58 }
 0x12e   : > { %v3967_v11 = vmax.f32 %v1157_v3, 0.0  ;;  %v1063_v0 = vadd.f32 %v3918_v46, %v952_v51 }
 0x12f   : > { %v3977_v15 = vmax.f32 %v1158_v8, 0.0  ;;  %v670_v17 = vpop.f32.mrf.mxu2 }
 0x130   : > { %v3981_v18 = vadd.f32 1e-30, %v3967_v11  ;;  %v1125_v21 = vmul.f32 2.0, %v670_v17  ;;  %v783_v22 = vpop.f32.mrf.mxu3  ;;  %vm2189_vm3 = vcmp.lt.f32.partialorder %v3967_v11, 1.0 }
 0x131   : > { %v3990_v24 = vadd.f32 1e-30, %v3977_v15  ;;  %v1126_v26 = vmul.f32 2.0, %v783_v22  ;;  %v625_v27 = vpop.f32.mrf.mxu0  ;;  %vm2190_vm5 = vcmp.lt.f32.partialorder %v3977_v15, 1.0  ;;  %vm4102_vm14 = vmand %vm2189_vm3, %vm2253_vm1 }
 0x132   : > { %3264 = vrsqrt.f32 %v3981_v18  ;;  %v1189_v29 = vsub.f32 %v1061_v12, %v1125_v21  ;;  %v1095_v30 = vmul.f32 2.0, %v625_v27  ;;  %v738_v31 = vpop.f32.mrf.mxu1  ;;  %v4056_v12 = vadd.s32 %v3975_v14, %v2119_v48  ;;  %vm4121_vm1 = vmand %vm2190_vm5, %vm2254_vm2 }
 0x133   : > { %3266 = vrsqrt.f32 %v3990_v24  ;;  %v1190_v33 = vsub.f32 %v1062_v16, %v1126_v26  ;;  %v1096_v34 = vmul.f32 2.0, %v738_v31  ;;  %v1064_v16 = vadd.f32 %v3922_v47, %v952_v51  ;;  %v4087_v51 = vpop.permute.xlu0 %926 }
 0x134   : > { %v4007_v39 = vmax.f32 %v1189_v29, 0.0  ;;  %v1159_v40 = vsub.f32 %v1031_v60, %v1095_v30  ;;  %vm1355_vm7 = vweird.f32 %v3981_v18  ;;  %vm1365_vm8 = vweird.f32 %v3990_v24 }
 0x135   : > { %v4015_v43 = vmax.f32 %v1190_v33, 0.0  ;;  %v1160_v49 = vsub.f32 %v1032_v61, %v1096_v34  ;;  %vm2255_vm0 = vcmp.gt.s32.totalorder %v3998_v32, %v4056_v12 }
 0x136   : > { %v4027_v56 = vadd.f32 1e-30, %v4007_v39  ;;  %v4029_v57 = vmax.f32 %v1159_v40, 0.0 }
 0x137   : > { %v4037_v60 = vadd.f32 1e-30, %v4015_v43  ;;  %v4039_v37 = vmax.f32 %v1160_v49, 0.0  ;;  %v673_v3 = vpop.f32.mrf.mxu2 }
 0x138   : > { %v4041_v61 = vpop.eup %3264  ;;  %3268 = vrsqrt.f32 %v4027_v56  ;;  %v4047_v62 = vadd.f32 1e-30, %v4029_v57  ;;  %v786_v17 = vpop.f32.mrf.mxu3  ;;  %v1127_v26 = vmul.f32 2.0, %v673_v3  ;;  %vm2191_vm3 = vcmp.lt.f32.partialorder %v4029_v57, 1.0 }
 0x139   : > { %v4050_v4 = vpop.eup %3266  ;;  %v1350_v8 = vmul.f32 %v4041_v61, %v3981_v18  ;;  %3270 = vrsqrt.f32 %v4037_v60  ;;  %v628_v21 = vpop.f32.mrf.mxu0  ;;  %v4071_v25 = vadd.f32 1e-30, %v4039_v37  ;;  %v1128_v29 = vmul.f32 2.0, %v786_v17 }
 0x13a   : > { %v1360_v19 = vmul.f32 %v4050_v4, %v3990_v24  ;;  %3272 = vrsqrt.f32 %v4047_v62  ;;  %v1191_v31 = vsub.f32 %v1063_v0, %v1127_v26  ;;  %v4079_v33 = vmul.f32 2.0, %v628_v21 }
 0x13b   : > { %v1351_v22 = vmul.f32 %v4041_v61, %v1350_v8  ;;  %3274 = vrsqrt.f32 %v4071_v25  ;;  %vm1356_vm10 = vweird.f32 %v4041_v61  ;;  %v1192_v48 = vsub.f32 %v1064_v16, %v1128_v29 }
 0x13c   : > { %v1361_v27 = vmul.f32 %v4050_v4, %v1360_v19  ;;  %vm1366_vm12 = vweird.f32 %v4050_v4  ;;  %v4093_v8 = vmax.f32 %v1191_v31, 0.0  ;;  %vm1685_vm15 = vweird.f32 %v4037_v60  ;;  %vm1357_vm2 = vmor %vm1355_vm7, %vm1356_vm10 }
 0x13d   : > { %v1352_v30 = vmul.f32 0.5, %v1351_v22  ;;  %vm1375_vm11 = vweird.f32 %v4047_v62  ;;  %v4113_v22 = vmax.f32 %v1192_v48, 0.0  ;;  %vm1385_vm13 = vweird.f32 %v4071_v25  ;;  %vm1367_vm7 = vmor %vm1365_vm8, %vm1366_vm12 }
 0x13e   : > { %v4081_v34 = vpop.eup %3268  ;;  %v1362_v40 = vmul.f32 0.5, %v1361_v27  ;;  %v4142_v48 = vadd.f32 1e-30, %v4093_v8  ;;  %vm4163_vm10 = vmand %vm4102_vm14, %vm2381_vm4  ;;  %vm6510_vm14 = vweird.f32 %v4027_v56 }
 0x13f   : > { %v4085_v49 = vpop.eup %3270  ;;  %v1353_v3 = vsub.f32 1.5, %v1352_v30  ;;  %v1670_v0 = vmul.f32 %v4081_v34, %v4027_v56  ;;  %vm1676_vm5 = vweird.f32 %v4081_v34  ;;  %v4153_v31 = vadd.f32 1e-30, %v4113_v22  ;;  %vm4173_vm12 = vmand %vm4121_vm1, %vm6490_vm6 }
 0x140   : > { %v4095_v17 = vpop.eup %3272  ;;  %v1363_v19 = vsub.f32 1.5, %v1362_v40  ;;  %v1680_v21 = vmul.f32 %v4085_v49, %v4037_v60  ;;  %vm1686_vm8 = vweird.f32 %v4085_v49  ;;  %3276 = vrsqrt.f32 %v4142_v48  ;;  %vm1677_vm6 = vmor %vm6510_vm14, %vm1676_vm5 }
 0x141   : > { %v1354_v26 = vmul.f32 %v4041_v61, %v1353_v3  ;;  %v1671_v29 = vmul.f32 %v4081_v34, %v1670_v0  ;;  %v1370_v30 = vmul.f32 %v4095_v17, %v4047_v62  ;;  %v4144_v3 = vpop.eup %3274  ;;  %3278 = vrsqrt.f32 %v4153_v31 }
 0x142   : > { %v1364_v28 = vmul.f32 %v4050_v4, %v1363_v19  ;;  %v1681_v40 = vmul.f32 %v4085_v49, %v1680_v21  ;;  %v1380_v52 = vmul.f32 %v4144_v3, %v4071_v25  ;;  %vm1386_vm5 = vweird.f32 %v4144_v3 }
 0x143   : > { %v1358_v0 = vsel %vm1357_vm2, %v4041_v61, %v1354_v26  ;;  %v1672_v18 = vmul.f32 0.5, %v1671_v29  ;;  %v1371_v19 = vmul.f32 %v4095_v17, %v1370_v30  ;;  %vm6507_vm2 = vcmp.lt.f32.partialorder %v4007_v39, 1.0 }
 0x144   : > { %v1989_v21 = vmul.f32 %v1358_v0, %v3967_v11  ;;  %v1368_v36 = vsel %vm1367_vm7, %v4050_v4, %v1364_v28  ;;  %v1682_v41 = vmul.f32 0.5, %v1681_v40  ;;  %v1381_v30 = vmul.f32 %v4144_v3, %v1380_v52  ;;  %vm4187_vm1 = vmand %vm6507_vm2, %vm2285_vm9  ;;  %v2447_v52 = vld [vmem:[#allocation2 + $0xb0] sm:$0xff] }
 0x145   : > { %v1990_v61 = vmul.f32 %v1368_v36, %v3977_v15  ;;  %v1673_v26 = vsub.f32 1.5, %v1672_v18  ;;  %v1372_v11 = vmul.f32 0.5, %v1371_v19  ;;  %vm1376_vm7 = vweird.f32 %v4095_v17  ;;  %v2448_v18 = vld [vmem:[#allocation2 + $0x1b0] sm:$0xff]  ;;  %vm1687_vm9 = vmor %vm1685_vm15, %vm1686_vm8 }
 0x146   : > { %v2053_v29 = vsub.f32 1.0, %v1989_v21  ;;  %v1683_v16 = vsub.f32 1.5, %v1682_v41  ;;  %v1382_v0 = vmul.f32 0.5, %v1381_v30  ;;  %v4198_v21 = vpop.permute.xlu0 %941  ;;  %vm6511_vm15 = vcmp.gt.s32.totalorder %v4005_v38, %v4034_v58  ;;  %v4228_v62 = vpop.eup %3276 }
 0x147   : > { %v2054_v15 = vsub.f32 1.0, %v1990_v61  ;;  %v1674_v36 = vmul.f32 %v4081_v34, %v1673_v26  ;;  %v1373_v41 = vsub.f32 1.5, %v1372_v11  ;;  %vm2192_vm14 = vcmp.lt.f32.partialorder %v4039_v37, 1.0 }
 0x148   : > { %v2511_v28 = vmul.f32 %v2053_v29, %v2053_v29  ;;  %v1684_v40 = vmul.f32 %v4085_v49, %v1683_v16 }
 0x149   : > { %v2512_v19 = vmul.f32 %v2054_v15, %v2054_v15  ;;  %v1678_v61 = vsel %vm1677_vm6, %v4081_v34, %v1674_v36  ;;  %v1374_v26 = vmul.f32 %v4095_v17, %v1373_v41  ;;  %vm1377_vm6 = vmor %vm1375_vm11, %vm1376_vm7  ;;  %v1383_v34 = vsub.f32 1.5, %v1382_v0 }
 0x14a   : > { %v2575_v56 = vsel %vm4163_vm10, %v2511_v28, 0.0  ;;  %v2021_v11 = vmul.f32 %v1678_v61, %v4007_v39  ;;  %v1688_v29 = vsel %vm1687_vm9, %v4085_v49, %v1684_v40  ;;  %vm6512_vm10 = vcmp.lt.f32.partialorder %v4015_v43, 1.0  ;;  %vm4236_vm11 = vmand %vm2191_vm3, %vm2255_vm0  ;;  %v4256_v28 = vpop.eup %3278  ;;  %v2479_v40 = vld [vmem:[#allocation2 + $0x148] sm:$0xff] }
 0x14b   : > { %v2639_v16 = vadd.f32 %v2575_v56, %v2447_v52  ;;  %v2576_v60 = vsel %vm4173_vm12, %v2512_v19, 0.0  ;;  %v2022_v30 = vmul.f32 %v1688_v29, %v4015_v43  ;;  %vm4223_vm8 = vmand %vm6512_vm10, %vm6511_vm15  ;;  %v1378_v49 = vsel %vm1377_vm6, %v4095_v17, %v1374_v26  ;;  %v741_v52 = vpop.f32.mrf.mxu1  ;;  %v2480_v26 = vld [vmem:[#allocation2 + $0x1d0] sm:$0xff] }
 0x14c   : > { %v2640_v24 = vadd.f32 %v2576_v60, %v2448_v18  ;;  %v2085_v15 = vsub.f32 1.0, %v2021_v11  ;;  %v1991_v4 = vmul.f32 %v1378_v49, %v4029_v57  ;;  %v1384_v43 = vmul.f32 %v4144_v3, %v1383_v34  ;;  %vm4245_vm12 = vmor %vm1385_vm13, %vm1386_vm5 }
 0x14d   : > { %2703 = vst [vmem:[#allocation2 + $0xb0] sm:$0xff] %v2639_v16  ;;  %v2086_v36 = vsub.f32 1.0, %v2022_v30  ;;  %v1690_v57 = vmul.f32 %v4228_v62, %v4142_v48  ;;  %v4254_v41 = vadd.s32 %v3975_v14, %v4065_v20  ;;  %vm4262_vm13 = vmand %vm4187_vm1, %vm2381_vm4  ;;  %v6521_v19 = vsub.f32 %v3928_v50, %v4079_v33  ;;  %v2449_v33 = vld [vmem:[#allocation2 + $0xd8] sm:$0xff] }
 0x14e   : > { %2704 = vst [vmem:[#allocation2 + $0x1b0] sm:$0xff] %v2640_v24  ;;  %v2543_v0 = vmul.f32 %v2085_v15, %v2085_v15  ;;  %v2055_v18 = vsub.f32 1.0, %v1991_v4  ;;  %v1388_v20 = vsel %vm4245_vm12, %v4144_v3, %v1384_v43  ;;  %vm6522_vm0 = vcmp.lt.s32.totalorder %v4005_v38, 500  ;;  %vm2385_vm2 = vmand %vm4236_vm11, %vm2381_vm4 }
 0x14f   : > { %v4272_v61 = vmax.f32 %v6521_v19, 0.0  ;;  %vm4278_vm3 = vmand %vm4223_vm8, %vm6522_vm0  ;;  %v2544_v56 = vmul.f32 %v2086_v36, %v2086_v36  ;;  %v1992_v11 = vmul.f32 %v1388_v20, %v4039_v37  ;;  %v1691_v29 = vmul.f32 %v4228_v62, %v1690_v57  ;;  %v2450_v36 = vld [vmem:[#allocation2 + $0x18] sm:$0xff]  ;;  %v957_v57 = vpop.permute.xlu0 %956 }
 0x150   : > { %v1700_v3 = vmul.f32 %v4256_v28, %v4153_v31  ;;  %v2607_v50 = vsel %vm4262_vm13, %v2543_v0, 0.0  ;;  %v2513_v34 = vmul.f32 %v2055_v18, %v2055_v18  ;;  %v1098_v60 = vmul.f32 2.0, %v741_v52  ;;  %vm6526_vm5 = vmmov %vm6522_vm0 }
 0x151   : > { %v4293_v16 = vadd.f32 1e-30, %v4272_v61  ;;  %v2671_v30 = vadd.f32 %v2607_v50, %v2479_v40  ;;  %v2608_v39 = vsel %vm4278_vm3, %v2544_v56, 0.0  ;;  %v2056_v49 = vsub.f32 1.0, %v1992_v11  ;;  %v676_v40 = vpop.f32.mrf.mxu2 }
 0x152   : > { %vm6525_vm1 = vcmp.gt.s32.totalorder %v4005_v38, %v4056_v12  ;;  %v1692_v24 = vmul.f32 0.5, %v1691_v29  ;;  %v2672_v15 = vadd.f32 %v2608_v39, %v2480_v26  ;;  %v2577_v4 = vsel %vm2385_vm2, %v2513_v34, 0.0  ;;  %v789_v34 = vpop.f32.mrf.mxu3 }
 0x153   : > { %vm2320_vm7 = vmand %vm2192_vm14, %vm6525_vm1  ;;  %v1701_v58 = vmul.f32 %v4256_v28, %v1700_v3  ;;  %3280 = vrsqrt.f32 %v4293_v16  ;;  %2735 = vst [vmem:[#allocation2 + $0x148] sm:$0xff] %v2671_v30  ;;  %v2641_v43 = vadd.f32 %v2577_v4, %v2449_v33  ;;  %v2514_v17 = vmul.f32 %v2056_v49, %v2056_v49 }
 0x154   : > { %v1693_v52 = vsub.f32 1.5, %v1692_v24  ;;  %vm1696_vm9 = vweird.f32 %v4228_v62  ;;  %2736 = vst [vmem:[#allocation2 + $0x1d0] sm:$0xff] %v2672_v15  ;;  %vm2386_vm6 = vmand %vm2320_vm7, %vm6526_vm5  ;;  %v1065_v37 = vadd.f32 %v3918_v46, %v957_v57  ;;  %vm2287_vm15 = vcmp.gt.s32.totalorder %v3998_v32, %v4254_v41 }
 0x155   : > { %v1702_v12 = vmul.f32 0.5, %v1701_v58  ;;  %v1162_v25 = vsub.f32 %v3932_v53, %v1098_v60  ;;  %2705 = vst [vmem:[#allocation2 + $0xd8] sm:$0xff] %v2641_v43  ;;  %v2578_v0 = vsel %vm2386_vm6, %v2514_v17, 0.0  ;;  %vm1695_vm10 = vweird.f32 %v4142_v48  ;;  %v631_v60 = vpop.f32.mrf.mxu0 }
 0x156   : > { %v1694_v18 = vmul.f32 %v4228_v62, %v1693_v52  ;;  %vm2223_vm8 = vcmp.lt.f32.partialorder %v4093_v8, 1.0  ;;  %v2642_v20 = vadd.f32 %v2578_v0, %v2450_v36  ;;  %vm1697_vm11 = vmor %vm1695_vm10, %vm1696_vm9  ;;  %vm1706_vm12 = vweird.f32 %v4256_v28  ;;  %v2482_v0 = vld [vmem:[#allocation2 + $0xc8] sm:$0xff] }
 0x157   : > { %v1703_v19 = vsub.f32 1.5, %v1702_v12  ;;  %v4315_v27 = vmax.f32 %v1162_v25, 0.0  ;;  %v4319_v26 = vadd.f32 %v3922_v47, %v4013_v42  ;;  %v2120_v56 = vadd.s32 16, %v3959_v7  ;;  %vm4329_vm14 = vmand %vm2223_vm8, %vm2287_vm15 }
 0x158   : > { %v1698_v53 = vsel %vm1697_vm11, %v4228_v62, %v1694_v18  ;;  %v1129_v11 = vmul.f32 2.0, %v676_v40  ;;  %2706 = vst [vmem:[#allocation2 + $0x18] sm:$0xff] %v2642_v20  ;;  %vm1705_vm13 = vweird.f32 %v4153_v31  ;;  %v1066_v50 = vadd.f32 %v3922_v47, %v957_v57  ;;  %vm2417_vm1 = vmand %vm4329_vm14, %vm2381_vm4 }
 0x159   : > { %v4323_v29 = vpop.eup %3280  ;;  %v2023_v48 = vmul.f32 %v1698_v53, %v4093_v8  ;;  %v1704_v42 = vmul.f32 %v4256_v28, %v1703_v19  ;;  %v4336_v62 = vadd.f32 1e-30, %v4315_v27  ;;  %vm1707_vm0 = vmor %vm1705_vm13, %vm1706_vm12  ;;  %vm2288_vm3 = vcmp.gt.s32.totalorder %v4005_v38, %v4254_v41 }
 0x15a   : > { %v1390_v8 = vmul.f32 %v4323_v29, %v4293_v16  ;;  %v1193_v33 = vsub.f32 %v1065_v37, %v1129_v11  ;;  %vm2224_vm2 = vcmp.lt.f32.partialorder %v4113_v22, 1.0  ;;  %v4348_v31 = vadd.f32 %v3918_v46, %v3914_v44 }
 0x15b   : > { %v2087_v30 = vsub.f32 1.0, %v2023_v48  ;;  %v1708_v39 = vsel %vm1707_vm0, %v4256_v28, %v1704_v42  ;;  %3282 = vrsqrt.f32 %v4336_v62  ;;  %v2481_v28 = vld [vmem:[#allocation2 + $0x100] sm:$0xff]  ;;  %v4359_v58 = vadd.s32 %v3975_v14, %v2120_v56  ;;  %vm4364_vm7 = vmand %vm2224_vm2, %vm2288_vm3 }
 0x15c   : > { %v2024_v49 = vmul.f32 %v1708_v39, %v4113_v22  ;;  %v1391_v24 = vmul.f32 %v4323_v29, %v1390_v8  ;;  %v4352_v15 = vmax.f32 %v1193_v33, 0.0  ;;  %v1130_v43 = vmul.f32 2.0, %v789_v34  ;;  %v744_v33 = vpop.f32.mrf.mxu1  ;;  %v962_v39 = vpop.permute.xlu1 %961 }
 0x15d   : > { %v2545_v4 = vmul.f32 %v2087_v30, %v2087_v30  ;;  %v1099_v36 = vmul.f32 2.0, %v631_v60  ;;  %vm1395_vm9 = vweird.f32 %v4293_v16  ;;  %vm1396_vm5 = vweird.f32 %v4323_v29  ;;  %v679_v22 = vpop.f32.mrf.mxu2 }
 0x15e   : > { %v2088_v17 = vsub.f32 1.0, %v2024_v49  ;;  %v1392_v57 = vmul.f32 0.5, %v1391_v24  ;;  %v4370_v52 = vadd.f32 1e-30, %v4352_v15  ;;  %v1194_v12 = vsub.f32 %v1066_v50, %v1130_v43  ;;  %vm1397_vm10 = vmor %vm1395_vm9, %vm1396_vm5 }
 0x15f   : > { %v2609_v37 = vsel %vm2417_vm1, %v2545_v4, 0.0  ;;  %v1163_v25 = vsub.f32 %v3935_v54, %v1099_v36  ;;  %v4379_v19 = vadd.f32 %v3922_v47, %v3914_v44  ;;  %v4383_v53 = vadd.f32 %v3918_v46, %v3916_v45 }
 0x160   : > { %v2673_v40 = vadd.f32 %v2609_v37, %v2481_v28  ;;  %v2546_v18 = vmul.f32 %v2088_v17, %v2088_v17  ;;  %v1393_v41 = vsub.f32 1.5, %v1392_v57  ;;  %3284 = vrsqrt.f32 %v4370_v52 }
 0x161   : > { %v4375_v20 = vpop.eup %3282  ;;  %vm6531_vm6 = vcmp.lt.s32.totalorder %v4005_v38, 500  ;;  %v4389_v54 = vmax.f32 %v1194_v12, 0.0  ;;  %v4391_v56 = vmax.f32 %v1163_v25, 0.0  ;;  %v4395_v11 = vadd.f32 %v3922_v47, %v3916_v45  ;;  %v2451_v12 = vld [vmem:[#allocation2 + $0x50] sm:$0xff] }
 0x162   : > { %vm2418_vm15 = vmand %vm4364_vm7, %vm6531_vm6  ;;  %2737 = vst [vmem:[#allocation2 + $0x100] sm:$0xff] %v2673_v40  ;;  %v1394_v48 = vmul.f32 %v4323_v29, %v1393_v41  ;;  %v1400_v3 = vmul.f32 %v4375_v20, %v4336_v62  ;;  %v2136_v50 = vadd.s32 144, %v3959_v7  ;;  %vm2193_vm8 = vcmp.lt.f32.partialorder %v4272_v61, 1.0 }
 0x163   : > { %v2610_v44 = vsel %vm2418_vm15, %v2546_v18, 0.0  ;;  %v4406_v8 = vadd.f32 1e-30, %v4389_v54  ;;  %v4409_v45 = vadd.f32 1e-30, %v4391_v56  ;;  %vm2257_vm11 = vcmp.gt.s32.totalorder %v3998_v32, %v4359_v58 }
 0x164   : > { %v2674_v42 = vadd.f32 %v2610_v44, %v2482_v0  ;;  %v1398_v34 = vsel %vm1397_vm10, %v4323_v29, %v1394_v48  ;;  %v1401_v60 = vmul.f32 %v4375_v20, %v1400_v3  ;;  %v4418_v16 = vadd.f32 %v3918_v46, %v4087_v51  ;;  %vm2321_vm12 = vmand %vm2193_vm8, %vm2257_vm11 }
 0x165   : > { %v4422_v30 = vadd.f32 %v3922_v47, %v4087_v51  ;;  %v1993_v49 = vmul.f32 %v1398_v34, %v4272_v61  ;;  %3286 = vrsqrt.f32 %v4406_v8  ;;  %v1067_v24 = vadd.f32 %v3918_v46, %v962_v39  ;;  %vm2387_vm2 = vmand %vm2321_vm12, %vm2381_vm4  ;;  %v792_v34 = vpop.f32.mrf.mxu3 }
 0x166   : > { %2738 = vst [vmem:[#allocation2 + $0xc8] sm:$0xff] %v2674_v42  ;;  %v4426_v29 = vpop.eup %3284  ;;  %v1402_v28 = vmul.f32 0.5, %v1401_v60  ;;  %3288 = vrsqrt.f32 %v4409_v45  ;;  %v1100_v4 = vmul.f32 2.0, %v744_v33  ;;  %v4431_v43 = vadd.f32 %v3922_v47, %v962_v39 }
 0x167   : > { %v2057_v36 = vsub.f32 1.0, %v1993_v49  ;;  %v1710_v51 = vmul.f32 %v4426_v29, %v4370_v52  ;;  %v4441_v17 = vadd.s32 %v3975_v14, %v2136_v50  ;;  %vm1405_vm14 = vweird.f32 %v4336_v62 }
 0x168   : > { %v1403_v57 = vsub.f32 1.5, %v1402_v28  ;;  %vm1406_vm13 = vweird.f32 %v4375_v20  ;;  %v1164_v37 = vsub.f32 %v3938_v55, %v1100_v4  ;;  %vm2194_vm0 = vcmp.lt.f32.partialorder %v4315_v27, 1.0 }
 0x169   : > { %v2515_v25 = vmul.f32 %v2057_v36, %v2057_v36  ;;  %vm2258_vm3 = vcmp.gt.s32.totalorder %v4005_v38, %v4359_v58  ;;  %v1711_v61 = vmul.f32 %v4426_v29, %v1710_v51  ;;  %v2121_v0 = vadd.s32 24, %v3959_v7  ;;  %vm1407_vm1 = vmor %vm1405_vm14, %vm1406_vm13 }
 0x16a   : > { %v1404_v40 = vmul.f32 %v4375_v20, %v1403_v57  ;;  %v4454_v18 = vmax.f32 %v1164_v37, 0.0  ;;  %v1131_v41 = vmul.f32 2.0, %v679_v22  ;;  %vm2225_vm7 = vcmp.lt.f32.partialorder %v4352_v15, 1.0  ;;  %vm2322_vm15 = vmand %vm2194_vm0, %vm2258_vm3 }
 0x16b   : > { %v4456_v55 = vpop.eup %3286  ;;  %v2579_v44 = vsel %vm2387_vm2, %v2515_v25, 0.0  ;;  %v1712_v48 = vmul.f32 0.5, %v1711_v61  ;;  %vm2289_vm9 = vcmp.gt.s32.totalorder %v3998_v32, %v4441_v17  ;;  %vm1715_vm5 = vweird.f32 %v4370_v52 }
 0x16c   : > { %v4463_v3 = vpop.eup %3288  ;;  %v2643_v42 = vadd.f32 %v2579_v44, %v2451_v12  ;;  %v1408_v50 = vsel %vm1407_vm1, %v4375_v20, %v1404_v40  ;;  %v1720_v33 = vmul.f32 %v4456_v55, %v4406_v8  ;;  %vm1716_vm6 = vweird.f32 %v4426_v29  ;;  %v2452_v12 = vld [vmem:[#allocation2 + $0x168] sm:$0xff]  ;;  %vm4509_vm3 = vmand %vm2225_vm7, %vm2289_vm9 }
 0x16d   : > { %v1994_v62 = vmul.f32 %v1408_v50, %v4315_v27  ;;  %v1713_v60 = vsub.f32 1.5, %v1712_v48  ;;  %v1410_v39 = vmul.f32 %v4463_v3, %v4409_v45  ;;  %v4475_v28 = vadd.s32 %v3975_v14, %v2121_v0  ;;  %vm1717_vm10 = vmor %vm1715_vm5, %vm1716_vm6  ;;  %v634_v0 = vpop.f32.mrf.mxu0 }
 0x16e   : > { %2707 = vst [vmem:[#allocation2 + $0x50] sm:$0xff] %v2643_v42  ;;  %v1721_v49 = vmul.f32 %v4456_v55, %v1720_v33  ;;  %v4478_v20 = vadd.f32 1e-30, %v4454_v18  ;;  %v1195_v4 = vsub.f32 %v1067_v24, %v1131_v41  ;;  %v1132_v57 = vmul.f32 2.0, %v792_v34  ;;  %vm2419_vm6 = vmand %vm4509_vm3, %vm2381_vm4 }
 0x16f   : > { %v2058_v36 = vsub.f32 1.0, %v1994_v62  ;;  %v1714_v51 = vmul.f32 %v4426_v29, %v1713_v60  ;;  %v1411_v22 = vmul.f32 %v4463_v3, %v1410_v39  ;;  %vm1725_vm8 = vweird.f32 %v4406_v8  ;;  %v747_v60 = vpop.f32.mrf.mxu1 }
 0x170   : > { %v1722_v37 = vmul.f32 0.5, %v1721_v49  ;;  %3290 = vrsqrt.f32 %v4478_v20  ;;  %v4491_v24 = vmax.f32 %v1195_v4, 0.0  ;;  %vm1415_vm11 = vweird.f32 %v4409_v45  ;;  %v2483_v49 = vld [vmem:[#allocation2 + $0x40] sm:$0xff] }
 0x171   : > { %v2516_v58 = vmul.f32 %v2058_v36, %v2058_v36  ;;  %v1718_v27 = vsel %vm1717_vm10, %v4426_v29, %v1714_v51  ;;  %v1412_v25 = vmul.f32 0.5, %v1411_v22  ;;  %vm6532_vm12 = vcmp.lt.s32.totalorder %v4005_v38, 500 }
 0x172   : > { %vm2388_vm14 = vmand %vm2322_vm15, %vm6532_vm12  ;;  %v2025_v52 = vmul.f32 %v1718_v27, %v4352_v15  ;;  %v1723_v61 = vsub.f32 1.5, %v1722_v37  ;;  %vm1726_vm13 = vweird.f32 %v4456_v55  ;;  %v4500_v40 = vadd.f32 1e-30, %v4491_v24 }
 0x173   : > { %v2580_v41 = vsel %vm2388_vm14, %v2516_v58, 0.0  ;;  %v1413_v44 = vsub.f32 1.5, %v1412_v25  ;;  %vm1416_vm0 = vweird.f32 %v4463_v3  ;;  %v1196_v29 = vsub.f32 %v4431_v43, %v1132_v57  ;;  %vm4517_vm2 = vmor %vm1725_vm8, %vm1726_vm13 }
 0x174   : > { %v2644_v48 = vadd.f32 %v2580_v41, %v2452_v12  ;;  %v2089_v42 = vsub.f32 1.0, %v2025_v52  ;;  %v1724_v33 = vmul.f32 %v4456_v55, %v1723_v61  ;;  %3292 = vrsqrt.f32 %v4500_v40  ;;  %vm1417_vm9 = vmor %vm1415_vm11, %vm1416_vm0  ;;  %v2484_v41 = vld [vmem:[#allocation2 + $0x1f8] sm:$0xff] }
 0x175   : > { %vm2290_vm1 = vcmp.gt.s32.totalorder %v4005_v38, %v4441_v17  ;;  %v1414_v43 = vmul.f32 %v4463_v3, %v1413_v44  ;;  %v4524_v15 = vmax.f32 %v1196_v29, 0.0  ;;  %v1101_v62 = vmul.f32 2.0, %v634_v0  ;;  %vm6541_vm11 = vmmov %vm6532_vm12  ;;  %v795_v0 = vpop.f32.mrf.mxu3 }
 0x176   : > { %v4526_v39 = vpop.eup %3290  ;;  %2708 = vst [vmem:[#allocation2 + $0x168] sm:$0xff] %v2644_v48  ;;  %v2547_v4 = vmul.f32 %v2089_v42, %v2089_v42  ;;  %v1728_v8 = vsel %vm4517_vm2, %v4456_v55, %v1724_v33  ;;  %vm2226_vm7 = vcmp.lt.f32.partialorder %v4389_v54, 1.0  ;;  %vm2195_vm5 = vcmp.lt.f32.partialorder %v4391_v56, 1.0 }
 0x177   : > { %v2026_v36 = vmul.f32 %v1728_v8, %v4389_v54  ;;  %v1418_v51 = vsel %vm1417_vm9, %v4463_v3, %v1414_v43  ;;  %vm2259_vm15 = vcmp.gt.s32.totalorder %v3998_v32, %v4475_v28  ;;  %v1420_v55 = vmul.f32 %v4526_v39, %v4478_v20  ;;  %vm4554_vm10 = vmand %vm2226_vm7, %vm2290_vm1 }
 0x178   : > { %v2611_v22 = vsel %vm2419_vm6, %v2547_v4, 0.0  ;;  %v1995_v45 = vmul.f32 %v1418_v51, %v4391_v56  ;;  %v4549_v57 = vadd.f32 1e-30, %v4524_v15  ;;  %v1102_v37 = vmul.f32 2.0, %v747_v60  ;;  %vm4568_vm8 = vmand %vm2195_vm5, %vm2259_vm15  ;;  %v2453_v56 = vld [vmem:[#allocation2 + $0x130] sm:$0xff] }
 0x179   : > { %v2675_v12 = vadd.f32 %v2611_v22, %v2483_v49  ;;  %v2090_v58 = vsub.f32 1.0, %v2026_v36  ;;  %v1421_v3 = vmul.f32 %v4526_v39, %v1420_v55  ;;  %v1165_v27 = vsub.f32 %v3941_v59, %v1101_v62  ;;  %vm2420_vm12 = vmand %vm4554_vm10, %vm6541_vm11 }
 0x17a   : > { %v4560_v25 = vpop.eup %3292  ;;  %v4564_v52 = vadd.f32 %v3918_v46, %v3945_v63  ;;  %v2059_v61 = vsub.f32 1.0, %v1995_v45  ;;  %v2137_v17 = vadd.s32 152, %v3959_v7  ;;  %3294 = vrsqrt.f32 %v4549_v57  ;;  %vm2389_vm13 = vmand %vm4568_vm8, %vm2381_vm4 }
 0x17b   : > { %v4576_v59 = vadd.f32 %v3922_v47, %v3945_v63  ;;  %2739 = vst [vmem:[#allocation2 + $0x40] sm:$0xff] %v2675_v12  ;;  %v2548_v44 = vmul.f32 %v2090_v58, %v2090_v58  ;;  %v1422_v29 = vmul.f32 0.5, %v1421_v3  ;;  %v1730_v48 = vmul.f32 %v4560_v25, %v4500_v40 }
 0x17c   : > { %v2517_v42 = vmul.f32 %v2059_v61, %v2059_v61  ;;  %vm1425_vm14 = vweird.f32 %v4478_v20  ;;  %v4585_v50 = vmax.f32 %v1165_v27, 0.0  ;;  %v1166_v63 = vsub.f32 %v3948_v1, %v1102_v37  ;;  %v967_v37 = vpop.permute.xlu2 %966  ;;  %v682_v27 = vpop.f32.mrf.mxu2 }
 0x17d   : > { %v2612_v33 = vsel %vm2420_vm12, %v2548_v44, 0.0  ;;  %v1423_v34 = vsub.f32 1.5, %v1422_v29  ;;  %vm1426_vm0 = vweird.f32 %v4526_v39  ;;  %v1731_v43 = vmul.f32 %v4560_v25, %v1730_v48 }
 0x17e   : > { %v2676_v62 = vadd.f32 %v2612_v33, %v2484_v41  ;;  %v2581_v60 = vsel %vm2389_vm13, %v2517_v42, 0.0  ;;  %v4595_v49 = vadd.s32 %v3975_v14, %v2137_v17  ;;  %v4598_v4 = vadd.f32 1e-30, %v4585_v50  ;;  %vm1427_vm3 = vmor %vm1425_vm14, %vm1426_vm0 }
 0x17f   : > { %v2645_v1 = vadd.f32 %v2581_v60, %v2453_v56  ;;  %v1424_v8 = vmul.f32 %v4526_v39, %v1423_v34  ;;  %v1732_v36 = vmul.f32 0.5, %v1731_v43  ;;  %v4601_v51 = vmax.f32 %v1166_v63, 0.0  ;;  %v2454_v56 = vld [vmem:[#allocation2 + $0x48] sm:$0xff] }
 0x180   : > { %v4603_v55 = vpop.eup %3294  ;;  %v4607_v22 = vadd.f32 %v3918_v46, %v4198_v21  ;;  %2740 = vst [vmem:[#allocation2 + $0x1f8] sm:$0xff] %v2676_v62  ;;  %vm2196_vm2 = vcmp.lt.f32.partialorder %v4454_v18, 1.0  ;;  %vm2260_vm1 = vcmp.gt.s32.totalorder %v4005_v38, %v4475_v28  ;;  %3296 = vrsqrt.f32 %v4598_v4 }
 0x181   : > { %2709 = vst [vmem:[#allocation2 + $0x130] sm:$0xff] %v2645_v1  ;;  %v1428_v45 = vsel %vm1427_vm3, %v4526_v39, %v1424_v8  ;;  %v1733_v12 = vsub.f32 1.5, %v1732_v36  ;;  %vm1736_vm7 = vweird.f32 %v4560_v25  ;;  %v1740_v58 = vmul.f32 %v4603_v55, %v4549_v57  ;;  %vm4625_vm9 = vmand %vm2196_vm2, %vm2260_vm1  ;;  %v637_v36 = vpop.f32.mrf.mxu0 }
 0x182   : > { %v1996_v20 = vmul.f32 %v1428_v45, %v4454_v18  ;;  %v1069_v54 = vadd.f32 %v3918_v46, %v967_v37  ;;  %v1070_v3 = vadd.f32 %v3922_v47, %v967_v37  ;;  %v4623_v28 = vadd.f32 1e-30, %v4601_v51 }
 0x183   : > { %v1734_v39 = vmul.f32 %v4560_v25, %v1733_v12  ;;  %vm1735_vm5 = vweird.f32 %v4500_v40  ;;  %vm2291_vm6 = vcmp.gt.s32.totalorder %v3998_v32, %v4595_v49  ;;  %v1741_v18 = vmul.f32 %v4603_v55, %v1740_v58 }
 0x184   : > { %v2060_v17 = vsub.f32 1.0, %v1996_v20  ;;  %vm1737_vm15 = vmor %vm1735_vm5, %vm1736_vm7  ;;  %vm2227_vm10 = vcmp.lt.f32.partialorder %v4491_v24, 1.0  ;;  %vm2292_vm8 = vcmp.gt.s32.totalorder %v4005_v38, %v4595_v49  ;;  %3298 = vrsqrt.f32 %v4623_v28  ;;  %v2486_v49 = vld [vmem:[#allocation2 + $0x128] sm:$0xff] }
 0x185   : > { %v1738_v41 = vsel %vm1737_vm15, %v4560_v25, %v1734_v39  ;;  %v1742_v44 = vmul.f32 0.5, %v1741_v18  ;;  %v2122_v40 = vadd.s32 32, %v3959_v7  ;;  %v1133_v29 = vmul.f32 2.0, %v682_v27  ;;  %vm4656_vm0 = vmand %vm2227_vm10, %vm2291_vm6 }
 0x186   : > { %v4640_v48 = vpop.eup %3296  ;;  %v2518_v42 = vmul.f32 %v2060_v17, %v2060_v17  ;;  %v2027_v63 = vmul.f32 %v1738_v41, %v4491_v24  ;;  %vm2228_vm11 = vcmp.lt.f32.partialorder %v4524_v15, 1.0  ;;  %v1134_v33 = vmul.f32 2.0, %v795_v0  ;;  %vm2421_vm7 = vmand %vm4656_vm0, %vm2381_vm4 }
 0x187   : > { %vm6544_vm12 = vcmp.lt.s32.totalorder %v4005_v38, 500  ;;  %v1743_v34 = vsub.f32 1.5, %v1742_v44  ;;  %vm1746_vm13 = vweird.f32 %v4603_v55  ;;  %v1430_v25 = vmul.f32 %v4640_v48, %v4598_v4  ;;  %vm4700_vm5 = vmand %vm2228_vm11, %vm2292_vm8 }
 0x188   : > { %vm2390_vm14 = vmand %vm4625_vm9, %vm6544_vm12  ;;  %v1197_v43 = vsub.f32 %v1069_v54, %v1133_v29  ;;  %v2091_v60 = vsub.f32 1.0, %v2027_v63  ;;  %vm1745_vm3 = vweird.f32 %v4549_v57  ;;  %v1198_v8 = vsub.f32 %v1070_v3, %v1134_v33  ;;  %v2485_v54 = vld [vmem:[#allocation2 + $0x20] sm:$0xff] }
 0x189   : > { %v2582_v62 = vsel %vm2390_vm14, %v2518_v42, 0.0  ;;  %v1744_v37 = vmul.f32 %v4603_v55, %v1743_v34  ;;  %v1431_v12 = vmul.f32 %v4640_v48, %v1430_v25  ;;  %vm1747_vm2 = vmor %vm1745_vm3, %vm1746_vm13  ;;  %vm1435_vm1 = vweird.f32 %v4598_v4 }
 0x18a   : > { %v2646_v45 = vadd.f32 %v2582_v62, %v2454_v56  ;;  %v4663_v58 = vmax.f32 %v1197_v43, 0.0  ;;  %v4665_v20 = vpop.eup %3298  ;;  %v2549_v27 = vmul.f32 %v2091_v60, %v2091_v60  ;;  %v4671_v24 = vadd.s32 %v3975_v14, %v2122_v40  ;;  %v977_v60 = vpop.permute.xlu1 %976  ;;  %vm6549_vm8 = vmmov %vm6544_vm12 }
 0x18b   : > { %v4673_v57 = vmax.f32 %v1198_v8, 0.0  ;;  %v1748_v3 = vsel %vm1747_vm2, %v4603_v55, %v1744_v37  ;;  %v1432_v61 = vmul.f32 0.5, %v1431_v12  ;;  %v1440_v39 = vmul.f32 %v4665_v20, %v4623_v28  ;;  %v750_v55 = vpop.f32.mrf.mxu1  ;;  %vm2422_vm11 = vmand %vm4700_vm5, %vm6549_vm8 }
 0x18c   : > { %2710 = vst [vmem:[#allocation2 + $0x48] sm:$0xff] %v2646_v45  ;;  %v1103_v18 = vmul.f32 2.0, %v637_v36  ;;  %v2613_v0 = vsel %vm2421_vm7, %v2549_v27, 0.0  ;;  %v2028_v17 = vmul.f32 %v1748_v3, %v4524_v15  ;;  %vm1436_vm9 = vweird.f32 %v4640_v48 }
 0x18d   : > { %v4685_v41 = vadd.f32 1e-30, %v4663_v58  ;;  %v2677_v44 = vadd.f32 %v2613_v0, %v2485_v54  ;;  %v1433_v40 = vsub.f32 1.5, %v1432_v61  ;;  %v1441_v29 = vmul.f32 %v4665_v20, %v1440_v39  ;;  %vm1437_vm10 = vmor %vm1435_vm1, %vm1436_vm9 }
 0x18e   : > { %v4689_v56 = vadd.f32 1e-30, %v4673_v57  ;;  %v4693_v42 = vadd.f32 %v3922_v47, %v4198_v21  ;;  %v2092_v63 = vsub.f32 1.0, %v2028_v17  ;;  %vm2261_vm6 = vcmp.gt.s32.totalorder %v3998_v32, %v4671_v24 }
 0x18f   : > { %3300 = vrsqrt.f32 %v4685_v41  ;;  %2741 = vst [vmem:[#allocation2 + $0x20] sm:$0xff] %v2677_v44  ;;  %v1434_v34 = vmul.f32 %v4640_v48, %v1433_v40  ;;  %vm2197_vm15 = vcmp.lt.f32.partialorder %v4585_v50, 1.0  ;;  %v1442_v21 = vmul.f32 0.5, %v1441_v29  ;;  %v2455_v40 = vld [vmem:[#allocation2 + $0x180] sm:$0xff] }
 0x190   : > { %3302 = vrsqrt.f32 %v4689_v56  ;;  %v2550_v25 = vmul.f32 %v2092_v63, %v2092_v63  ;;  %v2138_v15 = vadd.s32 160, %v3959_v7  ;;  %v1167_v43 = vsub.f32 %v3962_v9, %v1103_v18  ;;  %vm4737_vm13 = vmand %vm2197_vm15, %vm2261_vm6  ;;  %v972_v18 = vpop.permute.xlu0 %971 }
 0x191   : > { %v1104_v62 = vmul.f32 2.0, %v750_v55  ;;  %v1438_v1 = vsel %vm1437_vm10, %v4640_v48, %v1434_v34  ;;  %v1443_v8 = vsub.f32 1.5, %v1442_v21  ;;  %vm1445_vm12 = vweird.f32 %v4623_v28  ;;  %vm2391_vm1 = vmand %vm4737_vm13, %vm2381_vm4 }
 0x192   : > { %vm1446_vm14 = vweird.f32 %v4665_v20  ;;  %v4724_v4 = vadd.f32 %v3918_v46, %v977_v60  ;;  %v2614_v36 = vsel %vm2422_vm11, %v2550_v25, 0.0  ;;  %v1997_v9 = vmul.f32 %v1438_v1, %v4585_v50  ;;  %v2456_v1 = vld [vmem:[#allocation2 + $0x110] sm:$0xff]  ;;  %vm6554_vm10 = vmmov %vm6549_vm8 }
 0x193   : > { %v4727_v45 = vmax.f32 %v1167_v43, 0.0  ;;  %v4730_v37 = vadd.f32 %v3922_v47, %v977_v60  ;;  %v2678_v12 = vadd.f32 %v2614_v36, %v2486_v49  ;;  %v1444_v48 = vmul.f32 %v4665_v20, %v1443_v8  ;;  %vm1447_vm0 = vmor %vm1445_vm12, %vm1446_vm14  ;;  %v685_v43 = vpop.f32.mrf.mxu2  ;;  %v640_v36 = vpop.f32.mrf.mxu0 }
 0x194   : > { %v1168_v54 = vsub.f32 %v3971_v13, %v1104_v62  ;;  %v2061_v3 = vsub.f32 1.0, %v1997_v9  ;;  %vm2262_vm3 = vcmp.gt.s32.totalorder %v4005_v38, %v4671_v24  ;;  %v4748_v61 = vadd.s32 %v3975_v14, %v2138_v15  ;;  %v798_v24 = vpop.f32.mrf.mxu3 }
 0x195   : > { %v4743_v27 = vpop.eup %3300  ;;  %v4751_v50 = vadd.f32 1e-30, %v4727_v45  ;;  %2742 = vst [vmem:[#allocation2 + $0x128] sm:$0xff] %v2678_v12  ;;  %v1448_v0 = vsel %vm1447_vm0, %v4665_v20, %v1444_v48  ;;  %vm2198_vm2 = vcmp.lt.f32.partialorder %v4601_v51, 1.0  ;;  %v1071_v44 = vadd.f32 %v3918_v46, %v972_v18 }
 0x196   : > { %v4753_v39 = vpop.eup %3302  ;;  %v1750_v13 = vmul.f32 %v4743_v27, %v4685_v41  ;;  %v4759_v17 = vmax.f32 %v1168_v54, 0.0  ;;  %v2519_v29 = vmul.f32 %v2061_v3, %v2061_v3  ;;  %v1998_v55 = vmul.f32 %v1448_v0, %v4601_v51  ;;  %vm4782_vm7 = vmand %vm2198_vm2, %vm2262_vm3 }
 0x197   : > { %v1760_v63 = vmul.f32 %v4753_v39, %v4689_v56  ;;  %v4766_v33 = vadd.f32 %v3922_v47, %v972_v18  ;;  %3304 = vrsqrt.f32 %v4751_v50  ;;  %vm2293_vm9 = vcmp.gt.s32.totalorder %v3998_v32, %v4748_v61  ;;  %vm2392_vm8 = vmand %vm4782_vm7, %vm6554_vm10 }
 0x198   : > { %v1751_v20 = vmul.f32 %v4743_v27, %v1750_v13  ;;  %v4775_v34 = vadd.f32 1e-30, %v4759_v17  ;;  %v2583_v21 = vsel %vm2391_vm1, %v2519_v29, 0.0  ;;  %v2062_v49 = vsub.f32 1.0, %v1998_v55 }
 0x199   : > { %v1761_v15 = vmul.f32 %v4753_v39, %v1760_v63  ;;  %v2647_v62 = vadd.f32 %v2583_v21, %v2455_v40  ;;  %vm2294_vm5 = vcmp.gt.s32.totalorder %v4005_v38, %v4748_v61  ;;  %vm1755_vm6 = vweird.f32 %v4685_v41 }
 0x19a   : > { %v1752_v60 = vmul.f32 0.5, %v1751_v20  ;;  %3306 = vrsqrt.f32 %v4775_v34  ;;  %v2520_v51 = vmul.f32 %v2062_v49, %v2062_v49  ;;  %vm2229_vm15 = vcmp.lt.f32.partialorder %v4663_v58, 1.0 }
 0x19b   : > { %v1762_v8 = vmul.f32 0.5, %v1761_v15  ;;  %2711 = vst [vmem:[#allocation2 + $0x180] sm:$0xff] %v2647_v62  ;;  %vm1756_vm11 = vweird.f32 %v4743_v27  ;;  %v2123_v12 = vadd.s32 40, %v3959_v7  ;;  %v1135_v28 = vmul.f32 2.0, %v685_v43  ;;  %vm2357_vm1 = vmand %vm2229_vm15, %vm2293_vm9 }
 0x19c   : > { %v1753_v9 = vsub.f32 1.5, %v1752_v60  ;;  %v2584_v48 = vsel %vm2392_vm8, %v2520_v51, 0.0  ;;  %vm1766_vm12 = vweird.f32 %v4753_v39  ;;  %v1136_v3 = vmul.f32 2.0, %v798_v24  ;;  %vm1757_vm14 = vmor %vm1755_vm6, %vm1756_vm11  ;;  %v2487_v51 = vld [vmem:[#allocation2 + $0x1a0] sm:$0xff] }
 0x19d   : > { %v1763_v54 = vsub.f32 1.5, %v1762_v8  ;;  %v4801_v18 = vpop.eup %3304  ;;  %v2648_v0 = vadd.f32 %v2584_v48, %v2456_v1  ;;  %v1199_v40 = vsub.f32 %v1071_v44, %v1135_v28  ;;  %v1105_v29 = vmul.f32 2.0, %v640_v36  ;;  %vm2423_vm15 = vmand %vm2357_vm1, %vm2381_vm4 }
 0x19e   : > { %v1754_v13 = vmul.f32 %v4743_v27, %v1753_v9  ;;  %vm1765_vm13 = vweird.f32 %v4689_v56  ;;  %vm2230_vm0 = vcmp.lt.f32.partialorder %v4673_v57, 1.0  ;;  %v1450_v63 = vmul.f32 %v4801_v18, %v4751_v50 }
 0x19f   : > { %v1764_v55 = vmul.f32 %v4753_v39, %v1763_v54  ;;  %2712 = vst [vmem:[#allocation2 + $0x110] sm:$0xff] %v2648_v0  ;;  %vm1767_vm3 = vmor %vm1765_vm13, %vm1766_vm12  ;;  %v4817_v41 = vadd.s32 %v3975_v14, %v2123_v12  ;;  %v4819_v44 = vmax.f32 %v1199_v40, 0.0  ;;  %v1200_v56 = vsub.f32 %v4766_v33, %v1136_v3 }
 0x1a0   : > { %v4811_v20 = vpop.eup %3306  ;;  %v1758_v21 = vsel %vm1757_vm14, %v4743_v27, %v1754_v13  ;;  %v1451_v15 = vmul.f32 %v4801_v18, %v1450_v63  ;;  %vm2199_vm2 = vcmp.lt.f32.partialorder %v4727_v45, 1.0  ;;  %v1169_v60 = vsub.f32 %v3957_v6, %v1105_v29  ;;  %vm4845_vm6 = vmand %vm2230_vm0, %vm2294_vm5  ;;  %v753_v13 = vpop.f32.mrf.mxu1 }
 0x1a1   : > { %v2029_v49 = vmul.f32 %v1758_v21, %v4663_v58  ;;  %v1768_v25 = vsel %vm1767_vm3, %v4753_v39, %v1764_v55  ;;  %v1460_v43 = vmul.f32 %v4811_v20, %v4775_v34  ;;  %v4830_v62 = vadd.f32 1e-30, %v4819_v44 }
 0x1a2   : > { %v2030_v27 = vmul.f32 %v1768_v25, %v4673_v57  ;;  %v1452_v39 = vmul.f32 0.5, %v1451_v15  ;;  %vm1455_vm7 = vweird.f32 %v4751_v50  ;;  %vm1465_vm10 = vweird.f32 %v4775_v34  ;;  %v2488_v57 = vld [vmem:[#allocation2 + $0x1f0] sm:$0xff]  ;;  %v4882_v25 = vpop.permute.xlu1 %991 }
 0x1a3   : > { %v2093_v24 = vsub.f32 1.0, %v2029_v49  ;;  %v1461_v33 = vmul.f32 %v4811_v20, %v1460_v43  ;;  %3308 = vrsqrt.f32 %v4830_v62  ;;  %v4851_v58 = vmax.f32 %v1200_v56, 0.0 }
 0x1a4   : > { %v2094_v1 = vsub.f32 1.0, %v2030_v27  ;;  %v1453_v36 = vsub.f32 1.5, %v1452_v39  ;;  %vm1456_vm9 = vweird.f32 %v4801_v18  ;;  %v2139_v12 = vadd.s32 168, %v3959_v7  ;;  %v982_v27 = vpop.permute.xlu2 %981 }
 0x1a5   : > { %v2551_v8 = vmul.f32 %v2093_v24, %v2093_v24  ;;  %v1462_v9 = vmul.f32 0.5, %v1461_v33  ;;  %v4858_v28 = vadd.f32 1e-30, %v4851_v58  ;;  %v4860_v48 = vmax.f32 %v1169_v60, 0.0  ;;  %vm1457_vm12 = vmor %vm1455_vm7, %vm1456_vm9  ;;  %v688_v24 = vpop.f32.mrf.mxu2 }
 0x1a6   : > { %v2552_v61 = vmul.f32 %v2094_v1, %v2094_v1  ;;  %vm6557_vm5 = vcmp.lt.s32.totalorder %v4005_v38, 500  ;;  %v1454_v3 = vmul.f32 %v4801_v18, %v1453_v36  ;;  %vm1466_vm11 = vweird.f32 %v4811_v20 }
 0x1a7   : > { %v2615_v54 = vsel %vm2423_vm15, %v2551_v8, 0.0  ;;  %vm2424_vm8 = vmand %vm4845_vm6, %vm6557_vm5  ;;  %v1463_v0 = vsub.f32 1.5, %v1462_v9  ;;  %vm2263_vm14 = vcmp.gt.s32.totalorder %v3998_v32, %v4817_v41  ;;  %3310 = vrsqrt.f32 %v4858_v28  ;;  %v2457_v9 = vld [vmem:[#allocation2 + $0x118] sm:$0xff] }
 0x1a8   : > { %v2679_v40 = vadd.f32 %v2615_v54, %v2487_v51  ;;  %v2616_v29 = vsel %vm2424_vm8, %v2552_v61, 0.0  ;;  %v1458_v63 = vsel %vm1457_vm12, %v4801_v18, %v1454_v3  ;;  %v4878_v56 = vadd.f32 1e-30, %v4860_v48  ;;  %vm4889_vm13 = vmor %vm1465_vm10, %vm1466_vm11  ;;  %v2458_v3 = vld [vmem:[#allocation2 + $0x98] sm:$0xff] }
 0x1a9   : > { %v2680_v55 = vadd.f32 %v2616_v29, %v2488_v57  ;;  %v1464_v21 = vmul.f32 %v4811_v20, %v1463_v0  ;;  %v4880_v49 = vpop.eup %3308  ;;  %v1999_v50 = vmul.f32 %v1458_v63, %v4727_v45  ;;  %vm2200_vm0 = vcmp.lt.f32.partialorder %v4759_v17, 1.0  ;;  %vm2327_vm1 = vmand %vm2199_vm2, %vm2263_vm14 }
 0x1aa   : > { %2743 = vst [vmem:[#allocation2 + $0x1a0] sm:$0xff] %v2679_v40  ;;  %v4895_v18 = vadd.s32 %v3975_v14, %v2139_v12  ;;  %v1106_v43 = vmul.f32 2.0, %v753_v13  ;;  %vm2264_vm3 = vcmp.gt.s32.totalorder %v4005_v38, %v4817_v41  ;;  %v1770_v34 = vmul.f32 %v4880_v49, %v4830_v62  ;;  %vm2393_vm10 = vmand %vm2327_vm1, %vm2381_vm4 }
 0x1ab   : > { %2744 = vst [vmem:[#allocation2 + $0x1f0] sm:$0xff] %v2680_v55  ;;  %v1468_v60 = vsel %vm4889_vm13, %v4811_v20, %v1464_v21  ;;  %3312 = vrsqrt.f32 %v4878_v56  ;;  %v4907_v39 = vadd.f32 %v3918_v46, %v4882_v25  ;;  %v4910_v33 = vadd.f32 %v3918_v46, %v982_v27  ;;  %vm4931_vm2 = vmand %vm2200_vm0, %vm2264_vm3 }
 0x1ac   : > { %v2063_v1 = vsub.f32 1.0, %v1999_v50  ;;  %v2000_v20 = vmul.f32 %v1468_v60, %v4759_v17  ;;  %v4919_v6 = vadd.f32 %v3922_v47, %v982_v27  ;;  %v1771_v51 = vmul.f32 %v4880_v49, %v1770_v34  ;;  %vm2394_vm8 = vmand %vm4931_vm2, %vm6557_vm5  ;;  %v643_v27 = vpop.f32.mrf.mxu0 }
 0x1ad   : > { %vm2231_vm7 = vcmp.lt.f32.partialorder %v4819_v44, 1.0  ;;  %v1170_v8 = vsub.f32 %v3965_v10, %v1106_v43  ;;  %v4924_v36 = vpop.eup %3310  ;;  %vm2295_vm6 = vcmp.gt.s32.totalorder %v3998_v32, %v4895_v18  ;;  %v1137_v12 = vmul.f32 2.0, %v688_v24  ;;  %v801_v43 = vpop.f32.mrf.mxu3 }
 0x1ae   : > { %v2521_v57 = vmul.f32 %v2063_v1, %v2063_v1  ;;  %v2064_v61 = vsub.f32 1.0, %v2000_v20  ;;  %v1772_v10 = vmul.f32 0.5, %v1771_v51  ;;  %vm1775_vm9 = vweird.f32 %v4830_v62  ;;  %vm2359_vm0 = vmand %vm2231_vm7, %vm2295_vm6 }
 0x1af   : > { %v1780_v54 = vmul.f32 %v4924_v36, %v4858_v28  ;;  %v4942_v41 = vmax.f32 %v1170_v8, 0.0  ;;  %vm1776_vm15 = vweird.f32 %v4880_v49  ;;  %v1201_v13 = vsub.f32 %v4724_v4, %v1137_v12  ;;  %vm4997_vm6 = vmand %vm2359_vm0, %vm2381_vm4 }
 0x1b0   : > { %v2585_v17 = vsel %vm2393_vm10, %v2521_v57, 0.0  ;;  %v2522_v0 = vmul.f32 %v2064_v61, %v2064_v61  ;;  %v1773_v55 = vsub.f32 1.5, %v1772_v10  ;;  %vm2296_vm11 = vcmp.gt.s32.totalorder %v4005_v38, %v4895_v18  ;;  %vm1777_vm12 = vmor %vm1775_vm9, %vm1776_vm15 }
 0x1b1   : > { %v4946_v40 = vpop.eup %3312  ;;  %v2649_v29 = vadd.f32 %v2585_v17, %v2457_v9  ;;  %v1781_v63 = vmul.f32 %v4924_v36, %v1780_v54  ;;  %v4954_v21 = vadd.f32 1e-30, %v4942_v41  ;;  %v2124_v15 = vadd.s32 48, %v3959_v7 }
 0x1b2   : > { %v2586_v50 = vsel %vm2394_vm8, %v2522_v0, 0.0  ;;  %v1470_v4 = vmul.f32 %v4946_v40, %v4878_v56  ;;  %v1774_v34 = vmul.f32 %v4880_v49, %v1773_v55  ;;  %vm1786_vm14 = vweird.f32 %v4924_v36 }
 0x1b3   : > { %2713 = vst [vmem:[#allocation2 + $0x118] sm:$0xff] %v2649_v29  ;;  %v2650_v60 = vadd.f32 %v2586_v50, %v2458_v3  ;;  %v1782_v24 = vmul.f32 0.5, %v1781_v63  ;;  %3314 = vrsqrt.f32 %v4954_v21  ;;  %vm2232_vm13 = vcmp.lt.f32.partialorder %v4851_v58, 1.0  ;;  %v2489_v29 = vld [vmem:[#allocation2 + $0xe8] sm:$0xff] }
 0x1b4   : > { %v1471_v1 = vmul.f32 %v4946_v40, %v1470_v4  ;;  %v4970_v20 = vmax.f32 %v1201_v13, 0.0  ;;  %v1778_v51 = vsel %vm1777_vm12, %v4880_v49, %v1774_v34  ;;  %v1138_v9 = vmul.f32 2.0, %v801_v43  ;;  %vm5012_vm10 = vmand %vm2232_vm13, %vm2296_vm11 }
 0x1b5   : > { %2714 = vst [vmem:[#allocation2 + $0x98] sm:$0xff] %v2650_v60  ;;  %v1783_v8 = vsub.f32 1.5, %v1782_v24  ;;  %v1107_v57 = vmul.f32 2.0, %v643_v27  ;;  %v2031_v61 = vmul.f32 %v1778_v51, %v4819_v44  ;;  %vm1785_vm3 = vweird.f32 %v4858_v28 }
 0x1b6   : > { %v1472_v62 = vmul.f32 0.5, %v1471_v1  ;;  %v4981_v45 = vadd.f32 1e-30, %v4970_v20  ;;  %vm1475_vm1 = vweird.f32 %v4878_v56  ;;  %v4986_v49 = vadd.s32 %v3975_v14, %v2124_v15  ;;  %vm1787_vm2 = vmor %vm1785_vm3, %vm1786_vm14 }
 0x1b7   : > { %v1784_v12 = vmul.f32 %v4924_v36, %v1783_v8  ;;  %v1202_v10 = vsub.f32 %v4730_v37, %v1138_v9  ;;  %v2095_v54 = vsub.f32 1.0, %v2031_v61  ;;  %vm1476_vm7 = vweird.f32 %v4946_v40 }
 0x1b8   : > { %v1473_v44 = vsub.f32 1.5, %v1472_v62  ;;  %3316 = vrsqrt.f32 %v4981_v45  ;;  %v2140_v37 = vadd.s32 176, %v3959_v7  ;;  %v1171_v13 = vsub.f32 %v3951_v2, %v1107_v57  ;;  %vm1477_vm9 = vmor %vm1475_vm1, %vm1476_vm7 }
 0x1b9   : > { %v4993_v28 = vpop.eup %3314  ;;  %v1788_v3 = vsel %vm1787_vm2, %v4924_v36, %v1784_v12  ;;  %v5003_v0 = vmax.f32 %v1202_v10, 0.0  ;;  %v2553_v55 = vmul.f32 %v2095_v54, %v2095_v54  ;;  %vm2201_vm15 = vcmp.lt.f32.partialorder %v4860_v48, 1.0  ;;  %v756_v12 = vpop.f32.mrf.mxu1 }
 0x1ba   : > { %v2032_v63 = vmul.f32 %v1788_v3, %v4851_v58  ;;  %v1474_v36 = vmul.f32 %v4946_v40, %v1473_v44  ;;  %v1480_v4 = vmul.f32 %v4993_v28, %v4954_v21  ;;  %vm2265_vm5 = vcmp.gt.s32.totalorder %v3998_v32, %v4986_v49  ;;  %v691_v10 = vpop.f32.mrf.mxu2  ;;  %v2459_v3 = vld [vmem:[#allocation2 + $0x120] sm:$0xff] }
 0x1bb   : > { %v5025_v2 = vadd.f32 1e-30, %v5003_v0  ;;  %v5027_v58 = vmax.f32 %v1171_v13, 0.0  ;;  %v2617_v18 = vsel %vm4997_vm6, %v2553_v55, 0.0  ;;  %v5035_v34 = vadd.s32 %v3975_v14, %v2140_v37  ;;  %vm5058_vm14 = vmand %vm2201_vm15, %vm2265_vm5 }
 0x1bc   : > { %v2096_v15 = vsub.f32 1.0, %v2032_v63  ;;  %v1478_v43 = vsel %vm1477_vm9, %v4946_v40, %v1474_v36  ;;  %v1481_v27 = vmul.f32 %v4993_v28, %v1480_v4  ;;  %v2681_v56 = vadd.f32 %v2617_v18, %v2489_v29  ;;  %v2490_v40 = vld [vmem:[#allocation2 + $0x78] sm:$0xff]  ;;  %vm2395_vm7 = vmand %vm5058_vm14, %vm2381_vm4 }
 0x1bd   : > { %v2001_v60 = vmul.f32 %v1478_v43, %v4860_v48  ;;  %3318 = vrsqrt.f32 %v5025_v2  ;;  %vm6566_vm8 = vcmp.lt.s32.totalorder %v4005_v38, 500  ;;  %vm2266_vm12 = vcmp.gt.s32.totalorder %v4005_v38, %v4986_v49  ;;  %v804_v48 = vpop.f32.mrf.mxu3 }
 0x1be   : > { %v5038_v24 = vpop.eup %3316  ;;  %vm5044_vm11 = vmand %vm5012_vm10, %vm6566_vm8  ;;  %v2554_v51 = vmul.f32 %v2096_v15, %v2096_v15  ;;  %v1482_v8 = vmul.f32 0.5, %v1481_v27  ;;  %v5051_v9 = vadd.f32 1e-30, %v5027_v58  ;;  %2745 = vst [vmem:[#allocation2 + $0xe8] sm:$0xff] %v2681_v56  ;;  %vm1485_vm13 = vweird.f32 %v4954_v21 }
 0x1bf   : > { %v2065_v57 = vsub.f32 1.0, %v2001_v60  ;;  %vm2202_vm0 = vcmp.lt.f32.partialorder %v4942_v41, 1.0  ;;  %v1790_v62 = vmul.f32 %v5038_v24, %v4981_v45  ;;  %vm1486_vm3 = vweird.f32 %v4993_v28 }
 0x1c0   : > { %v2618_v54 = vsel %vm5044_vm11, %v2554_v51, 0.0  ;;  %v1483_v44 = vsub.f32 1.5, %v1482_v8  ;;  %vm2233_vm1 = vcmp.lt.f32.partialorder %v4970_v20, 1.0  ;;  %3320 = vrsqrt.f32 %v5051_v9  ;;  %vm1487_vm10 = vmor %vm1485_vm13, %vm1486_vm3 }
 0x1c1   : > { %v2682_v17 = vadd.f32 %v2618_v54, %v2490_v40  ;;  %v2523_v37 = vmul.f32 %v2065_v57, %v2065_v57  ;;  %v1791_v13 = vmul.f32 %v5038_v24, %v1790_v62  ;;  %vm2297_vm2 = vcmp.gt.s32.totalorder %v3998_v32, %v5035_v34  ;;  %vm5107_vm11 = vmand %vm2202_vm0, %vm2266_vm12  ;;  %v2460_v54 = vld [vmem:[#allocation2 + $0x150] sm:$0xff] }
 0x1c2   : > { %v1484_v29 = vmul.f32 %v4993_v28, %v1483_v44  ;;  %vm1795_vm6 = vweird.f32 %v4981_v45  ;;  %v1108_v55 = vmul.f32 2.0, %v756_v12  ;;  %v1139_v63 = vmul.f32 2.0, %v691_v10  ;;  %v646_v10 = vpop.f32.mrf.mxu0  ;;  %vm2361_vm3 = vmand %vm2233_vm1, %vm2297_vm2 }
 0x1c3   : > { %v5080_v50 = vpop.eup %3318  ;;  %2746 = vst [vmem:[#allocation2 + $0x78] sm:$0xff] %v2682_v17  ;;  %v2587_v36 = vsel %vm2395_vm7, %v2523_v37, 0.0  ;;  %v1792_v4 = vmul.f32 0.5, %v1791_v13  ;;  %v2125_v18 = vadd.s32 56, %v3959_v7  ;;  %v1140_v15 = vmul.f32 2.0, %v804_v48  ;;  %vm5161_vm7 = vmand %vm2361_vm3, %vm2381_vm4 }
 0x1c4   : > { %v2651_v43 = vadd.f32 %v2587_v36, %v2459_v3  ;;  %v1488_v27 = vsel %vm1487_vm10, %v4993_v28, %v1484_v29  ;;  %vm1796_vm9 = vweird.f32 %v5038_v24  ;;  %v1800_v56 = vmul.f32 %v5080_v50, %v5025_v2 }
 0x1c5   : > { %vm2298_vm15 = vcmp.gt.s32.totalorder %v4005_v38, %v5035_v34  ;;  %v2002_v60 = vmul.f32 %v1488_v27, %v4942_v41  ;;  %v1793_v1 = vsub.f32 1.5, %v1792_v4  ;;  %v1172_v21 = vsub.f32 %v3954_v5, %v1108_v55  ;;  %vm1797_vm14 = vmor %vm1795_vm6, %vm1796_vm9  ;;  %v2491_v27 = vld [vmem:[#allocation2 + $0x70] sm:$0xff]  ;;  %v759_v34 = vpop.f32.mrf.mxu1 }
 0x1c6   : > { %v1203_v40 = vsub.f32 %v4910_v33, %v1139_v63  ;;  %v5096_v51 = vpop.eup %3320  ;;  %2715 = vst [vmem:[#allocation2 + $0x120] sm:$0xff] %v2651_v43  ;;  %v1801_v28 = vmul.f32 %v5080_v50, %v1800_v56  ;;  %vm1805_vm5 = vweird.f32 %v5025_v2  ;;  %vm2234_vm8 = vcmp.lt.f32.partialorder %v5003_v0, 1.0 }
 0x1c7   : > { %v1204_v8 = vsub.f32 %v4919_v6, %v1140_v15  ;;  %v2066_v57 = vsub.f32 1.0, %v2002_v60  ;;  %v1794_v33 = vmul.f32 %v5038_v24, %v1793_v1  ;;  %v1490_v61 = vmul.f32 %v5096_v51, %v5051_v9  ;;  %vm5176_vm10 = vmand %vm2234_vm8, %vm2298_vm15 }
 0x1c8   : > { %v5115_v62 = vadd.s32 %v3975_v14, %v2125_v18  ;;  %v1802_v6 = vmul.f32 0.5, %v1801_v28  ;;  %v5121_v49 = vmax.f32 %v1172_v21, 0.0  ;;  %v5123_v41 = vmax.f32 %v1203_v40, 0.0  ;;  %v987_v40 = vpop.permute.xlu0 %986 }
 0x1c9   : > { %v2141_v12 = vadd.s32 184, %v3959_v7  ;;  %v2524_v44 = vmul.f32 %v2066_v57, %v2066_v57  ;;  %v1798_v48 = vsel %vm1797_vm14, %v5038_v24, %v1794_v33  ;;  %vm1806_vm12 = vweird.f32 %v5080_v50  ;;  %v694_v33 = vpop.f32.mrf.mxu2 }
 0x1ca   : > { %v1491_v17 = vmul.f32 %v5096_v51, %v1490_v61  ;;  %vm6573_vm13 = vcmp.lt.s32.totalorder %v4005_v38, 500  ;;  %v2033_v45 = vmul.f32 %v1798_v48, %v4970_v20  ;;  %v1803_v3 = vsub.f32 1.5, %v1802_v6  ;;  %vm1807_vm1 = vmor %vm1805_vm5, %vm1806_vm12  ;;  %v2492_v48 = vld [vmem:[#allocation2 + $0x90] sm:$0xff] }
 0x1cb   : > { %vm2396_vm0 = vmand %vm5107_vm11, %vm6573_vm13  ;;  %v5135_v37 = vadd.f32 1e-30, %v5121_v49  ;;  %v5137_v13 = vmax.f32 %v1204_v8, 0.0  ;;  %v5145_v55 = vadd.f32 1e-30, %v5123_v41  ;;  %v1109_v63 = vmul.f32 2.0, %v646_v10  ;;  %v5193_v8 = vpop.permute.xlu1 %1006 }
 0x1cc   : > { %v2588_v29 = vsel %vm2396_vm0, %v2524_v44, 0.0  ;;  %v1492_v24 = vmul.f32 0.5, %v1491_v17  ;;  %v2097_v4 = vsub.f32 1.0, %v2033_v45  ;;  %v1804_v18 = vmul.f32 %v5080_v50, %v1803_v3  ;;  %vm6578_vm15 = vmmov %vm6573_vm13 }
 0x1cd   : > { %v2652_v36 = vadd.f32 %v2588_v29, %v2460_v54  ;;  %3322 = vrsqrt.f32 %v5135_v37  ;;  %v5151_v15 = vadd.f32 %v3922_v47, %v4882_v25  ;;  %vm1496_vm2 = vweird.f32 %v5096_v51  ;;  %vm5215_vm8 = vmand %vm5176_vm10, %vm6578_vm15 }
 0x1ce   : > { %v1493_v20 = vsub.f32 1.5, %v1492_v24  ;;  %3324 = vrsqrt.f32 %v5145_v55  ;;  %v2555_v25 = vmul.f32 %v2097_v4, %v2097_v4  ;;  %v1808_v56 = vsel %vm1807_vm1, %v5080_v50, %v1804_v18 }
 0x1cf   : > { %2716 = vst [vmem:[#allocation2 + $0x150] sm:$0xff] %v2652_v36  ;;  %vm2203_vm6 = vcmp.lt.f32.partialorder %v5027_v58, 1.0  ;;  %v5168_v2 = vadd.f32 1e-30, %v5137_v13  ;;  %v2034_v60 = vmul.f32 %v1808_v56, %v5003_v0  ;;  %vm1495_vm9 = vweird.f32 %v5051_v9 }
 0x1d0   : > { %v1494_v21 = vmul.f32 %v5096_v51, %v1493_v20  ;;  %v1173_v50 = vsub.f32 %v3987_v23, %v1109_v63  ;;  %v2619_v28 = vsel %vm5161_vm7, %v2555_v25, 0.0  ;;  %vm1497_vm5 = vmor %vm1495_vm9, %vm1496_vm2  ;;  %vm2267_vm11 = vcmp.gt.s32.totalorder %v3998_v32, %v5115_v62 }
 0x1d1   : > { %v5190_v0 = vadd.s32 %v3975_v14, %v2141_v12  ;;  %3326 = vrsqrt.f32 %v5168_v2  ;;  %v2683_v9 = vadd.f32 %v2619_v28, %v2491_v27  ;;  %v2098_v23 = vsub.f32 1.0, %v2034_v60  ;;  %vm5231_vm12 = vmand %vm2203_vm6, %vm2267_vm11  ;;  %v2461_v27 = vld [vmem:[#allocation2 + $0x108] sm:$0xff] }
 0x1d2   : > { %v1498_v57 = vsel %vm1497_vm5, %v5096_v51, %v1494_v21  ;;  %v5196_v5 = vmax.f32 %v1173_v50, 0.0  ;;  %v1077_v6 = vadd.f32 %v3918_v46, %v987_v40  ;;  %v5202_v10 = vadd.f32 %v3922_v47, %v987_v40  ;;  %vm2397_vm2 = vmand %vm5231_vm12, %vm2381_vm4 }
 0x1d3   : > { %v5198_v61 = vpop.eup %3322  ;;  %v5206_v12 = vadd.f32 %v3918_v46, %v5193_v8  ;;  %v2003_v54 = vmul.f32 %v1498_v57, %v5027_v58  ;;  %2747 = vst [vmem:[#allocation2 + $0x70] sm:$0xff] %v2683_v9  ;;  %v2556_v17 = vmul.f32 %v2098_v23, %v2098_v23  ;;  %vm2268_vm14 = vcmp.gt.s32.totalorder %v4005_v38, %v5115_v62 }
 0x1d4   : > { %v5209_v44 = vpop.eup %3324  ;;  %v1500_v45 = vmul.f32 %v5198_v61, %v5135_v37  ;;  %v5224_v3 = vadd.f32 1e-30, %v5196_v5  ;;  %v1110_v29 = vmul.f32 2.0, %v759_v34  ;;  %vm2204_vm13 = vcmp.lt.f32.partialorder %v5121_v49, 1.0 }
 0x1d5   : > { %v2067_v24 = vsub.f32 1.0, %v2003_v54  ;;  %v1810_v36 = vmul.f32 %v5209_v44, %v5145_v55  ;;  %vm2299_vm0 = vcmp.gt.s32.totalorder %v3998_v32, %v5190_v0  ;;  %v1141_v4 = vmul.f32 2.0, %v694_v33  ;;  %v807_v33 = vpop.f32.mrf.mxu3 }
 0x1d6   : > { %v2620_v18 = vsel %vm5215_vm8, %v2556_v17, 0.0  ;;  %v1501_v20 = vmul.f32 %v5198_v61, %v1500_v45  ;;  %vm2235_vm3 = vcmp.lt.f32.partialorder %v5123_v41, 1.0  ;;  %3328 = vrsqrt.f32 %v5224_v3  ;;  %vm5295_vm8 = vmand %vm2204_vm13, %vm2268_vm14 }
 0x1d7   : > { %v5245_v58 = vpop.eup %3326  ;;  %v2684_v43 = vadd.f32 %v2620_v18, %v2492_v48  ;;  %v2525_v25 = vmul.f32 %v2067_v24, %v2067_v24  ;;  %vm1505_vm1 = vweird.f32 %v5135_v37  ;;  %v1811_v56 = vmul.f32 %v5209_v44, %v1810_v36  ;;  %vm5308_vm12 = vmand %vm2235_vm3, %vm2299_vm0 }
 0x1d8   : > { %v1502_v60 = vmul.f32 0.5, %v1501_v20  ;;  %vm1815_vm7 = vweird.f32 %v5145_v55  ;;  %v1820_v1 = vmul.f32 %v5245_v58, %v5168_v2  ;;  %v1174_v21 = vsub.f32 %v4003_v35, %v1110_v29  ;;  %v2494_v20 = vld [vmem:[#allocation2 + $0xd0] sm:$0xff] }
 0x1d9   : > { %2748 = vst [vmem:[#allocation2 + $0x90] sm:$0xff] %v2684_v43  ;;  %v2589_v50 = vsel %vm2397_vm2, %v2525_v25, 0.0  ;;  %vm1506_vm6 = vweird.f32 %v5198_v61  ;;  %v1812_v40 = vmul.f32 0.5, %v1811_v56  ;;  %v1205_v28 = vsub.f32 %v1077_v6, %v1141_v4 }
 0x1da   : > { %v2653_v34 = vadd.f32 %v2589_v50, %v2461_v27  ;;  %v1503_v9 = vsub.f32 1.5, %v1502_v60  ;;  %v1821_v23 = vmul.f32 %v5245_v58, %v1820_v1  ;;  %v5259_v57 = vmax.f32 %v1174_v21, 0.0  ;;  %vm1507_vm5 = vmor %vm1505_vm1, %vm1506_vm6  ;;  %v2462_v21 = vld [vmem:[#allocation2 + $0x60] sm:$0xff] }
 0x1db   : > { %v1813_v54 = vsub.f32 1.5, %v1812_v40  ;;  %vm1816_vm10 = vweird.f32 %v5209_v44  ;;  %vm2236_vm9 = vcmp.lt.f32.partialorder %v5137_v13, 1.0  ;;  %v5263_v51 = vmax.f32 %v1205_v28, 0.0  ;;  %v2463_v28 = vld [vmem:[#allocation2 + $0xe0] sm:$0xff] }
 0x1dc   : > { %v5265_v35 = vpop.eup %3328  ;;  %2717 = vst [vmem:[#allocation2 + $0x108] sm:$0xff] %v2653_v34  ;;  %v1504_v48 = vmul.f32 %v5198_v61, %v1503_v9  ;;  %v1822_v6 = vmul.f32 0.5, %v1821_v23  ;;  %v2126_v17 = vadd.s32 64, %v3959_v7  ;;  %v5270_v45 = vadd.f32 1e-30, %v5259_v57  ;;  %vm1817_vm11 = vmor %vm1815_vm7, %vm1816_vm10  ;;  %v2493_v34 = vld [vmem:[#allocation2 + $0x1d8] sm:$0xff] }
 0x1dd   : > { %v1814_v29 = vmul.f32 %v5209_v44, %v1813_v54  ;;  %v1510_v24 = vmul.f32 %v5265_v35, %v5224_v3  ;;  %v5280_v63 = vadd.f32 1e-30, %v5263_v51  ;;  %v1142_v36 = vmul.f32 2.0, %v807_v33  ;;  %vm5339_vm10 = vmand %vm5308_vm12, %vm2381_vm4 }
 0x1de   : > { %v1508_v4 = vsel %vm1507_vm5, %v5198_v61, %v1504_v48  ;;  %v1823_v18 = vsub.f32 1.5, %v1822_v6  ;;  %vm1826_vm15 = vweird.f32 %v5245_v58  ;;  %3330 = vrsqrt.f32 %v5270_v45 }
 0x1df   : > { %v2004_v37 = vmul.f32 %v1508_v4, %v5121_v49  ;;  %v1818_v61 = vsel %vm1817_vm11, %v5209_v44, %v1814_v29  ;;  %v1511_v55 = vmul.f32 %v5265_v35, %v1510_v24  ;;  %3332 = vrsqrt.f32 %v5280_v63 }
 0x1e0   : > { %v2035_v43 = vmul.f32 %v1818_v61, %v5123_v41  ;;  %v1824_v49 = vmul.f32 %v5245_v58, %v1823_v18  ;;  %vm1825_vm14 = vweird.f32 %v5168_v2  ;;  %v5315_v44 = vadd.s32 %v3975_v14, %v2126_v17  ;;  %v649_v41 = vpop.f32.mrf.mxu0 }
 0x1e1   : > { %v2068_v27 = vsub.f32 1.0, %v2004_v37  ;;  %vm1827_vm13 = vmor %vm1825_vm14, %vm1826_vm15  ;;  %vm2300_vm1 = vcmp.gt.s32.totalorder %v4005_v38, %v5190_v0  ;;  %v1512_v25 = vmul.f32 0.5, %v1511_v55  ;;  %v1206_v56 = vsub.f32 %v5202_v10, %v1142_v36  ;;  %v762_v36 = vpop.f32.mrf.mxu1 }
 0x1e2   : > { %v2099_v60 = vsub.f32 1.0, %v2035_v43  ;;  %v1828_v1 = vsel %vm1827_vm13, %v5245_v58, %v1824_v49  ;;  %vm1515_vm0 = vweird.f32 %v5224_v3  ;;  %vm2205_vm3 = vcmp.lt.f32.partialorder %v5196_v5, 1.0  ;;  %vm5356_vm11 = vmand %vm2236_vm9, %vm2300_vm1 }
 0x1e3   : > { %vm6587_vm2 = vcmp.lt.s32.totalorder %v4005_v38, 500  ;;  %v2526_v50 = vmul.f32 %v2068_v27, %v2068_v27  ;;  %v2036_v10 = vmul.f32 %v1828_v1, %v5137_v13  ;;  %v1513_v40 = vsub.f32 1.5, %v1512_v25 }
 0x1e4   : > { %vm5327_vm7 = vmand %vm5295_vm8, %vm6587_vm2  ;;  %vm1516_vm6 = vweird.f32 %v5265_v35  ;;  %v5333_v58 = vpop.eup %3330  ;;  %v2557_v9 = vmul.f32 %v2099_v60, %v2099_v60  ;;  %vm2269_vm5 = vcmp.gt.s32.totalorder %v3998_v32, %v5315_v44  ;;  %v5345_v23 = vmax.f32 %v1206_v56, 0.0  ;;  %v6595_v56 = vld [vmem:[#allocation11_spill] sm:$0xff] }
 0x1e5   : > { %v1111_v33 = vmul.f32 2.0, %v649_v41  ;;  %v5347_v54 = vpop.eup %3332  ;;  %v2590_v48 = vsel %vm5327_vm7, %v2526_v50, 0.0  ;;  %v2100_v6 = vsub.f32 1.0, %v2036_v10  ;;  %v1514_v29 = vmul.f32 %v5265_v35, %v1513_v40  ;;  %vm1517_vm15 = vmor %vm1515_vm0, %vm1516_vm6 }
 0x1e6   : > { %v1520_v24 = vmul.f32 %v5333_v58, %v5270_v45  ;;  %v2654_v4 = vadd.f32 %v2590_v48, %v2462_v21  ;;  %v2621_v18 = vsel %vm5339_vm10, %v2557_v9, 0.0  ;;  %v1830_v13 = vmul.f32 %v5347_v54, %v5280_v63  ;;  %vm6594_vm8 = vmmov %vm6587_vm2  ;;  %v697_v21 = vpop.f32.mrf.mxu2 }
 0x1e7   : > { %v2142_v0 = vadd.s32 192, %v3959_v7  ;;  %v2685_v37 = vadd.f32 %v2621_v18, %v2493_v34  ;;  %v2558_v61 = vmul.f32 %v2100_v6, %v2100_v6  ;;  %v1518_v55 = vsel %vm1517_vm15, %v5265_v35, %v1514_v29  ;;  %vm2430_vm12 = vmand %vm5356_vm11, %vm6594_vm8 }
 0x1e8   : > { %v1521_v43 = vmul.f32 %v5333_v58, %v1520_v24  ;;  %vm2270_vm9 = vcmp.gt.s32.totalorder %v4005_v38, %v5315_v44  ;;  %2718 = vst [vmem:[#allocation2 + $0x60] sm:$0xff] %v2654_v4  ;;  %v2005_v3 = vmul.f32 %v1518_v55, %v5196_v5  ;;  %v1831_v62 = vmul.f32 %v5347_v54, %v1830_v13  ;;  %vm2333_vm13 = vmand %vm2205_vm3, %vm2269_vm5  ;;  %v5426_v13 = vpop.permute.xlu0 %1001 }
 0x1e9   : > { %v5383_v49 = vadd.f32 1e-30, %v5345_v23  ;;  %v1112_v27 = vmul.f32 2.0, %v762_v36  ;;  %2749 = vst [vmem:[#allocation2 + $0x1d8] sm:$0xff] %v2685_v37  ;;  %v2622_v35 = vsel %vm2430_vm12, %v2558_v61, 0.0  ;;  %vm2206_vm14 = vcmp.lt.f32.partialorder %v5259_v57, 1.0  ;;  %vm2399_vm3 = vmand %vm2333_vm13, %vm2381_vm4  ;;  %v810_v61 = vpop.f32.mrf.mxu3 }
 0x1ea   : > { %v1522_v25 = vmul.f32 0.5, %v1521_v43  ;;  %v1175_v41 = vsub.f32 %v6595_v56, %v1111_v33  ;;  %v2686_v60 = vadd.f32 %v2622_v35, %v2494_v20  ;;  %v2069_v1 = vsub.f32 1.0, %v2005_v3  ;;  %v5441_v43 = vpop.permute.xlu2 %996  ;;  %vm2334_vm15 = vmand %vm2206_vm14, %vm2270_vm9  ;;  %v2464_v35 = vld [vmem:[#allocation2 + $0x188] sm:$0xff] }
 0x1eb   : > { %v1832_v2 = vmul.f32 0.5, %v1831_v62  ;;  %3334 = vrsqrt.f32 %v5383_v49  ;;  %vm1526_vm1 = vweird.f32 %v5333_v58  ;;  %v5395_v10 = vadd.s32 %v3975_v14, %v2142_v0 }
 0x1ec   : > { %v1523_v50 = vsub.f32 1.5, %v1522_v25  ;;  %v5397_v40 = vmax.f32 %v1175_v41, 0.0  ;;  %2750 = vst [vmem:[#allocation2 + $0xd0] sm:$0xff] %v2686_v60  ;;  %v2527_v34 = vmul.f32 %v2069_v1, %v2069_v1  ;;  %vm1836_vm0 = vweird.f32 %v5347_v54 }
 0x1ed   : > { %v1833_v9 = vsub.f32 1.5, %v1832_v2  ;;  %v1176_v5 = vsub.f32 %v4319_v26, %v1112_v27  ;;  %vm1525_vm2 = vweird.f32 %v5270_v45  ;;  %v1143_v6 = vmul.f32 2.0, %v697_v21  ;;  %v652_v27 = vpop.f32.mrf.mxu0 }
 0x1ee   : > { %v1524_v33 = vmul.f32 %v5333_v58, %v1523_v50  ;;  %v5406_v48 = vadd.f32 1e-30, %v5397_v40  ;;  %v2591_v17 = vsel %vm2399_vm3, %v2527_v34, 0.0  ;;  %vm1527_vm7 = vmor %vm1525_vm2, %vm1526_vm1  ;;  %vm1835_vm6 = vweird.f32 %v5280_v63 }
 0x1ef   : > { %v1834_v29 = vmul.f32 %v5347_v54, %v1833_v9  ;;  %v5412_v26 = vmax.f32 %v1176_v5, 0.0  ;;  %v2655_v24 = vadd.f32 %v2591_v17, %v2463_v28  ;;  %vm1837_vm10 = vmor %vm1835_vm6, %vm1836_vm0  ;;  %vm2237_vm5 = vcmp.lt.f32.partialorder %v5263_v51, 1.0 }
 0x1f0   : > { %v1528_v36 = vsel %vm1527_vm7, %v5333_v58, %v1524_v33  ;;  %3336 = vrsqrt.f32 %v5406_v48  ;;  %vm2301_vm11 = vcmp.gt.s32.totalorder %v3998_v32, %v5395_v10  ;;  %v2127_v37 = vadd.s32 72, %v3959_v7 }
 0x1f1   : > { %v5417_v45 = vpop.eup %3334  ;;  %v2006_v4 = vmul.f32 %v1528_v36, %v5259_v57  ;;  %v1838_v18 = vsel %vm1837_vm10, %v5347_v54, %v1834_v29  ;;  %v5424_v63 = vadd.f32 1e-30, %v5412_v26  ;;  %2719 = vst [vmem:[#allocation2 + $0xe0] sm:$0xff] %v2655_v24  ;;  %v1207_v20 = vsub.f32 %v4907_v39, %v1143_v6  ;;  %vm5458_vm8 = vmand %vm2237_vm5, %vm2301_vm11  ;;  %v765_v36 = vpop.f32.mrf.mxu1 }
 0x1f2   : > { %v2037_v58 = vmul.f32 %v1838_v18, %v5263_v51  ;;  %v1840_v0 = vmul.f32 %v5417_v45, %v5383_v49  ;;  %v5435_v54 = vadd.f32 %v3922_v47, %v5193_v8  ;;  %v5439_v55 = vadd.f32 %v3918_v46, %v5426_v13  ;;  %v2495_v51 = vld [vmem:[#allocation2 + $0xb8] sm:$0xff]  ;;  %vm2431_vm1 = vmand %vm5458_vm8, %vm2381_vm4 }
 0x1f3   : > { %v2070_v3 = vsub.f32 1.0, %v2006_v4  ;;  %3338 = vrsqrt.f32 %v5424_v63  ;;  %v5451_v39 = vadd.f32 %v3918_v46, %v5441_v43  ;;  %v5463_v57 = vmax.f32 %v1207_v20, 0.0 }
 0x1f4   : > { %v2101_v8 = vsub.f32 1.0, %v2037_v58  ;;  %v1841_v44 = vmul.f32 %v5417_v45, %v1840_v0  ;;  %vm2238_vm9 = vcmp.lt.f32.partialorder %v5345_v23, 1.0  ;;  %vm2302_vm12 = vcmp.gt.s32.totalorder %v4005_v38, %v5395_v10  ;;  %v6599_v58 = vld [vmem:[#allocation9_spill] sm:$0xff] }
 0x1f5   : > { %v2528_v25 = vmul.f32 %v2070_v3, %v2070_v3  ;;  %v1144_v56 = vmul.f32 2.0, %v810_v61  ;;  %vm6598_vm14 = vcmp.lt.s32.totalorder %v4005_v38, 500  ;;  %v5473_v2 = vadd.s32 %v3975_v14, %v2127_v37  ;;  %vm2366_vm8 = vmand %vm2238_vm9, %vm2302_vm12 }
 0x1f6   : > { %v5468_v41 = vpop.eup %3336  ;;  %vm2400_vm13 = vmand %vm2334_vm15, %vm6598_vm14  ;;  %v2559_v60 = vmul.f32 %v2101_v8, %v2101_v8  ;;  %v1842_v1 = vmul.f32 0.5, %v1841_v44  ;;  %v5476_v21 = vadd.f32 1e-30, %v5463_v57  ;;  %vm1846_vm0 = vweird.f32 %v5417_v45 }
 0x1f7   : > { %v2592_v50 = vsel %vm2400_vm13, %v2528_v25, 0.0  ;;  %v1530_v28 = vmul.f32 %v5468_v41, %v5406_v48  ;;  %v1113_v34 = vmul.f32 2.0, %v652_v27  ;;  %vm1845_vm3 = vweird.f32 %v5383_v49  ;;  %v700_v27 = vpop.f32.mrf.mxu2 }
 0x1f8   : > { %v2656_v9 = vadd.f32 %v2592_v50, %v2464_v35  ;;  %v2623_v5 = vsel %vm2431_vm1, %v2559_v60, 0.0  ;;  %v1843_v33 = vsub.f32 1.5, %v1842_v1  ;;  %3340 = vrsqrt.f32 %v5476_v21  ;;  %vm1847_vm6 = vmor %vm1845_vm3, %vm1846_vm0  ;;  %v6600_v1 = vld [vmem:[#allocation10_spill] sm:$0xff] }
 0x1f9   : > { %v5486_v6 = vpop.eup %3338  ;;  %v2687_v17 = vadd.f32 %v2623_v5, %v2495_v51  ;;  %v1531_v29 = vmul.f32 %v5468_v41, %v1530_v28  ;;  %v1208_v24 = vsub.f32 %v5151_v15, %v1144_v56  ;;  %vm2207_vm2 = vcmp.lt.f32.partialorder %v5397_v40, 1.0 }
 0x1fa   : > { %2720 = vst [vmem:[#allocation2 + $0x188] sm:$0xff] %v2656_v9  ;;  %v1844_v4 = vmul.f32 %v5417_v45, %v1843_v33  ;;  %vm2271_vm7 = vcmp.gt.s32.totalorder %v3998_v32, %v5473_v2  ;;  %v1540_v18 = vmul.f32 %v5486_v6, %v5424_v63  ;;  %vm1535_vm10 = vweird.f32 %v5406_v48  ;;  %v2496_v9 = vld [vmem:[#allocation2 + $0x88] sm:$0xff] }
 0x1fb   : > { %2751 = vst [vmem:[#allocation2 + $0xb8] sm:$0xff] %v2687_v17  ;;  %v1532_v49 = vmul.f32 0.5, %v1531_v29  ;;  %v5500_v15 = vmax.f32 %v1208_v24, 0.0  ;;  %v1177_v0 = vsub.f32 %v6599_v58, %v1113_v34  ;;  %vm2208_vm5 = vcmp.lt.f32.partialorder %v5412_v26, 1.0  ;;  %vm5552_vm0 = vmand %vm2207_vm2, %vm2271_vm7 }
 0x1fc   : > { %v1848_v37 = vsel %vm1847_vm6, %v5417_v45, %v1844_v4  ;;  %v1541_v20 = vmul.f32 %v5486_v6, %v1540_v18  ;;  %vm2272_vm11 = vcmp.gt.s32.totalorder %v4005_v38, %v5473_v2  ;;  %v2143_v61 = vadd.s32 200, %v3959_v7  ;;  %vm5581_vm6 = vmand %vm5552_vm0, %vm2381_vm4 }
 0x1fd   : > { %v1114_v3 = vmul.f32 2.0, %v765_v36  ;;  %v2038_v8 = vmul.f32 %v1848_v37, %v5345_v23  ;;  %v1533_v62 = vsub.f32 1.5, %v1532_v49  ;;  %vm1536_vm15 = vweird.f32 %v5468_v41 }
 0x1fe   : > { %v5512_v44 = vadd.f32 1e-30, %v5500_v15  ;;  %v5514_v45 = vpop.eup %3340  ;;  %v1542_v35 = vmul.f32 0.5, %v1541_v20  ;;  %vm1545_vm14 = vweird.f32 %v5424_v63  ;;  %vm1546_vm13 = vweird.f32 %v5486_v6  ;;  %vm1537_vm1 = vmor %vm1535_vm10, %vm1536_vm15  ;;  %v813_v63 = vpop.f32.mrf.mxu3 }
 0x1ff   : > { %v5523_v25 = vmax.f32 %v1177_v0, 0.0  ;;  %v2102_v56 = vsub.f32 1.0, %v2038_v8  ;;  %v1534_v51 = vmul.f32 %v5468_v41, %v1533_v62  ;;  %v1850_v60 = vmul.f32 %v5514_v45, %v5476_v21  ;;  %vm1547_vm3 = vmor %vm1545_vm14, %vm1546_vm13 }
 0x200   : > { %v1178_v50 = vsub.f32 %v6600_v1, %v1114_v3  ;;  %v1543_v23 = vsub.f32 1.5, %v1542_v35  ;;  %3342 = vrsqrt.f32 %v5512_v44  ;;  %v1145_v28 = vmul.f32 2.0, %v700_v27 }
 0x201   : > { %v5533_v10 = vadd.f32 1e-30, %v5523_v25  ;;  %vm6601_vm9 = vcmp.lt.s32.totalorder %v4005_v38, 500  ;;  %v2560_v5 = vmul.f32 %v2102_v56, %v2102_v56  ;;  %v1538_v33 = vsel %vm1537_vm1, %v5468_v41, %v1534_v51 }
 0x202   : > { %vm5537_vm12 = vmand %vm2366_vm8, %vm6601_vm9  ;;  %v1851_v48 = vmul.f32 %v5514_v45, %v1850_v60  ;;  %v5544_v17 = vadd.s32 %v3975_v14, %v2143_v61  ;;  %v2007_v29 = vmul.f32 %v1538_v33, %v5397_v40  ;;  %v1544_v36 = vmul.f32 %v5486_v6, %v1543_v23 }
 0x203   : > { %3344 = vrsqrt.f32 %v5533_v10  ;;  %v2128_v41 = vadd.s32 80, %v3959_v7  ;;  %v2624_v4 = vsel %vm5537_vm12, %v2560_v5, 0.0  ;;  %vm2239_vm2 = vcmp.lt.f32.partialorder %v5463_v57, 1.0  ;;  %vm5595_vm8 = vmand %vm2208_vm5, %vm2272_vm11 }
 0x204   : > { %v1852_v18 = vmul.f32 0.5, %v1851_v48  ;;  %v5566_v40 = vmax.f32 %v1178_v50, 0.0  ;;  %v2688_v49 = vadd.f32 %v2624_v4, %v2496_v9  ;;  %v2071_v58 = vsub.f32 1.0, %v2007_v29  ;;  %vm6610_vm5 = vmmov %vm6601_vm9 }
 0x205   : > { %v1548_v0 = vsel %vm1547_vm3, %v5486_v6, %v1544_v36  ;;  %v1209_v37 = vsub.f32 %v5451_v39, %v1145_v28  ;;  %vm1856_vm7 = vweird.f32 %v5514_v45  ;;  %v2465_v39 = vld [vmem:[#allocation2 + $0x138] sm:$0xff]  ;;  %vm1855_vm10 = vweird.f32 %v5476_v21  ;;  %v2466_v28 = vld [vmem:[#allocation2 + $0x140] sm:$0xff]  ;;  %vm2402_vm11 = vmand %vm5595_vm8, %vm6610_vm5 }
 0x206   : > { %v2008_v20 = vmul.f32 %v1548_v0, %v5412_v26  ;;  %v1853_v61 = vsub.f32 1.5, %v1852_v18  ;;  %v5573_v3 = vadd.f32 1e-30, %v5566_v40  ;;  %v5575_v8 = vpop.eup %3342  ;;  %2752 = vst [vmem:[#allocation2 + $0x88] sm:$0xff] %v2688_v49  ;;  %v2529_v62 = vmul.f32 %v2071_v58, %v2071_v58  ;;  %vm1857_vm14 = vmor %vm1855_vm10, %vm1856_vm7  ;;  %v2497_v0 = vld [vmem:[#allocation2 + $0xa8] sm:$0xff] }
 0x207   : > { %vm2303_vm15 = vcmp.gt.s32.totalorder %v3998_v32, %v5544_v17  ;;  %v5588_v27 = vmax.f32 %v1209_v37, 0.0  ;;  %v1860_v21 = vmul.f32 %v5575_v8, %v5512_v44  ;;  %v5603_v60 = vadd.s32 %v3975_v14, %v2128_v41 }
 0x208   : > { %v2072_v35 = vsub.f32 1.0, %v2008_v20  ;;  %v1854_v51 = vmul.f32 %v5514_v45, %v1853_v61  ;;  %v2593_v50 = vsel %vm5581_vm6, %v2529_v62, 0.0  ;;  %3346 = vrsqrt.f32 %v5573_v3  ;;  %vm2367_vm9 = vmand %vm2239_vm2, %vm2303_vm15 }
 0x209   : > { %v5605_v1 = vpop.eup %3344  ;;  %v5613_v26 = vadd.f32 1e-30, %v5588_v27  ;;  %v1146_v2 = vmul.f32 2.0, %v813_v63  ;;  %v2657_v23 = vadd.f32 %v2593_v50, %v2465_v39  ;;  %v1861_v5 = vmul.f32 %v5575_v8, %v1860_v21  ;;  %vm2433_vm2 = vmand %vm2367_vm9, %vm2381_vm4 }
 0x20a   : > { %v2530_v34 = vmul.f32 %v2072_v35, %v2072_v35  ;;  %v1858_v9 = vsel %vm1857_vm14, %v5514_v45, %v1854_v51  ;;  %v1082_v33 = vadd.f32 %v3922_v47, %v5441_v43  ;;  %v1550_v29 = vmul.f32 %v5605_v1, %v5533_v10  ;;  %v655_v43 = vpop.f32.mrf.mxu0 }
 0x20b   : > { %v2039_v48 = vmul.f32 %v1858_v9, %v5463_v57  ;;  %3348 = vrsqrt.f32 %v5613_v26  ;;  %2721 = vst [vmem:[#allocation2 + $0x138] sm:$0xff] %v2657_v23  ;;  %v1862_v45 = vmul.f32 0.5, %v1861_v5  ;;  %vm2240_vm13 = vcmp.lt.f32.partialorder %v5500_v15, 1.0  ;;  %v768_v5 = vpop.f32.mrf.mxu1 }
 0x20c   : > { %v2594_v24 = vsel %vm2402_vm11, %v2530_v34, 0.0  ;;  %vm2304_vm1 = vcmp.gt.s32.totalorder %v4005_v38, %v5544_v17  ;;  %v1551_v4 = vmul.f32 %v5605_v1, %v1550_v29  ;;  %vm2273_vm12 = vcmp.gt.s32.totalorder %v3998_v32, %v5603_v60 }
 0x20d   : > { %v2658_v36 = vadd.f32 %v2594_v24, %v2466_v28  ;;  %v2103_v41 = vsub.f32 1.0, %v2039_v48  ;;  %v1863_v18 = vsub.f32 1.5, %v1862_v45  ;;  %vm1865_vm0 = vweird.f32 %v5512_v44  ;;  %vm2368_vm9 = vmand %vm2240_vm13, %vm2304_vm1 }
 0x20e   : > { %vm1866_vm3 = vweird.f32 %v5575_v8  ;;  %v1210_v49 = vsub.f32 %v1082_v33, %v1146_v2  ;;  %v5640_v58 = vpop.eup %3346  ;;  %v1552_v20 = vmul.f32 0.5, %v1551_v4  ;;  %vm2209_vm7 = vcmp.lt.f32.partialorder %v5523_v25, 1.0 }
 0x20f   : > { %2722 = vst [vmem:[#allocation2 + $0x140] sm:$0xff] %v2658_v36  ;;  %v2561_v37 = vmul.f32 %v2103_v41, %v2103_v41  ;;  %v1115_v57 = vmul.f32 2.0, %v655_v43  ;;  %v1864_v61 = vmul.f32 %v5575_v8, %v1863_v18  ;;  %vm1555_vm6 = vweird.f32 %v5533_v10  ;;  %vm1867_vm10 = vmor %vm1865_vm0, %vm1866_vm3  ;;  %v2498_v43 = vld [vmem:[#allocation2 + $0x1c8] sm:$0xff] }
 0x210   : > { %v1560_v63 = vmul.f32 %v5640_v58, %v5573_v3  ;;  %v5649_v6 = vmax.f32 %v1210_v49, 0.0  ;;  %v1553_v35 = vsub.f32 1.5, %v1552_v20  ;;  %vm1556_vm15 = vweird.f32 %v5605_v1  ;;  %vm5695_vm13 = vmand %vm2209_vm7, %vm2273_vm12 }
 0x211   : > { %v5651_v39 = vpop.eup %3348  ;;  %v2625_v62 = vsel %vm2433_vm2, %v2561_v37, 0.0  ;;  %v1179_v56 = vsub.f32 %v4348_v31, %v1115_v57  ;;  %v1868_v21 = vsel %vm1867_vm10, %v5575_v8, %v1864_v61  ;;  %vm2210_vm8 = vcmp.lt.f32.partialorder %v5566_v40, 1.0  ;;  %vm1557_vm5 = vmor %vm1555_vm6, %vm1556_vm15  ;;  %v2467_v57 = vld [vmem:[#allocation2 + $0x80] sm:$0xff] }
 0x212   : > { %v2689_v51 = vadd.f32 %v2625_v62, %v2497_v0  ;;  %v1561_v50 = vmul.f32 %v5640_v58, %v1560_v63  ;;  %vm2274_vm14 = vcmp.gt.s32.totalorder %v4005_v38, %v5603_v60  ;;  %v1870_v2 = vmul.f32 %v5651_v39, %v5613_v26  ;;  %vm5718_vm10 = vmand %vm5695_vm13, %vm2381_vm4  ;;  %v5726_v62 = vpop.permute.xlu1 %1021 }
 0x213   : > { %v2040_v44 = vmul.f32 %v1868_v21, %v5500_v15  ;;  %v1554_v23 = vmul.f32 %v5605_v1, %v1553_v35  ;;  %v2144_v28 = vadd.s32 208, %v3959_v7  ;;  %v5670_v31 = vadd.f32 1e-30, %v5649_v6  ;;  %v2499_v15 = vld [vmem:[#allocation2 + $0x170] sm:$0xff] }
 0x214   : > { %2753 = vst [vmem:[#allocation2 + $0xa8] sm:$0xff] %v2689_v51  ;;  %v1562_v8 = vmul.f32 0.5, %v1561_v50  ;;  %vm1565_vm11 = vweird.f32 %v5573_v3  ;;  %v1871_v34 = vmul.f32 %v5651_v39, %v1870_v2  ;;  %v5676_v9 = vmax.f32 %v1179_v56, 0.0 }
 0x215   : > { %v2104_v33 = vsub.f32 1.0, %v2040_v44  ;;  %v1558_v48 = vsel %vm1557_vm5, %v5605_v1, %v1554_v23  ;;  %vm1566_vm0 = vweird.f32 %v5640_v58  ;;  %3350 = vrsqrt.f32 %v5670_v31 }
 0x216   : > { %v2009_v10 = vmul.f32 %v1558_v48, %v5523_v25  ;;  %v1563_v29 = vsub.f32 1.5, %v1562_v8  ;;  %v1872_v24 = vmul.f32 0.5, %v1871_v34  ;;  %v5688_v45 = vadd.f32 1e-30, %v5676_v9  ;;  %v703_v25 = vpop.f32.mrf.mxu2  ;;  %vm1567_vm12 = vmor %vm1565_vm11, %vm1566_vm0 }
 0x217   : > { %v2562_v36 = vmul.f32 %v2104_v33, %v2104_v33  ;;  %vm1876_vm1 = vweird.f32 %v5651_v39  ;;  %v5701_v17 = vadd.s32 %v3975_v14, %v2144_v28  ;;  %v1116_v1 = vmul.f32 2.0, %v768_v5  ;;  %vm5746_vm11 = vmand %vm2210_vm8, %vm2274_vm14  ;;  %v2468_v33 = vld [vmem:[#allocation2 + $0x1a8] sm:$0xff] }
 0x218   : > { %vm6613_vm3 = vcmp.lt.s32.totalorder %v4005_v38, 500  ;;  %v2073_v41 = vsub.f32 1.0, %v2009_v10  ;;  %v1564_v4 = vmul.f32 %v5640_v58, %v1563_v29  ;;  %v1873_v18 = vsub.f32 1.5, %v1872_v24 }
 0x219   : > { %vm2434_vm2 = vmand %vm2368_vm9, %vm6613_vm3  ;;  %3352 = vrsqrt.f32 %v5688_v45  ;;  %vm1875_vm7 = vweird.f32 %v5613_v26  ;;  %vm2241_vm6 = vcmp.lt.f32.partialorder %v5588_v27, 1.0  ;;  %v1180_v0 = vsub.f32 %v4379_v19, %v1116_v1 }
 0x21a   : > { %v2626_v49 = vsel %vm2434_vm2, %v2562_v36, 0.0  ;;  %v2531_v61 = vmul.f32 %v2073_v41, %v2073_v41  ;;  %v1568_v3 = vsel %vm1567_vm12, %v5640_v58, %v1564_v4  ;;  %v1874_v63 = vmul.f32 %v5651_v39, %v1873_v18  ;;  %vm1877_vm15 = vmor %vm1875_vm7, %vm1876_vm1 }
 0x21b   : > { %v2690_v37 = vadd.f32 %v2626_v49, %v2498_v43  ;;  %v5724_v26 = vpop.eup %3350  ;;  %v2010_v19 = vmul.f32 %v1568_v3, %v5566_v40  ;;  %vm2305_vm5 = vcmp.gt.s32.totalorder %v3998_v32, %v5701_v17  ;;  %v5733_v35 = vmax.f32 %v1180_v0, 0.0  ;;  %vm6620_vm9 = vmmov %vm6613_vm3  ;;  %v816_v43 = vpop.f32.mrf.mxu3 }
 0x21c   : > { %v1147_v56 = vmul.f32 2.0, %v703_v25  ;;  %v2595_v58 = vsel %vm5718_vm10, %v2531_v61, 0.0  ;;  %v1878_v51 = vsel %vm1877_vm15, %v5651_v39, %v1874_v63  ;;  %v1880_v21 = vmul.f32 %v5724_v26, %v5670_v31  ;;  %vm5769_vm8 = vmand %vm2241_vm6, %vm2305_vm5  ;;  %v658_v49 = vpop.f32.mrf.mxu0  ;;  %v771_v63 = vpop.f32.mrf.mxu1 }
 0x21d   : > { %2754 = vst [vmem:[#allocation2 + $0x1c8] sm:$0xff] %v2690_v37  ;;  %v2129_v50 = vadd.s32 88, %v3959_v7  ;;  %v2659_v2 = vadd.f32 %v2595_v58, %v2467_v57  ;;  %v2074_v44 = vsub.f32 1.0, %v2010_v19  ;;  %v2041_v28 = vmul.f32 %v1878_v51, %v5588_v27  ;;  %vm2404_vm0 = vmand %vm5746_vm11, %vm6620_vm9 }
 0x21e   : > { %v5752_v39 = vadd.f32 1e-30, %v5733_v35  ;;  %v1084_v34 = vadd.f32 %v3922_v47, %v5426_v13  ;;  %v5760_v5 = vadd.f32 %v3918_v46, %v5726_v62  ;;  %v1881_v40 = vmul.f32 %v5724_v26, %v1880_v21  ;;  %vm2435_vm1 = vmand %vm5769_vm8, %vm2381_vm4  ;;  %v706_v51 = vpop.f32.mrf.mxu2 }
 0x21f   : > { %v5754_v8 = vpop.eup %3352  ;;  %v1211_v60 = vsub.f32 %v5439_v55, %v1147_v56  ;;  %2723 = vst [vmem:[#allocation2 + $0x80] sm:$0xff] %v2659_v2  ;;  %v2532_v48 = vmul.f32 %v2074_v44, %v2074_v44  ;;  %v2105_v10 = vsub.f32 1.0, %v2041_v28  ;;  %vm2306_vm14 = vcmp.gt.s32.totalorder %v4005_v38, %v5701_v17 }
 0x220   : > { %v1570_v13 = vmul.f32 %v5754_v8, %v5688_v45  ;;  %v1882_v55 = vmul.f32 0.5, %v1881_v40  ;;  %v5782_v24 = vadd.s32 %v3975_v14, %v2129_v50  ;;  %3354 = vrsqrt.f32 %v5752_v39 }
 0x221   : > { %v5785_v27 = vmax.f32 %v1211_v60, 0.0  ;;  %v2596_v36 = vsel %vm2404_vm0, %v2532_v48, 0.0  ;;  %v2563_v1 = vmul.f32 %v2105_v10, %v2105_v10  ;;  %vm2242_vm13 = vcmp.lt.f32.partialorder %v5649_v6, 1.0 }
 0x222   : > { %v1571_v41 = vmul.f32 %v5754_v8, %v1570_v13  ;;  %v2660_v4 = vadd.f32 %v2596_v36, %v2468_v33  ;;  %v1883_v18 = vsub.f32 1.5, %v1882_v55  ;;  %vm1886_vm3 = vweird.f32 %v5724_v26  ;;  %vm5815_vm5 = vmand %vm2242_vm13, %vm2306_vm14 }
 0x223   : > { %v5795_v25 = vadd.f32 1e-30, %v5785_v27  ;;  %v2627_v0 = vsel %vm2435_vm1, %v2563_v1, 0.0  ;;  %vm1885_vm2 = vweird.f32 %v5670_v31  ;;  %v1148_v20 = vmul.f32 2.0, %v816_v43  ;;  %v819_v2 = vpop.f32.mrf.mxu3 }
 0x224   : > { %v1572_v37 = vmul.f32 0.5, %v1571_v41  ;;  %2724 = vst [vmem:[#allocation2 + $0x1a8] sm:$0xff] %v2660_v4  ;;  %v2691_v57 = vadd.f32 %v2627_v0, %v2499_v15  ;;  %v1884_v61 = vmul.f32 %v5724_v26, %v1883_v18  ;;  %v2145_v3 = vadd.s32 216, %v3959_v7  ;;  %vm1887_vm12 = vmor %vm1885_vm2, %vm1886_vm3 }
 0x225   : > { %3356 = vrsqrt.f32 %v5795_v25  ;;  %vm1576_vm7 = vweird.f32 %v5754_v8  ;;  %v1212_v56 = vsub.f32 %v1084_v34, %v1148_v20  ;;  %v1117_v58 = vmul.f32 2.0, %v658_v49  ;;  %v2469_v49 = vld [vmem:[#allocation2 + $0x1b8] sm:$0xff] }
 0x226   : > { %v1573_v19 = vsub.f32 1.5, %v1572_v37  ;;  %v5802_v21 = vpop.eup %3354  ;;  %2755 = vst [vmem:[#allocation2 + $0x170] sm:$0xff] %v2691_v57  ;;  %v1888_v31 = vsel %vm1887_vm12, %v5724_v26, %v1884_v61  ;;  %vm1575_vm6 = vweird.f32 %v5688_v45  ;;  %vm2211_vm10 = vcmp.lt.f32.partialorder %v5676_v9, 1.0 }
 0x227   : > { %vm2275_vm15 = vcmp.gt.s32.totalorder %v3998_v32, %v5782_v24  ;;  %v2042_v50 = vmul.f32 %v1888_v31, %v5649_v6  ;;  %v1580_v45 = vmul.f32 %v5802_v21, %v5752_v39  ;;  %v1118_v44 = vmul.f32 2.0, %v771_v63  ;;  %vm1577_vm11 = vmor %vm1575_vm6, %vm1576_vm7 }
 0x228   : > { %v1574_v26 = vmul.f32 %v5754_v8, %v1573_v19  ;;  %vm2212_vm8 = vcmp.lt.f32.partialorder %v5733_v35, 1.0  ;;  %vm2276_vm9 = vcmp.gt.s32.totalorder %v4005_v38, %v5782_v24  ;;  %v5827_v17 = vmax.f32 %v1212_v56, 0.0  ;;  %vm2339_vm1 = vmand %vm2211_vm10, %vm2275_vm15 }
 0x229   : > { %v1181_v6 = vsub.f32 %v4418_v16, %v1117_v58  ;;  %v1149_v23 = vmul.f32 2.0, %v706_v51  ;;  %v2106_v28 = vsub.f32 1.0, %v2042_v50  ;;  %v1581_v40 = vmul.f32 %v5802_v21, %v1580_v45  ;;  %v2500_v16 = vld [vmem:[#allocation2 + $0x178] sm:$0xff]  ;;  %vm2405_vm12 = vmand %vm2339_vm1, %vm2381_vm4  ;;  %v661_v45 = vpop.f32.mrf.mxu0 }
 0x22a   : > { %v1578_v34 = vsel %vm1577_vm11, %v5754_v8, %v1574_v26  ;;  %v5833_v60 = vadd.s32 %v3975_v14, %v2145_v3  ;;  %vm1585_vm14 = vweird.f32 %v5752_v39  ;;  %v5840_v10 = vadd.f32 1e-30, %v5827_v17  ;;  %vm5896_vm11 = vmand %vm2212_vm8, %vm2276_vm9 }
 0x22b   : > { %v5835_v33 = vpop.eup %3356  ;;  %v2011_v48 = vmul.f32 %v1578_v34, %v5676_v9  ;;  %v5842_v29 = vmax.f32 %v1181_v6, 0.0  ;;  %vm6623_vm0 = vcmp.lt.s32.totalorder %v4005_v38, 500  ;;  %v2564_v8 = vmul.f32 %v2106_v28, %v2106_v28  ;;  %v2470_v28 = vld [vmem:[#allocation2 + $0x28] sm:$0xff] }
 0x22c   : > { %vm2436_vm13 = vmand %vm5815_vm5, %vm6623_vm0  ;;  %v1582_v13 = vmul.f32 0.5, %v1581_v40  ;;  %v1890_v55 = vmul.f32 %v5835_v33, %v5795_v25  ;;  %v1182_v43 = vsub.f32 %v4422_v30, %v1118_v44  ;;  %3358 = vrsqrt.f32 %v5840_v10 }
 0x22d   : > { %v2075_v36 = vsub.f32 1.0, %v2011_v48  ;;  %v5858_v15 = vadd.f32 1e-30, %v5842_v29  ;;  %v1213_v1 = vsub.f32 %v5206_v12, %v1149_v23  ;;  %v2628_v41 = vsel %vm2436_vm13, %v2564_v8, 0.0 }
 0x22e   : > { %v1583_v4 = vsub.f32 1.5, %v1582_v13  ;;  %vm1586_vm3 = vweird.f32 %v5802_v21  ;;  %v1891_v30 = vmul.f32 %v5835_v33, %v1890_v55  ;;  %v2692_v18 = vadd.f32 %v2628_v41, %v2500_v16 }
 0x22f   : > { %v2533_v0 = vmul.f32 %v2075_v36, %v2075_v36  ;;  %vm2307_vm2 = vcmp.gt.s32.totalorder %v3998_v32, %v5833_v60  ;;  %3360 = vrsqrt.f32 %v5858_v15  ;;  %v2130_v37 = vadd.s32 96, %v3959_v7  ;;  %vm1587_vm7 = vmor %vm1585_vm14, %vm1586_vm3 }
 0x230   : > { %v1584_v9 = vmul.f32 %v5802_v21, %v1583_v4  ;;  %v1892_v12 = vmul.f32 0.5, %v1891_v30  ;;  %v5870_v20 = vmax.f32 %v1182_v43, 0.0  ;;  %2756 = vst [vmem:[#allocation2 + $0x178] sm:$0xff] %v2692_v18  ;;  %vm1896_vm6 = vweird.f32 %v5835_v33  ;;  %v2471_v43 = vld [vmem:[#allocation2 + $0x1e8] sm:$0xff] }
 0x231   : > { %v2597_v57 = vsel %vm2405_vm12, %v2533_v0, 0.0  ;;  %vm2243_vm10 = vcmp.lt.f32.partialorder %v5785_v27, 1.0  ;;  %v5876_v61 = vmax.f32 %v1213_v1, 0.0  ;;  %vm1895_vm15 = vweird.f32 %v5795_v25  ;;  %v2501_v0 = vld [vmem:[#allocation2 + $0x68] sm:$0xff] }
 0x232   : > { %v2661_v3 = vadd.f32 %v2597_v57, %v2469_v49  ;;  %v1588_v63 = vsel %vm1587_vm7, %v5802_v21, %v1584_v9  ;;  %v1893_v19 = vsub.f32 1.5, %v1892_v12  ;;  %v5880_v56 = vadd.f32 1e-30, %v5870_v20  ;;  %v5882_v58 = vpop.eup %3358  ;;  %vm1897_vm8 = vmor %vm1895_vm15, %vm1896_vm6 }
 0x233   : > { %v2012_v51 = vmul.f32 %v1588_v63, %v5733_v35  ;;  %vm2308_vm5 = vcmp.gt.s32.totalorder %v4005_v38, %v5833_v60  ;;  %v5889_v39 = vadd.f32 1e-30, %v5876_v61  ;;  %v1900_v25 = vmul.f32 %v5882_v58, %v5840_v10  ;;  %vm5934_vm7 = vmand %vm2243_vm10, %vm2307_vm2 }
 0x234   : > { %2725 = vst [vmem:[#allocation2 + $0x1b8] sm:$0xff] %v2661_v3  ;;  %v1894_v31 = vmul.f32 %v5835_v33, %v1893_v19  ;;  %v5904_v50 = vadd.s32 %v3975_v14, %v2130_v37  ;;  %3362 = vrsqrt.f32 %v5880_v56  ;;  %vm2244_vm9 = vcmp.lt.f32.partialorder %v5827_v17, 1.0  ;;  %vm2437_vm10 = vmand %vm5934_vm7, %vm2381_vm4 }
 0x235   : > { %v5907_v26 = vpop.eup %3360  ;;  %v2076_v24 = vsub.f32 1.0, %v2012_v51  ;;  %3364 = vrsqrt.f32 %v5889_v39  ;;  %v2146_v35 = vadd.s32 224, %v3959_v7  ;;  %v1901_v6 = vmul.f32 %v5882_v58, %v1900_v25 }
 0x236   : > { %v1898_v44 = vsel %vm1897_vm8, %v5835_v33, %v1894_v31  ;;  %vm1905_vm14 = vweird.f32 %v5840_v10  ;;  %v1590_v23 = vmul.f32 %v5907_v26, %v5858_v15  ;;  %vm1595_vm0 = vweird.f32 %v5858_v15 }
 0x237   : > { %v2534_v34 = vmul.f32 %v2076_v24, %v2076_v24  ;;  %v2043_v40 = vmul.f32 %v1898_v44, %v5785_v27  ;;  %v1150_v48 = vmul.f32 2.0, %v819_v2  ;;  %vm6626_vm13 = vcmp.lt.s32.totalorder %v4005_v38, 500  ;;  %v774_v2 = vpop.f32.mrf.mxu1 }
 0x238   : > { %vm2406_vm1 = vmand %vm5896_vm11, %vm6626_vm13  ;;  %v1902_v33 = vmul.f32 0.5, %v1901_v6  ;;  %v1591_v16 = vmul.f32 %v5907_v26, %v1590_v23  ;;  %vm2213_vm3 = vcmp.lt.f32.partialorder %v5842_v29, 1.0  ;;  %vm2277_vm12 = vcmp.gt.s32.totalorder %v3998_v32, %v5904_v50 }
 0x239   : > { %v1119_v8 = vmul.f32 2.0, %v661_v45  ;;  %v2598_v13 = vsel %vm2406_vm1, %v2534_v34, 0.0  ;;  %v2107_v55 = vsub.f32 1.0, %v2043_v40  ;;  %v5939_v36 = vadd.s32 %v3975_v14, %v2146_v35  ;;  %vm5977_vm13 = vmand %vm2244_vm9, %vm2308_vm5  ;;  %v2502_v34 = vld [vmem:[#allocation2 + $0x190] sm:$0xff] }
 0x23a   : > { %v1214_v1 = vsub.f32 %v5435_v54, %v1150_v48  ;;  %v5942_v41 = vpop.eup %3362  ;;  %v2662_v4 = vadd.f32 %v2598_v13, %v2470_v28  ;;  %v1903_v30 = vsub.f32 1.5, %v1902_v33  ;;  %vm1906_vm6 = vweird.f32 %v5882_v58 }
 0x23b   : > { %v1592_v18 = vmul.f32 0.5, %v1591_v16  ;;  %v5945_v49 = vpop.eup %3364  ;;  %v2565_v27 = vmul.f32 %v2107_v55, %v2107_v55  ;;  %vm1596_vm2 = vweird.f32 %v5907_v26  ;;  %v1600_v9 = vmul.f32 %v5942_v41, %v5880_v56  ;;  %vm1907_vm15 = vmor %vm1905_vm14, %vm1906_vm6 }
 0x23c   : > { %v5950_v12 = vmax.f32 %v1214_v1, 0.0  ;;  %2726 = vst [vmem:[#allocation2 + $0x28] sm:$0xff] %v2662_v4  ;;  %v1904_v54 = vmul.f32 %v5882_v58, %v1903_v30  ;;  %v1910_v57 = vmul.f32 %v5945_v49, %v5889_v39  ;;  %v1183_v3 = vsub.f32 %v4383_v53, %v1119_v8  ;;  %vm1597_vm14 = vmor %vm1595_vm0, %vm1596_vm2  ;;  %v1017_v8 = vpop.permute.xlu0 %1016  ;;  %v1012_v30 = vpop.permute.xlu2 %1011 }
 0x23d   : > { %v1593_v37 = vsub.f32 1.5, %v1592_v18  ;;  %v2629_v63 = vsel %vm2437_vm10, %v2565_v27, 0.0  ;;  %v1601_v19 = vmul.f32 %v5942_v41, %v1600_v9  ;;  %vm2214_vm11 = vcmp.lt.f32.partialorder %v5870_v20, 1.0  ;;  %vm6013_vm2 = vmand %vm2213_vm3, %vm2277_vm12 }
 0x23e   : > { %vm2278_vm8 = vcmp.gt.s32.totalorder %v4005_v38, %v5904_v50  ;;  %v5969_v51 = vadd.f32 1e-30, %v5950_v12  ;;  %v2693_v21 = vadd.f32 %v2629_v63, %v2501_v0  ;;  %v1908_v31 = vsel %vm1907_vm15, %v5882_v58, %v1904_v54  ;;  %v822_v63 = vpop.f32.mrf.mxu3 }
 0x23f   : > { %v1594_v10 = vmul.f32 %v5907_v26, %v1593_v37  ;;  %v1911_v25 = vmul.f32 %v5945_v49, %v1910_v57  ;;  %v2044_v24 = vmul.f32 %v1908_v31, %v5827_v17  ;;  %v1602_v58 = vmul.f32 0.5, %v1601_v19 }
 0x240   : > { %vm2245_vm1 = vcmp.lt.f32.partialorder %v5876_v61, 1.0  ;;  %3366 = vrsqrt.f32 %v5969_v51  ;;  %2757 = vst [vmem:[#allocation2 + $0x68] sm:$0xff] %v2693_v21  ;;  %vm1606_vm5 = vweird.f32 %v5942_v41  ;;  %v5992_v45 = vmax.f32 %v1183_v3, 0.0 }
 0x241   : > { %v1598_v60 = vsel %vm1597_vm14, %v5907_v26, %v1594_v10  ;;  %v1912_v35 = vmul.f32 0.5, %v1911_v25  ;;  %v2108_v44 = vsub.f32 1.0, %v2044_v24  ;;  %v1603_v6 = vsub.f32 1.5, %v1602_v58  ;;  %vm2342_vm14 = vmand %vm2214_vm11, %vm2278_vm8  ;;  %v2472_v24 = vld [vmem:[#allocation2 + $0xf8] sm:$0xff] }
 0x242   : > { %v2013_v17 = vmul.f32 %v1598_v60, %v5842_v29  ;;  %v1120_v23 = vmul.f32 2.0, %v774_v2  ;;  %vm6631_vm9 = vcmp.lt.s32.totalorder %v4005_v38, 500  ;;  %vm1605_vm7 = vweird.f32 %v5880_v56 }
 0x243   : > { %vm5999_vm0 = vmand %vm5977_vm13, %vm6631_vm9  ;;  %v1913_v26 = vsub.f32 1.5, %v1912_v35  ;;  %vm1916_vm6 = vweird.f32 %v5945_v49  ;;  %v6006_v28 = vadd.f32 1e-30, %v5992_v45  ;;  %v2566_v40 = vmul.f32 %v2108_v44, %v2108_v44 }
 0x244   : > { %v2077_v48 = vsub.f32 1.0, %v2013_v17  ;;  %v1604_v56 = vmul.f32 %v5942_v41, %v1603_v6  ;;  %v1184_v16 = vsub.f32 %v4395_v11, %v1120_v23  ;;  %vm6021_vm10 = vmor %vm1605_vm7, %vm1606_vm5  ;;  %vm1915_vm15 = vweird.f32 %v5889_v39 }
 0x245   : > { %v1914_v55 = vmul.f32 %v5945_v49, %v1913_v26  ;;  %vm2309_vm3 = vcmp.gt.s32.totalorder %v3998_v32, %v5939_v36  ;;  %3368 = vrsqrt.f32 %v6006_v28  ;;  %v2630_v11 = vsel %vm5999_vm0, %v2566_v40, 0.0  ;;  %vm1917_vm12 = vmor %vm1915_vm15, %vm1916_vm6 }
 0x246   : > { %v6030_v29 = vpop.eup %3366  ;;  %v2535_v1 = vmul.f32 %v2077_v48, %v2077_v48  ;;  %v1608_v4 = vsel %vm6021_vm10, %v5942_v41, %v1604_v56  ;;  %v6039_v39 = vmax.f32 %v1184_v16, 0.0  ;;  %v2694_v18 = vadd.f32 %v2630_v11, %v2502_v34  ;;  %vm2407_vm13 = vmand %vm6013_vm2, %vm2381_vm4  ;;  %v709_v41 = vpop.f32.mrf.mxu2 }
 0x247   : > { %v2014_v0 = vmul.f32 %v1608_v4, %v5870_v20  ;;  %v1918_v27 = vsel %vm1917_vm12, %v5945_v49, %v1914_v55  ;;  %v1920_v9 = vmul.f32 %v6030_v29, %v5969_v51  ;;  %v6050_v54 = vadd.f32 %v3918_v46, %v1017_v8  ;;  %vm6071_vm5 = vmand %vm2245_vm1, %vm2309_vm3 }
 0x248   : > { %v2599_v37 = vsel %vm2407_vm13, %v2535_v1, 0.0  ;;  %v2045_v57 = vmul.f32 %v1918_v27, %v5876_v61  ;;  %v6054_v3 = vadd.f32 1e-30, %v6039_v39  ;;  %v6057_v19 = vadd.f32 %v3922_v47, %v1017_v8  ;;  %2758 = vst [vmem:[#allocation2 + $0x190] sm:$0xff] %v2694_v18  ;;  %vm6640_vm11 = vmmov %vm6631_vm9  ;;  %v2503_v61 = vld [vmem:[#allocation2 + $0x198] sm:$0xff]  ;;  %v777_v27 = vpop.f32.mrf.mxu1 }
 0x249   : > { %v2663_v21 = vadd.f32 %v2599_v37, %v2471_v43  ;;  %v2078_v49 = vsub.f32 1.0, %v2014_v0  ;;  %v1921_v31 = vmul.f32 %v6030_v29, %v1920_v9  ;;  %v1087_v53 = vadd.f32 %v3918_v46, %v1012_v30  ;;  %vm2408_vm8 = vmand %vm2342_vm14, %vm6640_vm11 }
 0x24a   : > { %v2109_v10 = vsub.f32 1.0, %v2045_v57  ;;  %3370 = vrsqrt.f32 %v6054_v3  ;;  %v1151_v50 = vmul.f32 2.0, %v709_v41  ;;  %v1088_v20 = vadd.f32 %v3922_v47, %v1012_v30  ;;  %vm2439_vm1 = vmand %vm6071_vm5, %vm2381_vm4  ;;  %v664_v30 = vpop.f32.mrf.mxu0 }
 0x24b   : > { %v6076_v2 = vpop.eup %3368  ;;  %2727 = vst [vmem:[#allocation2 + $0x1e8] sm:$0xff] %v2663_v21  ;;  %v2536_v46 = vmul.f32 %v2078_v49, %v2078_v49  ;;  %v1922_v58 = vmul.f32 0.5, %v1921_v31  ;;  %v1152_v60 = vmul.f32 2.0, %v822_v63  ;;  %v2131_v17 = vadd.s32 104, %v3959_v7 }
 0x24c   : > { %v2567_v35 = vmul.f32 %v2109_v10, %v2109_v10  ;;  %v1610_v44 = vmul.f32 %v6076_v2, %v6006_v28  ;;  %v1215_v6 = vsub.f32 %v1087_v53, %v1151_v50  ;;  %vm1926_vm9 = vweird.f32 %v6030_v29  ;;  %v2504_v53 = vld [vmem:[#allocation2 + $0x38] sm:$0xff] }
 0x24d   : > { %v2600_v23 = vsel %vm2408_vm8, %v2536_v46, 0.0  ;;  %v1923_v15 = vsub.f32 1.5, %v1922_v58  ;;  %v1216_v26 = vsub.f32 %v1088_v20, %v1152_v60  ;;  %vm1925_vm0 = vweird.f32 %v5969_v51 }
 0x24e   : > { %v2664_v34 = vadd.f32 %v2600_v23, %v2472_v24  ;;  %v2631_v40 = vsel %vm2439_vm1, %v2567_v35, 0.0  ;;  %v1611_v48 = vmul.f32 %v6076_v2, %v1610_v44  ;;  %v6090_v33 = vmax.f32 %v1215_v6, 0.0  ;;  %vm1927_vm7 = vmor %vm1925_vm0, %vm1926_vm9  ;;  %v712_v9 = vpop.f32.mrf.mxu2 }
 0x24f   : > { %v2695_v56 = vadd.f32 %v2631_v40, %v2503_v61  ;;  %v1924_v16 = vmul.f32 %v6030_v29, %v1923_v15  ;;  %v6094_v8 = vmax.f32 %v1216_v26, 0.0  ;;  %vm2246_vm6 = vcmp.lt.f32.partialorder %v5950_v12, 1.0 }
 0x250   : > { %v6096_v13 = vpop.eup %3370  ;;  %2728 = vst [vmem:[#allocation2 + $0xf8] sm:$0xff] %v2664_v34  ;;  %vm2310_vm2 = vcmp.gt.s32.totalorder %v4005_v38, %v5939_v36  ;;  %v1612_v55 = vmul.f32 0.5, %v1611_v48  ;;  %v6102_v11 = vadd.f32 1e-30, %v6090_v33  ;;  %v6106_v51 = vadd.s32 %v3975_v14, %v2131_v17  ;;  %v2473_v17 = vld [vmem:[#allocation2 + $0x160] sm:$0xff] }
 0x251   : > { %2759 = vst [vmem:[#allocation2 + $0x198] sm:$0xff] %v2695_v56  ;;  %v1928_v43 = vsel %vm1927_vm7, %v6030_v29, %v1924_v16  ;;  %v1620_v1 = vmul.f32 %v6096_v13, %v6054_v3  ;;  %v6111_v4 = vadd.f32 1e-30, %v6094_v8  ;;  %vm1616_vm10 = vweird.f32 %v6076_v2  ;;  %vm2374_vm3 = vmand %vm2246_vm6, %vm2310_vm2 }
 0x252   : > { %v2046_v18 = vmul.f32 %v1928_v43, %v5950_v12  ;;  %v1613_v0 = vsub.f32 1.5, %v1612_v55  ;;  %3372 = vrsqrt.f32 %v6102_v11  ;;  %vm2215_vm15 = vcmp.lt.f32.partialorder %v5992_v45, 1.0  ;;  %vm2440_vm8 = vmand %vm2374_vm3, %vm6640_vm11 }
 0x253   : > { %v1621_v29 = vmul.f32 %v6096_v13, %v1620_v1  ;;  %v2147_v41 = vadd.s32 232, %v3959_v7  ;;  %3374 = vrsqrt.f32 %v6111_v4  ;;  %vm1615_vm12 = vweird.f32 %v6006_v28 }
 0x254   : > { %v2110_v37 = vsub.f32 1.0, %v2046_v18  ;;  %v1614_v57 = vmul.f32 %v6076_v2, %v1613_v0  ;;  %v1121_v63 = vmul.f32 2.0, %v664_v30  ;;  %vm1617_vm13 = vmor %vm1615_vm12, %vm1616_vm10  ;;  %vm2279_vm14 = vcmp.gt.s32.totalorder %v3998_v32, %v6106_v51  ;;  %v825_v0 = vpop.f32.mrf.mxu3 }
 0x255   : > { %v1622_v21 = vmul.f32 0.5, %v1621_v29  ;;  %v1122_v49 = vmul.f32 2.0, %v777_v27  ;;  %v1153_v31 = vmul.f32 2.0, %v712_v9  ;;  %vm1625_vm5 = vweird.f32 %v6054_v3  ;;  %vm6152_vm9 = vmand %vm2215_vm15, %vm2279_vm14  ;;  %v2474_v27 = vld [vmem:[#allocation2 + $0x30] sm:$0xff] }
 0x256   : > { %v2568_v10 = vmul.f32 %v2110_v37, %v2110_v37  ;;  %v1618_v25 = vsel %vm1617_vm13, %v6076_v2, %v1614_v57  ;;  %v1185_v36 = vsub.f32 %v4564_v52, %v1121_v63  ;;  %vm1626_vm1 = vweird.f32 %v6096_v13  ;;  %vm2409_vm15 = vmand %vm6152_vm9, %vm2381_vm4  ;;  %v667_v63 = vpop.f32.mrf.mxu0  ;;  %v715_v35 = vpop.f32.mrf.mxu2 }
 0x257   : > { %v2015_v12 = vmul.f32 %v1618_v25, %v5992_v45  ;;  %v1623_v28 = vsub.f32 1.5, %v1622_v21  ;;  %v6137_v50 = vadd.s32 %v3975_v14, %v2147_v41  ;;  %v1186_v2 = vsub.f32 %v4576_v59, %v1122_v49  ;;  %vm1627_vm0 = vmor %vm1625_vm5, %vm1626_vm1 }
 0x258   : > { %v6139_v20 = vpop.eup %3372  ;;  %v2632_v24 = vsel %vm2440_vm8, %v2568_v10, 0.0  ;;  %v6141_v46 = vmax.f32 %v1185_v36, 0.0  ;;  %v1217_v52 = vsub.f32 %v6050_v54, %v1153_v31  ;;  %vm2216_vm7 = vcmp.lt.f32.partialorder %v6039_v39, 1.0 }
 0x259   : > { %v6145_v58 = vpop.eup %3374  ;;  %v2696_v60 = vadd.f32 %v2632_v24, %v2504_v53  ;;  %v2079_v61 = vsub.f32 1.0, %v2015_v12  ;;  %v1624_v44 = vmul.f32 %v6096_v13, %v1623_v28  ;;  %v1930_v59 = vmul.f32 %v6139_v20, %v6102_v11 }
 0x25a   : > { %vm2280_vm6 = vcmp.gt.s32.totalorder %v4005_v38, %v6106_v51  ;;  %v1940_v45 = vmul.f32 %v6145_v58, %v6111_v4  ;;  %v6167_v54 = vadd.f32 1e-30, %v6141_v46  ;;  %vm2247_vm2 = vcmp.lt.f32.partialorder %v6090_v33, 1.0 }
 0x25b   : > { %2760 = vst [vmem:[#allocation2 + $0x38] sm:$0xff] %v2696_v60  ;;  %v2537_v6 = vmul.f32 %v2079_v61, %v2079_v61  ;;  %v1628_v23 = vsel %vm1627_vm0, %v6096_v13, %v1624_v44  ;;  %v1931_v15 = vmul.f32 %v6139_v20, %v1930_v59  ;;  %vm2311_vm10 = vcmp.gt.s32.totalorder %v3998_v32, %v6137_v50  ;;  %vm2344_vm3 = vmand %vm2216_vm7, %vm2280_vm6  ;;  %v2505_v59 = vld [vmem:[#allocation2 + $0xc0] sm:$0xff] }
 0x25c   : > { %v2016_v3 = vmul.f32 %v1628_v23, %v6039_v39  ;;  %v1941_v26 = vmul.f32 %v6145_v58, %v1940_v45  ;;  %3376 = vrsqrt.f32 %v6167_v54  ;;  %v2132_v34 = vadd.s32 112, %v3959_v7  ;;  %vm2410_vm8 = vmand %vm2344_vm3, %vm6640_vm11 }
 0x25d   : > { %v2601_v40 = vsel %vm2409_vm15, %v2537_v6, 0.0  ;;  %v1932_v48 = vmul.f32 0.5, %v1931_v15  ;;  %v6182_v56 = vmax.f32 %v1186_v2, 0.0  ;;  %v6184_v16 = vmax.f32 %v1217_v52, 0.0  ;;  %vm6235_vm15 = vmand %vm2247_vm2, %vm2311_vm10  ;;  %v780_v2 = vpop.f32.mrf.mxu1  ;;  %v2506_v6 = vld [vmem:[#allocation2 + $0x1c0] sm:$0xff] }
 0x25e   : > { %v2665_v13 = vadd.f32 %v2601_v40, %v2473_v17  ;;  %v2080_v55 = vsub.f32 1.0, %v2016_v3  ;;  %v1942_v43 = vmul.f32 0.5, %v1941_v26  ;;  %vm2312_vm12 = vcmp.gt.s32.totalorder %v4005_v38, %v6137_v50  ;;  %vm2441_vm10 = vmand %vm6235_vm15, %vm2381_vm4 }
 0x25f   : > { %v1933_v1 = vsub.f32 1.5, %v1932_v48  ;;  %vm1936_vm13 = vweird.f32 %v6139_v20  ;;  %v6195_v30 = vadd.f32 1e-30, %v6182_v56  ;;  %v6198_v18 = vadd.f32 1e-30, %v6184_v16 }
 0x260   : > { %2729 = vst [vmem:[#allocation2 + $0x160] sm:$0xff] %v2665_v13  ;;  %v2538_v51 = vmul.f32 %v2080_v55, %v2080_v55  ;;  %vm1935_vm14 = vweird.f32 %v6102_v11  ;;  %v1943_v39 = vsub.f32 1.5, %v1942_v43  ;;  %vm1946_vm5 = vweird.f32 %v6145_v58 }
 0x261   : > { %v1934_v9 = vmul.f32 %v6139_v20, %v1933_v1  ;;  %vm1945_vm1 = vweird.f32 %v6111_v4  ;;  %v6207_v29 = vadd.s32 %v3975_v14, %v2132_v34  ;;  %3378 = vrsqrt.f32 %v6195_v30  ;;  %vm1937_vm9 = vmor %vm1935_vm14, %vm1936_vm13 }
 0x262   : > { %v6210_v41 = vpop.eup %3376  ;;  %v2602_v37 = vsel %vm2410_vm8, %v2538_v51, 0.0  ;;  %v1944_v11 = vmul.f32 %v6145_v58, %v1943_v39  ;;  %3380 = vrsqrt.f32 %v6198_v18  ;;  %v1154_v57 = vmul.f32 2.0, %v825_v0  ;;  %vm1947_vm0 = vmor %vm1945_vm1, %vm1946_vm5 }
 0x263   : > { %v2666_v21 = vadd.f32 %v2602_v37, %v2474_v27  ;;  %v1938_v4 = vsel %vm1937_vm9, %v6139_v20, %v1934_v9  ;;  %v1630_v49 = vmul.f32 %v6210_v41, %v6167_v54  ;;  %v2148_v31 = vadd.s32 240, %v3959_v7 }
 0x264   : > { %v2047_v53 = vmul.f32 %v1938_v4, %v6090_v33  ;;  %v1948_v10 = vsel %vm1947_vm0, %v6145_v58, %v1944_v11  ;;  %vm2248_vm7 = vcmp.lt.f32.partialorder %v6094_v8, 1.0  ;;  %v1218_v25 = vsub.f32 %v6057_v19, %v1154_v57 }
 0x265   : > { %2730 = vst [vmem:[#allocation2 + $0x30] sm:$0xff] %v2666_v21  ;;  %v2048_v36 = vmul.f32 %v1948_v10, %v6094_v8  ;;  %v1631_v12 = vmul.f32 %v6210_v41, %v1630_v49  ;;  %vm2281_vm6 = vcmp.gt.s32.totalorder %v3998_v32, %v6207_v29  ;;  %v1123_v28 = vmul.f32 2.0, %v667_v63  ;;  %vm6250_vm14 = vmand %vm2248_vm7, %vm2312_vm12 }
 0x266   : > { %v2111_v20 = vsub.f32 1.0, %v2047_v53  ;;  %vm1635_vm3 = vweird.f32 %v6167_v54  ;;  %vm2217_vm13 = vcmp.lt.f32.partialorder %v6141_v46, 1.0  ;;  %v6241_v19 = vmax.f32 %v1218_v25, 0.0  ;;  %vm6647_vm12 = vmmov %vm6640_vm11  ;;  %v2475_v53 = vld [vmem:[#allocation2 + $0x1e0] sm:$0xff] }
 0x267   : > { %v6243_v52 = vpop.eup %3378  ;;  %v2112_v58 = vsub.f32 1.0, %v2048_v36  ;;  %v1632_v60 = vmul.f32 0.5, %v1631_v12  ;;  %vm1636_vm2 = vweird.f32 %v6210_v41  ;;  %v6256_v61 = vadd.s32 %v3975_v14, %v2148_v31  ;;  %vm2442_vm5 = vmand %vm6250_vm14, %vm6647_vm12 }
 0x268   : > { %v6258_v44 = vpop.eup %3380  ;;  %v2569_v45 = vmul.f32 %v2111_v20, %v2111_v20  ;;  %v1640_v50 = vmul.f32 %v6243_v52, %v6195_v30  ;;  %v6263_v8 = vadd.f32 1e-30, %v6241_v19  ;;  %v1187_v17 = vsub.f32 %v4607_v22, %v1123_v28  ;;  %vm1637_vm8 = vmor %vm1635_vm3, %vm1636_vm2 }
 0x269   : > { %v2570_v23 = vmul.f32 %v2112_v58, %v2112_v58  ;;  %v1633_v15 = vsub.f32 1.5, %v1632_v60  ;;  %v1950_v3 = vmul.f32 %v6258_v44, %v6198_v18  ;;  %v1124_v26 = vmul.f32 2.0, %v780_v2  ;;  %vm6308_vm15 = vmand %vm2217_vm13, %vm2281_vm6  ;;  %v828_v60 = vpop.f32.mrf.mxu3 }
 0x26a   : > { %v2633_v34 = vsel %vm2441_vm10, %v2569_v45, 0.0  ;;  %v1641_v22 = vmul.f32 %v6243_v52, %v1640_v50  ;;  %vm2282_vm11 = vcmp.gt.s32.totalorder %v4005_v38, %v6207_v29  ;;  %3382 = vrsqrt.f32 %v6263_v8  ;;  %vm2411_vm10 = vmand %vm6308_vm15, %vm2381_vm4  ;;  %v2476_v29 = vld [vmem:[#allocation2] sm:$0xff] }
 0x26b   : > { %v1155_v40 = vmul.f32 2.0, %v715_v35  ;;  %v2697_v48 = vadd.f32 %v2633_v34, %v2505_v59  ;;  %v2634_v13 = vsel %vm2442_vm5, %v2570_v23, 0.0  ;;  %v1634_v55 = vmul.f32 %v6210_v41, %v1633_v15 }
 0x26c   : > { %v1951_v43 = vmul.f32 %v6258_v44, %v1950_v3  ;;  %v2698_v1 = vadd.f32 %v2634_v13, %v2506_v6  ;;  %v1642_v0 = vmul.f32 0.5, %v1641_v22  ;;  %vm2218_vm1 = vcmp.lt.f32.partialorder %v6182_v56, 1.0 }
 0x26d   : > { %v6287_v27 = vmax.f32 %v1187_v17, 0.0  ;;  %2761 = vst [vmem:[#allocation2 + $0xc0] sm:$0xff] %v2697_v48  ;;  %v1638_v51 = vsel %vm1637_vm8, %v6210_v41, %v1634_v55  ;;  %vm2249_vm9 = vcmp.lt.f32.partialorder %v6184_v16, 1.0  ;;  %v1188_v9 = vsub.f32 %v4693_v42, %v1124_v26  ;;  %vm2346_vm12 = vmand %vm2218_vm1, %vm2282_vm11 }
 0x26e   : > { %v1952_v39 = vmul.f32 0.5, %v1951_v43  ;;  %2762 = vst [vmem:[#allocation2 + $0x1c0] sm:$0xff] %v2698_v1  ;;  %v2017_v37 = vmul.f32 %v1638_v51, %v6141_v46  ;;  %v1643_v11 = vsub.f32 1.5, %v1642_v0  ;;  %vm1646_vm0 = vweird.f32 %v6243_v52 }
 0x26f   : > { %v6295_v54 = vadd.f32 1e-30, %v6287_v27  ;;  %vm1956_vm7 = vweird.f32 %v6258_v44  ;;  %v6298_v63 = vmax.f32 %v1188_v9, 0.0  ;;  %v1219_v41 = vsub.f32 %v5760_v5, %v1155_v40 }
 0x270   : > { %v1953_v57 = vsub.f32 1.5, %v1952_v39  ;;  %v6301_v21 = vpop.eup %3382  ;;  %v2081_v4 = vsub.f32 1.0, %v2017_v37  ;;  %v1644_v49 = vmul.f32 %v6243_v52, %v1643_v11  ;;  %vm1645_vm3 = vweird.f32 %v6195_v30 }
 0x271   : > { %3384 = vrsqrt.f32 %v6295_v54  ;;  %vm1647_vm14 = vmor %vm1645_vm3, %vm1646_vm0  ;;  %vm1955_vm2 = vweird.f32 %v6198_v18  ;;  %v1960_v31 = vmul.f32 %v6301_v21, %v6263_v8  ;;  %v6320_v46 = vadd.f32 1e-30, %v6298_v63 }
 0x272   : > { %v1954_v5 = vmul.f32 %v6258_v44, %v1953_v57  ;;  %v2539_v10 = vmul.f32 %v2081_v4, %v2081_v4  ;;  %v1648_v25 = vsel %vm1647_vm14, %v6243_v52, %v1644_v49  ;;  %vm1957_vm6 = vmor %vm1955_vm2, %vm1956_vm7  ;;  %vm2313_vm13 = vcmp.gt.s32.totalorder %v3998_v32, %v6256_v61 }
 0x273   : > { %v6327_v30 = vmax.f32 %v1219_v41, 0.0  ;;  %v2018_v18 = vmul.f32 %v1648_v25, %v6182_v56  ;;  %v1961_v12 = vmul.f32 %v6301_v21, %v1960_v31  ;;  %3386 = vrsqrt.f32 %v6320_v46  ;;  %vm6354_vm5 = vmand %vm2249_vm9, %vm2313_vm13 }
 0x274   : > { %v1958_v36 = vsel %vm1957_vm6, %v6258_v44, %v1954_v5  ;;  %v2603_v28 = vsel %vm2411_vm10, %v2539_v10, 0.0  ;;  %v2133_v24 = vadd.s32 120, %v3959_v7  ;;  %vm1966_vm11 = vweird.f32 %v6301_v21  ;;  %vm2443_vm9 = vmand %vm6354_vm5, %vm2381_vm4 }
 0x275   : > { %v2049_v20 = vmul.f32 %v1958_v36, %v6184_v16  ;;  %v6340_v2 = vadd.f32 1e-30, %v6327_v30  ;;  %v2667_v52 = vadd.f32 %v2603_v28, %v2475_v53  ;;  %v2082_v58 = vsub.f32 1.0, %v2018_v18  ;;  %v2507_v16 = vld [vmem:[#allocation2 + $0x158] sm:$0xff] }
 0x276   : > { %v1962_v33 = vmul.f32 0.5, %v1961_v12  ;;  %v1092_v17 = vadd.f32 %v3922_v47, %v5726_v62  ;;  %vm6652_vm8 = vcmp.lt.s32.totalorder %v4005_v38, 500  ;;  %v2166_v23 = vadd.s32 %v3975_v14, %v2133_v24 }
 0x277   : > { %v6347_v35 = vpop.eup %3384  ;;  %v2113_v44 = vsub.f32 1.0, %v2049_v20  ;;  %3388 = vrsqrt.f32 %v6340_v2  ;;  %2731 = vst [vmem:[#allocation2 + $0x1e0] sm:$0xff] %v2667_v52  ;;  %v2540_v56 = vmul.f32 %v2082_v58, %v2082_v58  ;;  %vm2412_vm1 = vmand %vm2346_vm12, %vm6652_vm8  ;;  %v1156_v15 = vmul.f32 2.0, %v828_v60 }
 0x278   : > { %v1963_v45 = vsub.f32 1.5, %v1962_v33  ;;  %v1650_v50 = vmul.f32 %v6347_v35, %v6295_v54  ;;  %vm1965_vm0 = vweird.f32 %v6263_v8  ;;  %vm2314_vm15 = vcmp.gt.s32.totalorder %v4005_v38, %v6256_v61 }
 0x279   : > { %v2571_v6 = vmul.f32 %v2113_v44, %v2113_v44  ;;  %v3387_v3 = vpop.eup %3386  ;;  %v2604_v26 = vsel %vm2412_vm1, %v2540_v56, 0.0  ;;  %vm1967_vm7 = vmor %vm1965_vm0, %vm1966_vm11  ;;  %vm2250_vm3 = vcmp.lt.f32.partialorder %v6241_v19, 1.0  ;;  %vm2283_vm14 = vcmp.gt.s32.totalorder %v3998_v32, %v2166_v23 }
 0x27a   : > { %v1964_v34 = vmul.f32 %v6301_v21, %v1963_v45  ;;  %v1651_v47 = vmul.f32 %v6347_v35, %v1650_v50  ;;  %v2668_v62 = vadd.f32 %v2604_v26, %v2476_v29  ;;  %v1660_v40 = vmul.f32 %v3387_v3, %v6320_v46  ;;  %vm2378_vm13 = vmand %vm2250_vm3, %vm2314_vm15  ;;  %v2509_v45 = vld [vmem:[#allocation2 + $0x58] sm:$0xff] }
 0x27b   : > { %v2635_v22 = vsel %vm2443_vm9, %v2571_v6, 0.0  ;;  %v1220_v0 = vsub.f32 %v1092_v17, %v1156_v15  ;;  %vm1656_vm2 = vweird.f32 %v6347_v35  ;;  %vm2219_vm6 = vcmp.lt.f32.partialorder %v6287_v27, 1.0  ;;  %vm2444_vm1 = vmand %vm2378_vm13, %vm6652_vm8 }
 0x27c   : > { %v2699_v48 = vadd.f32 %v2635_v22, %v2507_v16  ;;  %v1968_v13 = vsel %vm1967_vm7, %v6301_v21, %v1964_v34  ;;  %v1652_v55 = vmul.f32 0.5, %v1651_v47  ;;  %2732 = vst [vmem:[#allocation2] sm:$0xff] %v2668_v62  ;;  %v1661_v1 = vmul.f32 %v3387_v3, %v1660_v40  ;;  %v2508_v21 = vld [vmem:[#allocation2 + $0x10] sm:$0xff]  ;;  %vm2347_vm3 = vmand %vm2219_vm6, %vm2283_vm14 }
 0x27d   : > { %v3389_v43 = vpop.eup %3388  ;;  %v2050_v8 = vmul.f32 %v1968_v13, %v6241_v19  ;;  %vm2284_vm10 = vcmp.gt.s32.totalorder %v4005_v38, %v2166_v23  ;;  %v6390_v19 = vmax.f32 %v1220_v0, 0.0  ;;  %vm1655_vm12 = vweird.f32 %v6295_v54  ;;  %vm2413_vm14 = vmand %vm2347_vm3, %vm2381_vm4 }
 0x27e   : > { %2763 = vst [vmem:[#allocation2 + $0x158] sm:$0xff] %v2699_v48  ;;  %v1653_v51 = vsub.f32 1.5, %v1652_v55  ;;  %v1970_v39 = vmul.f32 %v3389_v43, %v6340_v2  ;;  %v1662_v37 = vmul.f32 0.5, %v1661_v1  ;;  %v2149_v41 = vadd.s32 248, %v3959_v7  ;;  %vm1657_vm5 = vmor %vm1655_vm12, %vm1656_vm2 }
 0x27f   : > { %v2114_v9 = vsub.f32 1.0, %v2050_v8  ;;  %vm1666_vm11 = vweird.f32 %v3387_v3  ;;  %v1348_v61 = vadd.f32 1e-30, %v6390_v19  ;;  %vm1665_vm9 = vweird.f32 %v6320_v46 }
 0x280   : > { %v1654_v11 = vmul.f32 %v6347_v35, %v1653_v51  ;;  %v1971_v57 = vmul.f32 %v3389_v43, %v1970_v39  ;;  %v1663_v42 = vsub.f32 1.5, %v1662_v37  ;;  %vm2220_vm0 = vcmp.lt.f32.partialorder %v6298_v63, 1.0  ;;  %vm1667_vm7 = vmor %vm1665_vm9, %vm1666_vm11 }
 0x281   : > { %v2572_v4 = vmul.f32 %v2114_v9, %v2114_v9  ;;  %3390 = vrsqrt.f32 %v1348_v61  ;;  %vm1976_vm15 = vweird.f32 %v3389_v43  ;;  %v2182_v25 = vadd.s32 %v3975_v14, %v2149_v41  ;;  %vm6412_vm2 = vmand %vm2220_vm0, %vm2284_vm10  ;;  %v2477_v14 = vld [vmem:[#allocation2 + $0xf0] sm:$0xff] }
 0x282   : > { %v1658_v49 = vsel %vm1657_vm5, %v6347_v35, %v1654_v11  ;;  %v1972_v54 = vmul.f32 0.5, %v1971_v57  ;;  %v1664_v31 = vmul.f32 %v3387_v3, %v1663_v42  ;;  %vm1975_vm13 = vweird.f32 %v6340_v2  ;;  %vm6655_vm10 = vmmov %vm6652_vm8  ;;  %v2478_v2 = vld [vmem:[#allocation2 + $0x8] sm:$0xff] }
 0x283   : > { %v2636_v5 = vsel %vm2444_vm1, %v2572_v4, 0.0  ;;  %v2019_v7 = vmul.f32 %v1658_v49, %v6287_v27  ;;  %vm1977_vm12 = vmor %vm1975_vm13, %vm1976_vm15  ;;  %vm2251_vm6 = vcmp.lt.f32.partialorder %v6327_v30, 1.0  ;;  %vm2315_vm5 = vcmp.gt.s32.totalorder %v3998_v32, %v2182_v25  ;;  %v2510_v32 = vld [vmem:[#allocation2 + $0xa0] sm:$0xff] }
 0x284   : > { %v2700_v53 = vadd.f32 %v2636_v5, %v2508_v21  ;;  %v1973_v10 = vsub.f32 1.5, %v1972_v54  ;;  %v1668_v46 = vsel %vm1667_vm7, %v3387_v3, %v1664_v31  ;;  %vm2414_vm11 = vmand %vm6412_vm2, %vm6655_vm10  ;;  %vm1985_vm0 = vweird.f32 %v1348_v61 }
 0x285   : > { %v2083_v18 = vsub.f32 1.0, %v2019_v7  ;;  %v2020_v36 = vmul.f32 %v1668_v46, %v6298_v63  ;;  %vm2379_vm8 = vmand %vm2251_vm6, %vm2315_vm5  ;;  %vm2252_vm15 = vcmp.lt.f32.partialorder %v6390_v19, 1.0  ;;  %vm2316_vm3 = vcmp.gt.s32.totalorder %v4005_v38, %v2182_v25 }
 0x286   : > { %2764 = vst [vmem:[#allocation2 + $0x10] sm:$0xff] %v2700_v53  ;;  %v1974_v28 = vmul.f32 %v3389_v43, %v1973_v10  ;;  %vm2445_vm1 = vmand %vm2379_vm8, %vm2381_vm4 }
 0x287   : > { %v2541_v20 = vmul.f32 %v2083_v18, %v2083_v18  ;;  %v2084_v27 = vsub.f32 1.0, %v2020_v36  ;;  %v3391_v63 = vpop.eup %3390  ;;  %vm2380_vm2 = vmand %vm2252_vm15, %vm2316_vm3 }
 0x288   : > { %v1978_v24 = vsel %vm1977_vm12, %v3389_v43, %v1974_v28  ;;  %v1980_v35 = vmul.f32 %v3391_v63, %v1348_v61  ;;  %vm1986_vm9 = vweird.f32 %v3391_v63  ;;  %vm6656_vm4 = vmmov %vm6655_vm10 }
 0x289   : > { %v2605_v52 = vsel %vm2413_vm14, %v2541_v20, 0.0  ;;  %v2051_v58 = vmul.f32 %v1978_v24, %v6327_v30  ;;  %v2542_v60 = vmul.f32 %v2084_v27, %v2084_v27  ;;  %vm1987_vm7 = vmor %vm1985_vm0, %vm1986_vm9 }
 0x28a   : > { %v2669_v33 = vadd.f32 %v2605_v52, %v2477_v14  ;;  %v1981_v29 = vmul.f32 %v3391_v63, %v1980_v35  ;;  %vm2446_vm13 = vmand %vm2380_vm2, %vm6656_vm4 }
 0x28b   : > { %v2115_v44 = vsub.f32 1.0, %v2051_v58  ;;  %v2606_v59 = vsel %vm2414_vm11, %v2542_v60, 0.0 }
 0x28c   : > { %2733 = vst [vmem:[#allocation2 + $0xf0] sm:$0xff] %v2669_v33  ;;  %v2670_v56 = vadd.f32 %v2606_v59, %v2478_v2  ;;  %v1982_v30 = vmul.f32 0.5, %v1981_v29 }
 0x28d   : > { %v2573_v50 = vmul.f32 %v2115_v44, %v2115_v44 }
 0x28e   : > { %2734 = vst [vmem:[#allocation2 + $0x8] sm:$0xff] %v2670_v56  ;;  %v1983_v6 = vsub.f32 1.5, %v1982_v30 }
 0x28f   : > { %v2637_v17 = vsel %vm2445_vm1, %v2573_v50, 0.0 }
 0x290   : > { %v2701_v16 = vadd.f32 %v2637_v17, %v2509_v45  ;;  %v1984_v23 = vmul.f32 %v3391_v63, %v1983_v6 }
 0x292   : > { %2765 = vst [vmem:[#allocation2 + $0x58] sm:$0xff] %v2701_v16  ;;  %v1988_v15 = vsel %vm1987_vm7, %v3391_v63, %v1984_v23 }
 0x293   : > { %v2052_v3 = vmul.f32 %v1988_v15, %v6390_v19 }
 0x295   : > { %v2116_v26 = vsub.f32 1.0, %v2052_v3 }
 0x297   : > { %v2574_v34 = vmul.f32 %v2116_v26, %v2116_v26 }
 0x299   : > { %v2638_v47 = vsel %vm2446_vm13, %v2574_v34, 0.0 }
 0x29a   : > { %v2702_v62 = vadd.f32 %v2638_v47, %v2510_v32 }
 0x29c   : > { %2766 = vst [vmem:[#allocation2 + $0xa0] sm:$0xff] %v2702_v62 }
 0x29d PF: > { %p3149_p4 = scmp.ne.s32.totalorder %s3470_s18, 1 }
 0x29f   : > { %2770 = sbr.rel (%p3149_p4) target bundleno = 985 (0x3d9), region = 48 }
 0x2a4   : > { %v2771_v22 = vld [vmem:[#allocation2 + $0xb0] sm:$0xff]  ;;  %v2773_v48 = vld [vmem:[#allocation2 + $0xd8] sm:$0xff]  ;;  %v2776_v0 = vld [vmem:[#allocation2 + $0x168] sm:$0xff] }
 0x2a5   : > { %v2772_v40 = vld [vmem:[#allocation2 + $0x1b0] sm:$0xff]  ;;  %v2774_v55 = vld [vmem:[#allocation2 + $0x18] sm:$0xff]  ;;  %v2778_v9 = vld [vmem:[#allocation2 + $0x48] sm:$0xff] }
 0x2a6   : > { %v2835_v13 = vadd.f32 %v2772_v40, %v2771_v22  ;;  %v2775_v8 = vld [vmem:[#allocation2 + $0x50] sm:$0xff]  ;;  %v2779_v19 = vld [vmem:[#allocation2 + $0x180] sm:$0xff]  ;;  %v2781_v21 = vld [vmem:[#allocation2 + $0x118] sm:$0xff] }
 0x2a7   : > { %v2777_v39 = vld [vmem:[#allocation2 + $0x130] sm:$0xff]  ;;  %v2782_v42 = vld [vmem:[#allocation2 + $0x98] sm:$0xff]  ;;  %v2783_v49 = vld [vmem:[#allocation2 + $0x120] sm:$0xff] }
 0x2a8   : > { %v2836_v43 = vadd.f32 %v2835_v13, %v2773_v48  ;;  %v2780_v57 = vld [vmem:[#allocation2 + $0x110] sm:$0xff]  ;;  %v2785_v31 = vld [vmem:[#allocation2 + $0x108] sm:$0xff]  ;;  %v2786_v10 = vld [vmem:[#allocation2 + $0x60] sm:$0xff] }
 0x2a9   : > { %v2784_v5 = vld [vmem:[#allocation2 + $0x150] sm:$0xff]  ;;  %v2787_v18 = vld [vmem:[#allocation2 + $0xe0] sm:$0xff]  ;;  %v2788_v36 = vld [vmem:[#allocation2 + $0x188] sm:$0xff] }
 0x2aa   : > { %v2837_v1 = vadd.f32 %v2836_v43, %v2774_v55  ;;  %v2789_v28 = vld [vmem:[#allocation2 + $0x138] sm:$0xff]  ;;  %v2790_v20 = vld [vmem:[#allocation2 + $0x140] sm:$0xff]  ;;  %v2792_v52 = vld [vmem:[#allocation2 + $0x1a8] sm:$0xff] }
 0x2ab   : > { %v2791_v24 = vld [vmem:[#allocation2 + $0x80] sm:$0xff]  ;;  %v2793_v33 = vld [vmem:[#allocation2 + $0x1b8] sm:$0xff]  ;;  %v2794_v60 = vld [vmem:[#allocation2 + $0x28] sm:$0xff] }
 0x2ac   : > { %v2838_v51 = vadd.f32 %v2837_v1, %v2775_v8  ;;  %v2795_v44 = vld [vmem:[#allocation2 + $0x1e8] sm:$0xff]  ;;  %v2796_v29 = vld [vmem:[#allocation2 + $0xf8] sm:$0xff]  ;;  %v2797_v45 = vld [vmem:[#allocation2 + $0x160] sm:$0xff] }
 0x2ad   : > { %v2798_v30 = vld [vmem:[#allocation2 + $0x30] sm:$0xff]  ;;  %v2799_v16 = vld [vmem:[#allocation2 + $0x1e0] sm:$0xff]  ;;  %v2802_v32 = vld [vmem:[#allocation2 + $0x8] sm:$0xff] }
 0x2ae   : > { %v2839_v38 = vadd.f32 %v2838_v51, %v2776_v0  ;;  %v2800_v23 = vld [vmem:[#allocation2] sm:$0xff]  ;;  %v2801_v3 = vld [vmem:[#allocation2 + $0xf0] sm:$0xff]  ;;  %v2803_v47 = vld [vmem:[#allocation2 + $0x148] sm:$0xff] }
 0x2af   : > { %v2804_v22 = vld [vmem:[#allocation2 + $0x1d0] sm:$0xff]  ;;  %v2805_v48 = vld [vmem:[#allocation2 + $0x100] sm:$0xff]  ;;  %v2806_v55 = vld [vmem:[#allocation2 + $0xc8] sm:$0xff] }
 0x2b0   : > { %v2840_v37 = vadd.f32 %v2839_v38, %v2777_v39  ;;  %v2807_v8 = vld [vmem:[#allocation2 + $0x40] sm:$0xff]  ;;  %v2808_v0 = vld [vmem:[#allocation2 + $0x1f8] sm:$0xff] }
 0x2b1   : > { %v2809_v39 = vld [vmem:[#allocation2 + $0x20] sm:$0xff] }
 0x2b2   : > { %v2841_v11 = vadd.f32 %v2840_v37, %v2778_v9  ;;  %v2810_v9 = vld [vmem:[#allocation2 + $0x128] sm:$0xff] }
 0x2b4   : > { %v2842_v41 = vadd.f32 %v2841_v11, %v2779_v19  ;;  %v2811_v19 = vld [vmem:[#allocation2 + $0x1a0] sm:$0xff] }
 0x2b6   : > { %v2843_v4 = vadd.f32 %v2842_v41, %v2780_v57  ;;  %v2812_v57 = vld [vmem:[#allocation2 + $0x1f0] sm:$0xff] }
 0x2b8   : > { %v2844_v61 = vadd.f32 %v2843_v4, %v2781_v21  ;;  %v2813_v21 = vld [vmem:[#allocation2 + $0xe8] sm:$0xff] }
 0x2ba   : > { %v2845_v54 = vadd.f32 %v2844_v61, %v2782_v42  ;;  %v2814_v42 = vld [vmem:[#allocation2 + $0x78] sm:$0xff] }
 0x2bc   : > { %v2846_v7 = vadd.f32 %v2845_v54, %v2783_v49  ;;  %v2815_v49 = vld [vmem:[#allocation2 + $0x70] sm:$0xff] }
 0x2be   : > { %v2847_v53 = vadd.f32 %v2846_v7, %v2784_v5  ;;  %v2816_v5 = vld [vmem:[#allocation2 + $0x90] sm:$0xff] }
 0x2c0   : > { %v2848_v25 = vadd.f32 %v2847_v53, %v2785_v31  ;;  %v2817_v31 = vld [vmem:[#allocation2 + $0x1d8] sm:$0xff] }
 0x2c2   : > { %v2849_v46 = vadd.f32 %v2848_v25, %v2786_v10  ;;  %v2818_v10 = vld [vmem:[#allocation2 + $0xd0] sm:$0xff] }
 0x2c4   : > { %v2850_v12 = vadd.f32 %v2849_v46, %v2787_v18  ;;  %v2819_v18 = vld [vmem:[#allocation2 + $0xb8] sm:$0xff] }
 0x2c6   : > { %v2851_v14 = vadd.f32 %v2850_v12, %v2788_v36  ;;  %v2820_v36 = vld [vmem:[#allocation2 + $0x88] sm:$0xff] }
 0x2c8   : > { %v2852_v27 = vadd.f32 %v2851_v14, %v2789_v28  ;;  %v2821_v28 = vld [vmem:[#allocation2 + $0xa8] sm:$0xff] }
 0x2ca   : > { %v2853_v63 = vadd.f32 %v2852_v27, %v2790_v20  ;;  %v2822_v20 = vld [vmem:[#allocation2 + $0x1c8] sm:$0xff] }
 0x2cc   : > { %v2854_v58 = vadd.f32 %v2853_v63, %v2791_v24  ;;  %v2823_v24 = vld [vmem:[#allocation2 + $0x170] sm:$0xff] }
 0x2ce   : > { %v2855_v2 = vadd.f32 %v2854_v58, %v2792_v52  ;;  %v2824_v52 = vld [vmem:[#allocation2 + $0x178] sm:$0xff] }
 0x2d0   : > { %v2856_v35 = vadd.f32 %v2855_v2, %v2793_v33  ;;  %v2825_v33 = vld [vmem:[#allocation2 + $0x68] sm:$0xff] }
 0x2d2   : > { %v2857_v59 = vadd.f32 %v2856_v35, %v2794_v60  ;;  %v2826_v60 = vld [vmem:[#allocation2 + $0x190] sm:$0xff] }
 0x2d4   : > { %v2858_v56 = vadd.f32 %v2857_v59, %v2795_v44  ;;  %v2827_v44 = vld [vmem:[#allocation2 + $0x198] sm:$0xff] }
 0x2d6   : > { %v2859_v50 = vadd.f32 %v2858_v56, %v2796_v29  ;;  %v2828_v29 = vld [vmem:[#allocation2 + $0x38] sm:$0xff] }
 0x2d8   : > { %v2860_v17 = vadd.f32 %v2859_v50, %v2797_v45  ;;  %v2829_v45 = vld [vmem:[#allocation2 + $0xc0] sm:$0xff] }
 0x2da   : > { %v2861_v6 = vadd.f32 %v2860_v17, %v2798_v30  ;;  %v2830_v30 = vld [vmem:[#allocation2 + $0x1c0] sm:$0xff] }
 0x2dc   : > { %v2862_v15 = vadd.f32 %v2861_v6, %v2799_v16  ;;  %v2831_v16 = vld [vmem:[#allocation2 + $0x158] sm:$0xff] }
 0x2de   : > { %v2863_v26 = vadd.f32 %v2862_v15, %v2800_v23  ;;  %v2832_v23 = vld [vmem:[#allocation2 + $0x10] sm:$0xff] }
 0x2e0   : > { %v2864_v34 = vadd.f32 %v2863_v26, %v2801_v3  ;;  %v2833_v3 = vld [vmem:[#allocation2 + $0x58] sm:$0xff] }
 0x2e2   : > { %v2865_v62 = vadd.f32 %v2864_v34, %v2802_v32  ;;  %v2834_v32 = vld [vmem:[#allocation2 + $0xa0] sm:$0xff] }
 0x2e4   : > { %v2866_v40 = vadd.f32 %v2865_v62, %v2803_v47 }
 0x2e6   : > { %v2867_v13 = vadd.f32 %v2866_v40, %v2804_v22 }
 0x2e8   : > { %v2868_v43 = vadd.f32 %v2867_v13, %v2805_v48 }
 0x2ea   : > { %v2869_v1 = vadd.f32 %v2868_v43, %v2806_v55 }
 0x2ec   : > { %v2870_v51 = vadd.f32 %v2869_v1, %v2807_v8  ;;  %v2907_v8 = vlaneseq }
 0x2ee   : > { %v2871_v38 = vadd.f32 %v2870_v51, %v2808_v0  ;;  %v2908_v1 = vshrl.u32 %v2907_v8, 7  ;;  %v2910_v0 = vand.u32 127, %v2907_v8 }
 0x2f0   : > { %v2872_v37 = vadd.f32 %v2871_v38, %v2809_v39  ;;  %vm2911_vm12 = vcmp.eq.s32.totalorder %v2908_v1, 0  ;;  %vm2912_vm14 = vcmp.eq.s32.totalorder %v2910_v0, 0 }
 0x2f1   : > { %vm2913_vm6 = vmand %vm2911_vm12, %vm2912_vm14 }
 0x2f2   : > { %v2873_v11 = vadd.f32 %v2872_v37, %v2810_v9 }
 0x2f4   : > { %v2874_v41 = vadd.f32 %v2873_v11, %v2811_v19 }
 0x2f6   : > { %v2875_v4 = vadd.f32 %v2874_v41, %v2812_v57 }
 0x2f8   : > { %v2876_v61 = vadd.f32 %v2875_v4, %v2813_v21 }
 0x2fa   : > { %v2877_v54 = vadd.f32 %v2876_v61, %v2814_v42 }
 0x2fc   : > { %v2878_v7 = vadd.f32 %v2877_v54, %v2815_v49 }
 0x2fe   : > { %v2879_v53 = vadd.f32 %v2878_v7, %v2816_v5 }
 0x300   : > { %v2880_v25 = vadd.f32 %v2879_v53, %v2817_v31 }
 0x302   : > { %v2881_v46 = vadd.f32 %v2880_v25, %v2818_v10 }
 0x304   : > { %v2882_v12 = vadd.f32 %v2881_v46, %v2819_v18 }
 0x306   : > { %v2883_v14 = vadd.f32 %v2882_v12, %v2820_v36 }
 0x308   : > { %v2884_v27 = vadd.f32 %v2883_v14, %v2821_v28 }
 0x30a   : > { %v2885_v63 = vadd.f32 %v2884_v27, %v2822_v20 }
 0x30c   : > { %v2886_v58 = vadd.f32 %v2885_v63, %v2823_v24 }
 0x30e   : > { %v2887_v2 = vadd.f32 %v2886_v58, %v2824_v52 }
 0x310   : > { %v2888_v35 = vadd.f32 %v2887_v2, %v2825_v33 }
 0x312   : > { %v2889_v59 = vadd.f32 %v2888_v35, %v2826_v60 }
 0x314   : > { %v2890_v56 = vadd.f32 %v2889_v59, %v2827_v44 }
 0x316   : > { %v2891_v50 = vadd.f32 %v2890_v56, %v2828_v29 }
 0x318   : > { %v2892_v17 = vadd.f32 %v2891_v50, %v2829_v45 }
 0x31a   : > { %v2893_v6 = vadd.f32 %v2892_v17, %v2830_v30 }
 0x31c   : > { %v2894_v15 = vadd.f32 %v2893_v6, %v2831_v16 }
 0x31e   : > { %v2895_v26 = vadd.f32 %v2894_v15, %v2832_v23 }
 0x320   : > { %v2896_v34 = vadd.f32 %v2895_v26, %v2833_v3 }
 0x322   : > { %v2897_v47 = vadd.f32 %v2896_v34, %v2834_v32 }
 0x324   : > { %2898 = vadd.xlane.f32.xlu0 %v2897_v47 }
 0x397   : > { %v2899_v62 = vpop.xlane.xlu0 %2898 }
 0x398   : > { %v2900_v22 = vrot.slane %v2899_v62, 4 }
 0x39a   : > { %v2901_v40 = vadd.f32 %v2900_v22, %v2899_v62 }
 0x39c   : > { %v2902_v48 = vrot.slane %v2901_v40, 2 }
 0x39e   : > { %v2903_v13 = vadd.f32 %v2902_v48, %v2901_v40 }
 0x3a0   : > { %v2904_v55 = vrot.slane %v2903_v13, 1 }
 0x3a2   : > { %v2905_v43 = vadd.f32 %v2904_v55, %v2903_v13 }
 0x3a4   : > { %3186 = vpush %v2905_v43 }
 0x3d5   : > { %s3187_s18 = spop %3186 }
 0x3d6   : > { %v2914_v51 = vstv %s3187_s18 }
 0x3d7   : > { %v2915_v39 = vsel %vm2913_vm6, %v2914_v51, 0.0 }
 0x3d8   : > { %2916 = vst [vmem:[%s249_s13] sm:$0xff] %v2915_v39 }
 0x3d9 PF: > { %s3151_s10 = sshll.u32 %s3474_s19, 3  ;;  %s2930_s24 = sshll.u32 %s249_s13, 4  ;;  %s2931_s24 = int_to_ptr.vmem [resolvable:$true] %s2930_s24 }
 0x3da   : > { %s2928_s23 = scalar_lea.hbm %s6486_s4, %s3151_s10  ;;  %s6657_s30 = sand.u32 1, %s3462_s16  }
 0x3db   : > { %s2932_s29 = sshll.u32 %s2928_s23, 4  ;;  %s2918_s7 = scalar_lea.sflag [#allocation4], %s6657_s30  ;;  %s2933_s29 = int_to_ptr.hbm [resolvable:$true] %s2932_s29 }
 0x3dc   : > { %s3406_s12 = sshra.s32 %s2933_s29, 4  ;;  %s3412_s26 = scalar_lea.hbm %s6486_s4, 16  ;;  %s3407_s12 = int_to_ptr.hbm [resolvable:$true] %s3406_s12 }
 0x3dd   : > { %s3408_s21 = scalar_lea.hbm %s3407_s12, 8  ;;  %p3413_p8 = scmp.lt.s32.totalorder %s3407_s12, %s6486_s4 }
 0x3de   : > { %p3409_p5 = scmp.ne.s32.totalorder %s3407_s12, %s3408_s21  ;;  %p3414_p10 = scmp.lt.s32.totalorder %s3412_s26, %s3408_s21 }
 0x3e0   : > { %p3410_p6 = pnand %p3409_p5, %p3564_p3  ;;  %p3415_p11 = por %p3414_p10, %p3413_p8 }
 0x3e2   : > { %p3411_p7 = pneg %p3410_p6 }
 0x3e4   : > { %p3416_p12 = pnand %p3415_p11, %p3411_p7 }
 0x3e6   : > { %3419 = shalt.err (!%p3416_p12)
}
 0x3e7   : > { %3188 = dma.vmem_to_hbm [thread:$0]  (%p3564_p3), %s2931_s24, 128, %s2933_s29, %s2918_s7  }
 0x3e8 PF: > { %p3194_p13 = scmp.ge.s32.totalorder %s3486_s22, 2  ;;  %s2944_s8 = sand.u32 1, %s3458_s15  }
 0x3e9   : > { %s2945_s13 = scalar_lea.sflag [#allocation4], %s2944_s8 }
 0x3ea   : > { %p3191_p0 = pnand %p3194_p13, %p3574_p9 }
 0x3ec   : > { %p3192_p1 = pneg %p3191_p0 }
 0x3ee   : > { %3453 = dma.done.wait (%p3192_p1), %s2945_s13, 128  }
 0x3ef   : > { %3455 = vsyncadd (%p3192_p1), %s2945_s13, 4294967168  ;;  %s17_s22 = sadd.s32 1, %s3486_s22   ;;  %s6658_s19 = sld [smem:[#allocation6_spill]] }
 0x3f0   : > { %p14_p2 = scmp.ge.s32.totalorder %s17_s22, 6   ;;  %s6659_s27 = sld [smem:[#allocation7_spill]] }
 0x3f1   : > { %s6660_s21 = sld [smem:[#allocation8_spill]]  ;;  %s6661_s15 = smov %s3462_s16 }
 0x3f2   : > { %s6662_s16 = smov %s3466_s17  ;;  %s6663_s17 = smov %s3582_s5 }
 0x3f3   : > { %s6664_s18 = smov %s3478_s20  ;;  %16 = sbr.rel (!%p14_p2) target bundleno = 5 (0x5), region = 92 }
 0x3f6   : > { %s6665_s20 = smov %s6659_s27 }
 0x3f8   :  { %2951 = vsyncpa [#allocation4], 1 }
 0x3f9   :  { %2953 = vsyncpa [#allocation4 + $0x1], 1 }

</bundles_post_ra>
